<compile_context>
chip_gen: v6e
topology: v6e:2x2x1
jax: 0.10.0
libtpu: 0.0.40
codegen_flags: <defaults>
</compile_context>

<pallas_src>
import jax
import jax.numpy as jnp
from jax.experimental import pallas as pl
from jax.experimental.pallas import tpu as pltpu

LANE = 128


def _round_up(x, m):
    return (x + m - 1) // m * m


# ----------------------------- Pallas kernels ------------------------------

def _conv_relu_pool_kernel(x_ref, w_ref, b_ref, o_ref):
    """Fused conv + bias + ReLU + 2x2 maxpool.

    x_ref: (4, tm, Kp) bf16 -- one stride-2 im2col slab per pool phase.
    w_ref: (Kp, 128) bf16, b_ref: (1, 128) f32, o_ref: (tm, 128) bf16.
    """
    w = w_ref[...]
    acc = jnp.dot(x_ref[0], w, preferred_element_type=jnp.float32)
    acc = jnp.maximum(acc, jnp.dot(x_ref[1], w, preferred_element_type=jnp.float32))
    acc = jnp.maximum(acc, jnp.dot(x_ref[2], w, preferred_element_type=jnp.float32))
    acc = jnp.maximum(acc, jnp.dot(x_ref[3], w, preferred_element_type=jnp.float32))
    # maxpool(relu(conv + b)) == relu(maxpool(conv) + b): bias/ReLU after max.
    o_ref[...] = jnp.maximum(acc + b_ref[...], 0.0).astype(o_ref.dtype)


def _fc_softmax_kernel(x_ref, w_ref, b_ref, o_ref):
    """FC + softmax. Classes 10..127 are padding and masked out of softmax.

    x_ref: (B, 2048) bf16, w_ref: (2048, 128) bf16, b_ref: (1, 128) f32.
    """
    logits = jnp.dot(x_ref[...], w_ref[...], preferred_element_type=jnp.float32)
    logits = logits + b_ref[...]
    lane = jax.lax.broadcasted_iota(jnp.int32, logits.shape, 1)
    valid = lane < 10
    logits = jnp.where(valid, logits, -1e30)
    m = jnp.max(logits, axis=-1, keepdims=True)
    p = jnp.exp(logits - m)
    p = jnp.where(valid, p, 0.0)
    o_ref[...] = (p / jnp.sum(p, axis=-1, keepdims=True)).astype(o_ref.dtype)


# ------------------------------- Wrappers -----------------------------------

def _pooled_phase_patches(x, k):
    """x: (B, H, W, C) -> (4, B*(H//2)*(W//2), Kp) bf16 im2col slabs.

    Slab ph = (dy, dx) holds the patches of the conv-output pixels that land in
    pool-window position (dy, dx); columns ordered (ky, kx, cin), zero-padded
    to Kp = round_up(k*k*C, 128).
    """
    B, H, W, C = x.shape
    Ho, Wo = H // 2, W // 2
    pad = k // 2
    kk = k * k * C
    Kp = _round_up(kk, LANE)
    xp = jnp.pad(x, ((0, 0), (pad, pad), (pad, pad), (0, 0)))
    phases = []
    for dy in (0, 1):
        for dx in (0, 1):
            cols = []
            for ky in range(k):
                for kx in range(k):
                    r0, c0 = dy + ky, dx + kx
                    cols.append(xp[:, r0:r0 + 2 * Ho:2, c0:c0 + 2 * Wo:2, :])
            patch = jnp.concatenate(cols, axis=-1).reshape(B * Ho * Wo, kk)
            phases.append(patch)
    patches = jnp.stack(phases, axis=0)                        # (4, rows, kk)
    patches = jnp.pad(patches, ((0, 0), (0, 0), (0, Kp - kk)))
    return patches.astype(jnp.bfloat16)


def conv_relu_pool(x_nhwc, w, b):
    """Conv2d(k=5, pad=2) + ReLU + MaxPool2d(2); returns (B, H/2, W/2, 128)
    bf16 with channels Cout..127 being zero padding."""
    B, H, W, Cin = x_nhwc.shape
    K, _, _, Cout = w.shape
    Ho, Wo = H // 2, W // 2
    rows = B * Ho * Wo
    kk = K * K * Cin
    Kp = _round_up(kk, LANE)

    patches = _pooled_phase_patches(x_nhwc, K)                 # (4, rows, Kp)
    wm = jnp.pad(w.reshape(kk, Cout),
                 ((0, Kp - kk), (0, LANE - Cout))).astype(jnp.bfloat16)
    bm = jnp.pad(b, (0, LANE - Cout)).reshape(1, LANE).astype(jnp.float32)

    tm = rows // 2        # two "parallel" row blocks (feeds both v7x cores)
    y = pl.pallas_call(
        _conv_relu_pool_kernel,
        out_shape=jax.ShapeDtypeStruct((rows, LANE), jnp.bfloat16),
        grid=(2,),
        in_specs=[
            pl.BlockSpec((4, tm, Kp), lambda i: (0, i, 0)),
            pl.BlockSpec((Kp, LANE), lambda i: (0, 0)),
            pl.BlockSpec((1, LANE), lambda i: (0, 0)),
        ],
        out_specs=pl.BlockSpec((tm, LANE), lambda i: (i, 0)),
        compiler_params=pltpu.CompilerParams(dimension_semantics=("parallel",)),
    )(patches, wm, bm)
    return y.reshape(B, Ho, Wo, LANE)


def _fc_weight(wfc, bfc):
    """Fold torch's NCHW flatten (index = c*16 + h*4 + w) and channel/class
    padding into the FC weight so no activation transpose is needed."""
    w = wfc.reshape(32, 16, 10).transpose(1, 0, 2)             # (p, c, 10)
    w = jnp.pad(w, ((0, 0), (0, LANE - 32), (0, LANE - 10)))   # (16, 128, 128)
    w = w.reshape(16 * LANE, LANE).astype(jnp.bfloat16)
    b = jnp.pad(bfc, (0, LANE - 10)).reshape(1, LANE).astype(jnp.float32)
    return w, b


def network_forward(x_nchw, params):
    x = jnp.transpose(x_nchw, (0, 2, 3, 1)).astype(jnp.float32)   # NCHW -> NHWC
    x = conv_relu_pool(x, params["w1"], params["b1"])[..., :16]   # (B,16,16,16)
    x = conv_relu_pool(x, params["w2"], params["b2"])[..., :32]   # (B, 8, 8,32)
    x = conv_relu_pool(x, params["w3"], params["b3"])             # (B, 4, 4,128)
    B = x.shape[0]
    xf = x.reshape(B, 16 * LANE)                                  # (B, 2048) bf16
    # TODO(synk): Dropout(0.3) is identity here (inference semantics); the
    # training-mode stochastic mask cannot match torch's RNG stream.
    wr, br = _fc_weight(params["wfc"], params["bfc"])
    probs = pl.pallas_call(
        _fc_softmax_kernel,
        out_shape=jax.ShapeDtypeStruct((B, LANE), jnp.float32),
    )(xf, wr, br)
    return probs[:, :10]


# ----------------------------- pure-JAX reference ----------------------------

def reference_forward(x_nchw, params):
    """Same math in plain JAX (bf16 matmul inputs / f32 accumulation, bf16
    inter-layer activations) for a numerically tight correctness check."""
    x = jnp.transpose(x_nchw, (0, 2, 3, 1)).astype(jnp.float32)

    def block(x, w, b):
        y = jax.lax.conv_general_dilated(
            x.astype(jnp.bfloat16), w.astype(jnp.bfloat16),
            window_strides=(1, 1), padding=((2, 2), (2, 2)),
            dimension_numbers=("NHWC", "HWIO", "NHWC"),
            preferred_element_type=jnp.float32)
        y = jnp.maximum(y + b, 0.0)
        B, H, W, C = y.shape
        y = y.reshape(B, H // 2, 2, W // 2, 2, C).max(axis=(2, 4))
        return y.astype(jnp.bfloat16)

    x = block(x, params["w1"], params["b1"])
    x = block(x, params["w2"], params["b2"])
    x = block(x, params["w3"], params["b3"])
    B = x.shape[0]
    xf = jnp.transpose(x, (0, 3, 1, 2)).reshape(B, 512)          # torch flatten
    logits = jnp.dot(xf.astype(jnp.bfloat16),
                     params["wfc"].astype(jnp.bfloat16),
                     preferred_element_type=jnp.float32) + params["bfc"]
    return jax.nn.softmax(logits, axis=-1)


# --------------------------- deterministic params ---------------------------

def init_params(key):
    ks = jax.random.split(key, 8)

    def conv_w(k, kh, cin, cout):
        fan_in = kh * kh * cin
        return (jax.random.normal(k, (kh, kh, cin, cout), jnp.float32)
                / jnp.sqrt(jnp.float32(fan_in)))

    return {
        "w1": conv_w(ks[0], 5, 3, 16),
        "b1": 0.01 * jax.random.normal(ks[1], (16,), jnp.float32),
        "w2": conv_w(ks[2], 5, 16, 32),
        "b2": 0.01 * jax.random.normal(ks[3], (32,), jnp.float32),
        "w3": conv_w(ks[4], 5, 32, 32),
        "b3": 0.01 * jax.random.normal(ks[5], (32,), jnp.float32),
        "wfc": (jax.random.normal(ks[6], (512, 10), jnp.float32)
                / jnp.sqrt(jnp.float32(512))),
        "bfc": 0.01 * jax.random.normal(ks[7], (10,), jnp.float32),
    }


# ----------------------------------- main ------------------------------------

if __name__ == "__main__":
    key = jax.random.PRNGKey(0)
    kx, kp = jax.random.split(key)
    # The module's Linear(512, 10) implies 32x32x3 CIFAR-10 input; batch=2.
    x = jax.random.normal(kx, (2, 3, 32, 32), jnp.float32)   # NCHW, like torch
    params = init_params(kp)

    fwd = jax.jit(network_forward)
    out = jax.block_until_ready(fwd(x, params))

    assert out.shape == (2, 10)
    assert bool(jnp.all(jnp.isfinite(out)))
    # softmax rows should sum to ~1
    assert bool(jnp.allclose(jnp.sum(out, axis=1), 1.0, atol=1e-5))

    # correctness vs a pure-JAX reference (tolerance covers bf16 rounding).
    ref = jax.block_until_ready(jax.jit(reference_forward)(x, params))
    max_diff = float(jnp.max(jnp.abs(out - ref)))
    assert max_diff < 2e-2, f"mismatch vs reference: max|diff|={max_diff}"

    print("KERNEL_OK")
</pallas_src>

<mosaic_0001>
module attributes {stable_mosaic.version = 11 : i64} {
  func.func @_conv_relu_pool_kernel(%arg0: i32, %arg1: memref<4x256x128xbf16, #tpu.memory_space<vmem>>, %arg2: memref<128x128xbf16, #tpu.memory_space<vmem>>, %arg3: memref<1x128xf32, #tpu.memory_space<vmem>>, %arg4: memref<256x128xbf16, #tpu.memory_space<vmem>>) attributes {dimension_semantics = [#tpu.dimension_semantics<parallel>], iteration_bounds = array<i64: 2>, scalar_prefetch = 0 : i64, scratch_operands = 0 : i64, tpu.core_type = #tpu.core_type<tc>, window_params = [{transform_indices = @transform_0, window_bounds = array<i64: 4, 256, 128>}, {pipeline_mode = #tpu.pipeline_mode<synchronous>, transform_indices = @transform_1, window_bounds = array<i64: 128, 128>}, {pipeline_mode = #tpu.pipeline_mode<synchronous>, transform_indices = @transform_2, window_bounds = array<i64: 1, 128>}, {transform_indices = @transform_3, window_bounds = array<i64: 256, 128>}]} {
    %c0 = arith.constant 0 : index
    %c0_0 = arith.constant 0 : index
    %0 = vector.load %arg2[%c0, %c0_0] : memref<128x128xbf16, #tpu.memory_space<vmem>>, vector<128x128xbf16>
    %c0_1 = arith.constant 0 : index
    %c0_2 = arith.constant 0 : index
    %c0_3 = arith.constant 0 : index
    %1 = vector.load %arg1[%c0_1, %c0_2, %c0_3] : memref<4x256x128xbf16, #tpu.memory_space<vmem>>, vector<1x256x128xbf16>
    %2 = vector.shape_cast %1 : vector<1x256x128xbf16> to vector<256x128xbf16>
    %cst = arith.constant dense<0.000000e+00> : vector<256x128xf32>
    %3 = tpu.matmul %2, %0, %cst {dimension_numbers = #tpu.dot_dimension_numbers<[1], [0], [0], [1], [0, 0, 1, 1], [], []>} : vector<256x128xbf16>, vector<128x128xbf16>, vector<256x128xf32> -> vector<256x128xf32>
    %c1 = arith.constant 1 : index
    %c0_4 = arith.constant 0 : index
    %c0_5 = arith.constant 0 : index
    %4 = vector.load %arg1[%c1, %c0_4, %c0_5] : memref<4x256x128xbf16, #tpu.memory_space<vmem>>, vector<1x256x128xbf16>
    %5 = vector.shape_cast %4 : vector<1x256x128xbf16> to vector<256x128xbf16>
    %cst_6 = arith.constant dense<0.000000e+00> : vector<256x128xf32>
    %6 = tpu.matmul %5, %0, %cst_6 {dimension_numbers = #tpu.dot_dimension_numbers<[1], [0], [0], [1], [0, 0, 1, 1], [], []>} : vector<256x128xbf16>, vector<128x128xbf16>, vector<256x128xf32> -> vector<256x128xf32>
    %7 = arith.maximumf %3, %6 : vector<256x128xf32>
    %c2 = arith.constant 2 : index
    %c0_7 = arith.constant 0 : index
    %c0_8 = arith.constant 0 : index
    %8 = vector.load %arg1[%c2, %c0_7, %c0_8] : memref<4x256x128xbf16, #tpu.memory_space<vmem>>, vector<1x256x128xbf16>
    %9 = vector.shape_cast %8 : vector<1x256x128xbf16> to vector<256x128xbf16>
    %cst_9 = arith.constant dense<0.000000e+00> : vector<256x128xf32>
    %10 = tpu.matmul %9, %0, %cst_9 {dimension_numbers = #tpu.dot_dimension_numbers<[1], [0], [0], [1], [0, 0, 1, 1], [], []>} : vector<256x128xbf16>, vector<128x128xbf16>, vector<256x128xf32> -> vector<256x128xf32>
    %11 = arith.maximumf %7, %10 : vector<256x128xf32>
    %c3 = arith.constant 3 : index
    %c0_10 = arith.constant 0 : index
    %c0_11 = arith.constant 0 : index
    %12 = vector.load %arg1[%c3, %c0_10, %c0_11] : memref<4x256x128xbf16, #tpu.memory_space<vmem>>, vector<1x256x128xbf16>
    %13 = vector.shape_cast %12 : vector<1x256x128xbf16> to vector<256x128xbf16>
    %cst_12 = arith.constant dense<0.000000e+00> : vector<256x128xf32>
    %14 = tpu.matmul %13, %0, %cst_12 {dimension_numbers = #tpu.dot_dimension_numbers<[1], [0], [0], [1], [0, 0, 1, 1], [], []>} : vector<256x128xbf16>, vector<128x128xbf16>, vector<256x128xf32> -> vector<256x128xf32>
    %15 = arith.maximumf %11, %14 : vector<256x128xf32>
    %c0_13 = arith.constant 0 : index
    %c0_14 = arith.constant 0 : index
    %16 = vector.load %arg3[%c0_13, %c0_14] : memref<1x128xf32, #tpu.memory_space<vmem>>, vector<1x128xf32>
    %17 = vector.broadcast %16 : vector<1x128xf32> to vector<256x128xf32>
    %18 = arith.addf %15, %17 : vector<256x128xf32>
    %cst_15 = arith.constant 0.000000e+00 : f32
    %19 = vector.broadcast %cst_15 : f32 to vector<256x128xf32>
    %20 = arith.maximumf %18, %19 : vector<256x128xf32>
    %21 = arith.truncf %20 : vector<256x128xf32> to vector<256x128xbf16>
    %c0_16 = arith.constant 0 : index
    %c0_17 = arith.constant 0 : index
    %22 = vector.load %arg4[%c0_16, %c0_17] : memref<256x128xbf16, #tpu.memory_space<vmem>>, vector<256x128xbf16>
    tpu.vector_store %arg4[%c0_16, %c0_17], %21 {strides = array<i32>} : memref<256x128xbf16, #tpu.memory_space<vmem>>, vector<256x128xbf16>,
    return
  }
  func.func @transform_0(%arg0: i32) -> (i32, i32, i32) {
    %c0_i32 = arith.constant 0 : i32
    %c0_i32_0 = arith.constant 0 : i32
    %c0_i32_1 = arith.constant 0 : i32
    return %c0_i32, %arg0, %c0_i32_0 : i32, i32, i32
  }
  func.func @transform_1(%arg0: i32) -> (i32, i32) {
    %c0_i32 = arith.constant 0 : i32
    %c0_i32_0 = arith.constant 0 : i32
    %c0_i32_1 = arith.constant 0 : i32
    return %c0_i32, %c0_i32_0 : i32, i32
  }
  func.func @transform_2(%arg0: i32) -> (i32, i32) {
    %c0_i32 = arith.constant 0 : i32
    %c0_i32_0 = arith.constant 0 : i32
    %c0_i32_1 = arith.constant 0 : i32
    return %c0_i32, %c0_i32_0 : i32, i32
  }
  func.func @transform_3(%arg0: i32) -> (i32, i32) {
    %c0_i32 = arith.constant 0 : i32
    %c0_i32_0 = arith.constant 0 : i32
    return %arg0, %c0_i32 : i32, i32
  }
}

module attributes {stable_mosaic.version = 11 : i64} {
  func.func @_conv_relu_pool_kernel(%arg0: i32, %arg1: memref<4x64x512xbf16, #tpu.memory_space<vmem>>, %arg2: memref<512x128xbf16, #tpu.memory_space<vmem>>, %arg3: memref<1x128xf32, #tpu.memory_space<vmem>>, %arg4: memref<64x128xbf16, #tpu.memory_space<vmem>>) attributes {dimension_semantics = [#tpu.dimension_semantics<parallel>], iteration_bounds = array<i64: 2>, scalar_prefetch = 0 : i64, scratch_operands = 0 : i64, tpu.core_type = #tpu.core_type<tc>, window_params = [{transform_indices = @transform_0, window_bounds = array<i64: 4, 64, 512>}, {pipeline_mode = #tpu.pipeline_mode<synchronous>, transform_indices = @transform_1, window_bounds = array<i64: 512, 128>}, {pipeline_mode = #tpu.pipeline_mode<synchronous>, transform_indices = @transform_2, window_bounds = array<i64: 1, 128>}, {transform_indices = @transform_3, window_bounds = array<i64: 64, 128>}]} {
    %c0 = arith.constant 0 : index
    %c0_0 = arith.constant 0 : index
    %0 = vector.load %arg2[%c0, %c0_0] : memref<512x128xbf16, #tpu.memory_space<vmem>>, vector<512x128xbf16>
    %c0_1 = arith.constant 0 : index
    %c0_2 = arith.constant 0 : index
    %c0_3 = arith.constant 0 : index
    %1 = vector.load %arg1[%c0_1, %c0_2, %c0_3] : memref<4x64x512xbf16, #tpu.memory_space<vmem>>, vector<1x64x512xbf16>
    %2 = vector.shape_cast %1 : vector<1x64x512xbf16> to vector<64x512xbf16>
    %cst = arith.constant dense<0.000000e+00> : vector<64x128xf32>
    %3 = tpu.matmul %2, %0, %cst {dimension_numbers = #tpu.dot_dimension_numbers<[1], [0], [0], [1], [0, 0, 1, 1], [], []>} : vector<64x512xbf16>, vector<512x128xbf16>, vector<64x128xf32> -> vector<64x128xf32>
    %c1 = arith.constant 1 : index
    %c0_4 = arith.constant 0 : index
    %c0_5 = arith.constant 0 : index
    %4 = vector.load %arg1[%c1, %c0_4, %c0_5] : memref<4x64x512xbf16, #tpu.memory_space<vmem>>, vector<1x64x512xbf16>
    %5 = vector.shape_cast %4 : vector<1x64x512xbf16> to vector<64x512xbf16>
    %cst_6 = arith.constant dense<0.000000e+00> : vector<64x128xf32>
    %6 = tpu.matmul %5, %0, %cst_6 {dimension_numbers = #tpu.dot_dimension_numbers<[1], [0], [0], [1], [0, 0, 1, 1], [], []>} : vector<64x512xbf16>, vector<512x128xbf16>, vector<64x128xf32> -> vector<64x128xf32>
    %7 = arith.maximumf %3, %6 : vector<64x128xf32>
    %c2 = arith.constant 2 : index
    %c0_7 = arith.constant 0 : index
    %c0_8 = arith.constant 0 : index
    %8 = vector.load %arg1[%c2, %c0_7, %c0_8] : memref<4x64x512xbf16, #tpu.memory_space<vmem>>, vector<1x64x512xbf16>
    %9 = vector.shape_cast %8 : vector<1x64x512xbf16> to vector<64x512xbf16>
    %cst_9 = arith.constant dense<0.000000e+00> : vector<64x128xf32>
    %10 = tpu.matmul %9, %0, %cst_9 {dimension_numbers = #tpu.dot_dimension_numbers<[1], [0], [0], [1], [0, 0, 1, 1], [], []>} : vector<64x512xbf16>, vector<512x128xbf16>, vector<64x128xf32> -> vector<64x128xf32>
    %11 = arith.maximumf %7, %10 : vector<64x128xf32>
    %c3 = arith.constant 3 : index
    %c0_10 = arith.constant 0 : index
    %c0_11 = arith.constant 0 : index
    %12 = vector.load %arg1[%c3, %c0_10, %c0_11] : memref<4x64x512xbf16, #tpu.memory_space<vmem>>, vector<1x64x512xbf16>
    %13 = vector.shape_cast %12 : vector<1x64x512xbf16> to vector<64x512xbf16>
    %cst_12 = arith.constant dense<0.000000e+00> : vector<64x128xf32>
    %14 = tpu.matmul %13, %0, %cst_12 {dimension_numbers = #tpu.dot_dimension_numbers<[1], [0], [0], [1], [0, 0, 1, 1], [], []>} : vector<64x512xbf16>, vector<512x128xbf16>, vector<64x128xf32> -> vector<64x128xf32>
    %15 = arith.maximumf %11, %14 : vector<64x128xf32>
    %c0_13 = arith.constant 0 : index
    %c0_14 = arith.constant 0 : index
    %16 = vector.load %arg3[%c0_13, %c0_14] : memref<1x128xf32, #tpu.memory_space<vmem>>, vector<1x128xf32>
    %17 = vector.broadcast %16 : vector<1x128xf32> to vector<64x128xf32>
    %18 = arith.addf %15, %17 : vector<64x128xf32>
    %cst_15 = arith.constant 0.000000e+00 : f32
    %19 = vector.broadcast %cst_15 : f32 to vector<64x128xf32>
    %20 = arith.maximumf %18, %19 : vector<64x128xf32>
    %21 = arith.truncf %20 : vector<64x128xf32> to vector<64x128xbf16>
    %c0_16 = arith.constant 0 : index
    %c0_17 = arith.constant 0 : index
    %22 = vector.load %arg4[%c0_16, %c0_17] : memref<64x128xbf16, #tpu.memory_space<vmem>>, vector<64x128xbf16>
    tpu.vector_store %arg4[%c0_16, %c0_17], %21 {strides = array<i32>} : memref<64x128xbf16, #tpu.memory_space<vmem>>, vector<64x128xbf16>,
    return
  }
  func.func @transform_0(%arg0: i32) -> (i32, i32, i32) {
    %c0_i32 = arith.constant 0 : i32
    %c0_i32_0 = arith.constant 0 : i32
    %c0_i32_1 = arith.constant 0 : i32
    return %c0_i32, %arg0, %c0_i32_0 : i32, i32, i32
  }
  func.func @transform_1(%arg0: i32) -> (i32, i32) {
    %c0_i32 = arith.constant 0 : i32
    %c0_i32_0 = arith.constant 0 : i32
    %c0_i32_1 = arith.constant 0 : i32
    return %c0_i32, %c0_i32_0 : i32, i32
  }
  func.func @transform_2(%arg0: i32) -> (i32, i32) {
    %c0_i32 = arith.constant 0 : i32
    %c0_i32_0 = arith.constant 0 : i32
    %c0_i32_1 = arith.constant 0 : i32
    return %c0_i32, %c0_i32_0 : i32, i32
  }
  func.func @transform_3(%arg0: i32) -> (i32, i32) {
    %c0_i32 = arith.constant 0 : i32
    %c0_i32_0 = arith.constant 0 : i32
    return %arg0, %c0_i32 : i32, i32
  }
}

module attributes {stable_mosaic.version = 11 : i64} {
  func.func @_conv_relu_pool_kernel(%arg0: i32, %arg1: memref<4x16x896xbf16, #tpu.memory_space<vmem>>, %arg2: memref<896x128xbf16, #tpu.memory_space<vmem>>, %arg3: memref<1x128xf32, #tpu.memory_space<vmem>>, %arg4: memref<16x128xbf16, #tpu.memory_space<vmem>>) attributes {dimension_semantics = [#tpu.dimension_semantics<parallel>], iteration_bounds = array<i64: 2>, scalar_prefetch = 0 : i64, scratch_operands = 0 : i64, tpu.core_type = #tpu.core_type<tc>, window_params = [{transform_indices = @transform_0, window_bounds = array<i64: 4, 16, 896>}, {pipeline_mode = #tpu.pipeline_mode<synchronous>, transform_indices = @transform_1, window_bounds = array<i64: 896, 128>}, {pipeline_mode = #tpu.pipeline_mode<synchronous>, transform_indices = @transform_2, window_bounds = array<i64: 1, 128>}, {transform_indices = @transform_3, window_bounds = array<i64: 16, 128>}]} {
    %c0 = arith.constant 0 : index
    %c0_0 = arith.constant 0 : index
    %0 = vector.load %arg2[%c0, %c0_0] : memref<896x128xbf16, #tpu.memory_space<vmem>>, vector<896x128xbf16>
    %c0_1 = arith.constant 0 : index
    %c0_2 = arith.constant 0 : index
    %c0_3 = arith.constant 0 : index
    %1 = vector.load %arg1[%c0_1, %c0_2, %c0_3] : memref<4x16x896xbf16, #tpu.memory_space<vmem>>, vector<1x16x896xbf16>
    %2 = vector.shape_cast %1 : vector<1x16x896xbf16> to vector<16x896xbf16>
    %cst = arith.constant dense<0.000000e+00> : vector<16x128xf32>
    %3 = tpu.matmul %2, %0, %cst {dimension_numbers = #tpu.dot_dimension_numbers<[1], [0], [0], [1], [0, 0, 1, 1], [], []>} : vector<16x896xbf16>, vector<896x128xbf16>, vector<16x128xf32> -> vector<16x128xf32>
    %c1 = arith.constant 1 : index
    %c0_4 = arith.constant 0 : index
    %c0_5 = arith.constant 0 : index
    %4 = vector.load %arg1[%c1, %c0_4, %c0_5] : memref<4x16x896xbf16, #tpu.memory_space<vmem>>, vector<1x16x896xbf16>
    %5 = vector.shape_cast %4 : vector<1x16x896xbf16> to vector<16x896xbf16>
    %cst_6 = arith.constant dense<0.000000e+00> : vector<16x128xf32>
    %6 = tpu.matmul %5, %0, %cst_6 {dimension_numbers = #tpu.dot_dimension_numbers<[1], [0], [0], [1], [0, 0, 1, 1], [], []>} : vector<16x896xbf16>, vector<896x128xbf16>, vector<16x128xf32> -> vector<16x128xf32>
    %7 = arith.maximumf %3, %6 : vector<16x128xf32>
    %c2 = arith.constant 2 : index
    %c0_7 = arith.constant 0 : index
    %c0_8 = arith.constant 0 : index
    %8 = vector.load %arg1[%c2, %c0_7, %c0_8] : memref<4x16x896xbf16, #tpu.memory_space<vmem>>, vector<1x16x896xbf16>
    %9 = vector.shape_cast %8 : vector<1x16x896xbf16> to vector<16x896xbf16>
    %cst_9 = arith.constant dense<0.000000e+00> : vector<16x128xf32>
    %10 = tpu.matmul %9, %0, %cst_9 {dimension_numbers = #tpu.dot_dimension_numbers<[1], [0], [0], [1], [0, 0, 1, 1], [], []>} : vector<16x896xbf16>, vector<896x128xbf16>, vector<16x128xf32> -> vector<16x128xf32>
    %11 = arith.maximumf %7, %10 : vector<16x128xf32>
    %c3 = arith.constant 3 : index
    %c0_10 = arith.constant 0 : index
    %c0_11 = arith.constant 0 : index
    %12 = vector.load %arg1[%c3, %c0_10, %c0_11] : memref<4x16x896xbf16, #tpu.memory_space<vmem>>, vector<1x16x896xbf16>
    %13 = vector.shape_cast %12 : vector<1x16x896xbf16> to vector<16x896xbf16>
    %cst_12 = arith.constant dense<0.000000e+00> : vector<16x128xf32>
    %14 = tpu.matmul %13, %0, %cst_12 {dimension_numbers = #tpu.dot_dimension_numbers<[1], [0], [0], [1], [0, 0, 1, 1], [], []>} : vector<16x896xbf16>, vector<896x128xbf16>, vector<16x128xf32> -> vector<16x128xf32>
    %15 = arith.maximumf %11, %14 : vector<16x128xf32>
    %c0_13 = arith.constant 0 : index
    %c0_14 = arith.constant 0 : index
    %16 = vector.load %arg3[%c0_13, %c0_14] : memref<1x128xf32, #tpu.memory_space<vmem>>, vector<1x128xf32>
    %17 = vector.broadcast %16 : vector<1x128xf32> to vector<16x128xf32>
    %18 = arith.addf %15, %17 : vector<16x128xf32>
    %cst_15 = arith.constant 0.000000e+00 : f32
    %19 = vector.broadcast %cst_15 : f32 to vector<16x128xf32>
    %20 = arith.maximumf %18, %19 : vector<16x128xf32>
    %21 = arith.truncf %20 : vector<16x128xf32> to vector<16x128xbf16>
    %c0_16 = arith.constant 0 : index
    %c0_17 = arith.constant 0 : index
    %22 = vector.load %arg4[%c0_16, %c0_17] : memref<16x128xbf16, #tpu.memory_space<vmem>>, vector<16x128xbf16>
    tpu.vector_store %arg4[%c0_16, %c0_17], %21 {strides = array<i32>} : memref<16x128xbf16, #tpu.memory_space<vmem>>, vector<16x128xbf16>,
    return
  }
  func.func @transform_0(%arg0: i32) -> (i32, i32, i32) {
    %c0_i32 = arith.constant 0 : i32
    %c0_i32_0 = arith.constant 0 : i32
    %c0_i32_1 = arith.constant 0 : i32
    return %c0_i32, %arg0, %c0_i32_0 : i32, i32, i32
  }
  func.func @transform_1(%arg0: i32) -> (i32, i32) {
    %c0_i32 = arith.constant 0 : i32
    %c0_i32_0 = arith.constant 0 : i32
    %c0_i32_1 = arith.constant 0 : i32
    return %c0_i32, %c0_i32_0 : i32, i32
  }
  func.func @transform_2(%arg0: i32) -> (i32, i32) {
    %c0_i32 = arith.constant 0 : i32
    %c0_i32_0 = arith.constant 0 : i32
    %c0_i32_1 = arith.constant 0 : i32
    return %c0_i32, %c0_i32_0 : i32, i32
  }
  func.func @transform_3(%arg0: i32) -> (i32, i32) {
    %c0_i32 = arith.constant 0 : i32
    %c0_i32_0 = arith.constant 0 : i32
    return %arg0, %c0_i32 : i32, i32
  }
}

module attributes {stable_mosaic.version = 11 : i64} {
  func.func @_fc_softmax_kernel(%arg0: memref<2x2048xbf16, #tpu.memory_space<vmem>>, %arg1: memref<2048x128xbf16, #tpu.memory_space<vmem>>, %arg2: memref<1x128xf32, #tpu.memory_space<vmem>>, %arg3: memref<2x128xf32, #tpu.memory_space<vmem>>) attributes {dimension_semantics = [], scalar_prefetch = 0 : i64, scratch_operands = 0 : i64, tpu.core_type = #tpu.core_type<tc>} {
    %c0 = arith.constant 0 : index
    %c0_0 = arith.constant 0 : index
    %0 = vector.load %arg0[%c0, %c0_0] : memref<2x2048xbf16, #tpu.memory_space<vmem>>, vector<2x2048xbf16>
    %c0_1 = arith.constant 0 : index
    %c0_2 = arith.constant 0 : index
    %1 = vector.load %arg1[%c0_1, %c0_2] : memref<2048x128xbf16, #tpu.memory_space<vmem>>, vector<2048x128xbf16>
    %cst = arith.constant dense<0.000000e+00> : vector<2x128xf32>
    %2 = tpu.matmul %0, %1, %cst {dimension_numbers = #tpu.dot_dimension_numbers<[1], [0], [0], [1], [0, 0, 1, 1], [], []>} : vector<2x2048xbf16>, vector<2048x128xbf16>, vector<2x128xf32> -> vector<2x128xf32>
    %c0_3 = arith.constant 0 : index
    %c0_4 = arith.constant 0 : index
    %3 = vector.load %arg2[%c0_3, %c0_4] : memref<1x128xf32, #tpu.memory_space<vmem>>, vector<1x128xf32>
    %4 = vector.broadcast %3 : vector<1x128xf32> to vector<2x128xf32>
    %5 = arith.addf %2, %4 : vector<2x128xf32>
    %6 = tpu.iota {dimensions = array<i32: 1>} : vector<2x128xi32>
    %c10_i32 = arith.constant 10 : i32
    %7 = vector.broadcast %c10_i32 : i32 to vector<2x128xi32>
    %8 = arith.cmpi slt, %6, %7 : vector<2x128xi32>
    %cst_5 = arith.constant -1.000000e+30 : f32
    %9 = vector.broadcast %cst_5 : f32 to vector<2x128xf32>
    %10 = arith.select %8, %5, %9 : vector<2x128xi1>, vector<2x128xf32>
    %cst_6 = arith.constant dense<0xFF800000> : vector<2xf32>
    %11 = vector.multi_reduction <maximumf>, %10, %cst_6 [1] : vector<2x128xf32> to vector<2xf32>
    %12 = vector.shape_cast %11 : vector<2xf32> to vector<2x1xf32>
    %13 = vector.broadcast %12 : vector<2x1xf32> to vector<2x128xf32>
    %14 = arith.subf %10, %13 : vector<2x128xf32>
    %15 = math.exp %14 : vector<2x128xf32>
    %cst_7 = arith.constant 0.000000e+00 : f32
    %16 = vector.broadcast %cst_7 : f32 to vector<2x128xf32>
    %17 = arith.select %8, %15, %16 : vector<2x128xi1>, vector<2x128xf32>
    %cst_8 = arith.constant dense<0.000000e+00> : vector<2xf32>
    %18 = vector.multi_reduction <add>, %17, %cst_8 [1] : vector<2x128xf32> to vector<2xf32>
    %19 = vector.shape_cast %18 : vector<2xf32> to vector<2x1xf32>
    %20 = vector.broadcast %19 : vector<2x1xf32> to vector<2x128xf32>
    %21 = arith.divf %17, %20 : vector<2x128xf32>
    %c0_9 = arith.constant 0 : index
    %c0_10 = arith.constant 0 : index
    %22 = vector.load %arg3[%c0_9, %c0_10] : memref<2x128xf32, #tpu.memory_space<vmem>>, vector<2x128xf32>
    tpu.vector_store %arg3[%c0_9, %c0_10], %21 {strides = array<i32>} : memref<2x128xf32, #tpu.memory_space<vmem>>, vector<2x128xf32>,
    return
  }
}

</mosaic_0001>

<bundles_post_ra>
// kernel: network_forward.4
= control target key start
LH: loop header
LB: loop body
LE: loop exit
PB: predicated region body
PF: predicated region fallthrough
CT: control target
= control target key end

     0   :  { %s3108_s12 = smov 0   ;;  %s3110_s13 = smov 0   ;;  %s3737_s0 = inlined_call_operand.vmem [shape: bf16[4,512,128], index: 0, kind: input, shape index: {}]   ;;  %s3738_s1 = inlined_call_operand.vmem [shape: bf16[128,128], index: 1, kind: input, shape index: {}]   ;;  %s3739_s2 = inlined_call_operand.vmem [shape: f32[1,128], index: 2, kind: input, shape index: {}]   ;;  %s3740_s3 = inlined_call_operand.vmem [shape: bf16[512,128], index: 3, kind: output, shape index: {}]  }
   0x1   :  { %s3112_s14 = smov 0  }
   0x2 LB: > { %s2338_s15 = sadd.s32 4294967295, %s3086_s14   ;;  %s3125_s16 = sadd.s32 1, %s3086_s14   ;;  %s3086_s14 = sphi %s3112_s14, %s3793_s14   ;;  %s3082_s13 = sphi %s3110_s13, %s3792_s13   ;;  %s3078_s12 = sphi %s3108_s12, %s3791_s12  }
   0x3   : > { %s17_s17 = ssub.s32 %s3086_s14, %s3125_s16  ;;  %s20_s18 = sadd.s32 1, %s3082_s13 }
   0x4   : > { %p18_p0 = scmp.eq.s32.totalorder %s17_s17, 0  ;;  %p27_p1 = scmp.ne.s32.totalorder %s3082_s13, %s3078_s12 }
   0x5   : > { %p28_p2 = scmp.eq.s32.totalorder %s3086_s14, 0  ;;  %p2341_p4 = scmp.ge.s32.totalorder %s3086_s14, 2 }
   0x6   : > { %s3134_s19 = scalar_select %p18_p0, %s3082_s13, %s20_s18  }
   0x7   : > { %p29_p3 = por %p28_p2, %p27_p1  ;;  %127 = sbr.rel (%p2341_p4) target bundleno = 48 (0x30), region = 24 }
   0xc   : > { %130 = sbr.rel (!%p29_p3) target bundleno = 48 (0x30), region = 28  ;;  %s132_s20 = sand.u32 (%p29_p3), 1, %s3082_s13  }
   0xd   : > { %s2552_s21 = sshll.u32 (%p29_p3), %s3086_s14, 7  ;;  %s2342_s22 = sshll.u32 (%p29_p3), %s132_s20, 9 }
   0xe   : > { %s3142_s25 = scalar_lea.vmem (%p29_p3), %s3737_s0, %s2552_s21  ;;  %s3147_s26 = scalar_lea.vmem (%p29_p3), [#allocation2], %s2342_s22 }
   0xf   : > { %v154_v0 = vld [vmem:[%s3142_s25] sm:$0xff] (%p29_p3)   ;;  %v158_v1 = vld [vmem:[%s3142_s25 + $0x8] sm:$0xff] (%p29_p3)   ;;  %v162_v2 = vld [vmem:[%s3142_s25 + $0x10] sm:$0xff] (%p29_p3)  }
  0x10   : > { %155 = vst [vmem:[%s3147_s26] sm:$0xff] (%p29_p3), %v154_v0   ;;  %159 = vst [vmem:[%s3147_s26 + $0x8] sm:$0xff] (%p29_p3), %v158_v1   ;;  %v166_v3 = vld [vmem:[%s3142_s25 + $0x18] sm:$0xff] (%p29_p3)   ;;  %v170_v4 = vld [vmem:[%s3142_s25 + $0x20] sm:$0xff] (%p29_p3)  }
  0x11   : > { %163 = vst [vmem:[%s3147_s26 + $0x10] sm:$0xff] %v162_v2   ;;  %v174_v5 = vld [vmem:[%s3142_s25 + $0x28] sm:$0xff]   ;;  %167 = vst [vmem:[%s3147_s26 + $0x18] sm:$0xff] %v166_v3   ;;  %v178_v6 = vld [vmem:[%s3142_s25 + $0x30] sm:$0xff]  }
  0x12   : > { %171 = vst [vmem:[%s3147_s26 + $0x20] sm:$0xff] %v170_v4   ;;  %175 = vst [vmem:[%s3147_s26 + $0x28] sm:$0xff] %v174_v5   ;;  %v182_v7 = vld [vmem:[%s3142_s25 + $0x38] sm:$0xff]   ;;  %v186_v8 = vld [vmem:[%s3142_s25 + $0x40] sm:$0xff]  }
  0x13   : > { %179 = vst [vmem:[%s3147_s26 + $0x30] sm:$0xff] %v178_v6   ;;  %183 = vst [vmem:[%s3147_s26 + $0x38] sm:$0xff] %v182_v7   ;;  %v190_v9 = vld [vmem:[%s3142_s25 + $0x48] sm:$0xff]   ;;  %v194_v10 = vld [vmem:[%s3142_s25 + $0x50] sm:$0xff]  }
  0x14   : > { %187 = vst [vmem:[%s3147_s26 + $0x40] sm:$0xff] %v186_v8   ;;  %v198_v11 = vld [vmem:[%s3142_s25 + $0x58] sm:$0xff]   ;;  %191 = vst [vmem:[%s3147_s26 + $0x48] sm:$0xff] %v190_v9   ;;  %v202_v12 = vld [vmem:[%s3142_s25 + $0x60] sm:$0xff]  }
  0x15   : > { %195 = vst [vmem:[%s3147_s26 + $0x50] sm:$0xff] %v194_v10   ;;  %199 = vst [vmem:[%s3147_s26 + $0x58] sm:$0xff] %v198_v11   ;;  %v206_v13 = vld [vmem:[%s3142_s25 + $0x68] sm:$0xff]   ;;  %v210_v14 = vld [vmem:[%s3142_s25 + $0x70] sm:$0xff]  }
  0x16   : > { %203 = vst [vmem:[%s3147_s26 + $0x60] sm:$0xff] %v202_v12   ;;  %207 = vst [vmem:[%s3147_s26 + $0x68] sm:$0xff] %v206_v13   ;;  %v214_v15 = vld [vmem:[%s3142_s25 + $0x78] sm:$0xff]   ;;  %v218_v16 = vld [vmem:[%s3142_s25 + $0x100] sm:$0xff]  }
  0x17   : > { %211 = vst [vmem:[%s3147_s26 + $0x70] sm:$0xff] %v210_v14   ;;  %v222_v17 = vld [vmem:[%s3142_s25 + $0x108] sm:$0xff]   ;;  %215 = vst [vmem:[%s3147_s26 + $0x78] sm:$0xff] %v214_v15   ;;  %v226_v18 = vld [vmem:[%s3142_s25 + $0x110] sm:$0xff]  }
  0x18   : > { %219 = vst [vmem:[%s3147_s26 + $0x80] sm:$0xff] %v218_v16   ;;  %223 = vst [vmem:[%s3147_s26 + $0x88] sm:$0xff] %v222_v17   ;;  %v230_v19 = vld [vmem:[%s3142_s25 + $0x118] sm:$0xff]   ;;  %v234_v20 = vld [vmem:[%s3142_s25 + $0x120] sm:$0xff]  }
  0x19   : > { %227 = vst [vmem:[%s3147_s26 + $0x90] sm:$0xff] %v226_v18   ;;  %231 = vst [vmem:[%s3147_s26 + $0x98] sm:$0xff] %v230_v19   ;;  %v238_v21 = vld [vmem:[%s3142_s25 + $0x128] sm:$0xff]   ;;  %v242_v22 = vld [vmem:[%s3142_s25 + $0x130] sm:$0xff]  }
  0x1a   : > { %235 = vst [vmem:[%s3147_s26 + $0xa0] sm:$0xff] %v234_v20   ;;  %v246_v23 = vld [vmem:[%s3142_s25 + $0x138] sm:$0xff]   ;;  %239 = vst [vmem:[%s3147_s26 + $0xa8] sm:$0xff] %v238_v21   ;;  %v250_v24 = vld [vmem:[%s3142_s25 + $0x140] sm:$0xff]  }
  0x1b   : > { %243 = vst [vmem:[%s3147_s26 + $0xb0] sm:$0xff] %v242_v22   ;;  %247 = vst [vmem:[%s3147_s26 + $0xb8] sm:$0xff] %v246_v23   ;;  %v254_v25 = vld [vmem:[%s3142_s25 + $0x148] sm:$0xff]   ;;  %v258_v26 = vld [vmem:[%s3142_s25 + $0x150] sm:$0xff]  }
  0x1c   : > { %251 = vst [vmem:[%s3147_s26 + $0xc0] sm:$0xff] %v250_v24   ;;  %255 = vst [vmem:[%s3147_s26 + $0xc8] sm:$0xff] %v254_v25   ;;  %v262_v27 = vld [vmem:[%s3142_s25 + $0x158] sm:$0xff]   ;;  %v266_v28 = vld [vmem:[%s3142_s25 + $0x160] sm:$0xff]  }
  0x1d   : > { %259 = vst [vmem:[%s3147_s26 + $0xd0] sm:$0xff] %v258_v26   ;;  %v270_v29 = vld [vmem:[%s3142_s25 + $0x168] sm:$0xff]   ;;  %263 = vst [vmem:[%s3147_s26 + $0xd8] sm:$0xff] %v262_v27   ;;  %v274_v30 = vld [vmem:[%s3142_s25 + $0x170] sm:$0xff]  }
  0x1e   : > { %267 = vst [vmem:[%s3147_s26 + $0xe0] sm:$0xff] %v266_v28   ;;  %271 = vst [vmem:[%s3147_s26 + $0xe8] sm:$0xff] %v270_v29   ;;  %v278_v31 = vld [vmem:[%s3142_s25 + $0x178] sm:$0xff]   ;;  %v282_v32 = vld [vmem:[%s3142_s25 + $0x200] sm:$0xff]  }
  0x1f   : > { %275 = vst [vmem:[%s3147_s26 + $0xf0] sm:$0xff] %v274_v30   ;;  %279 = vst [vmem:[%s3147_s26 + $0xf8] sm:$0xff] %v278_v31   ;;  %v286_v33 = vld [vmem:[%s3142_s25 + $0x208] sm:$0xff]   ;;  %v290_v34 = vld [vmem:[%s3142_s25 + $0x210] sm:$0xff]  }
  0x20   : > { %283 = vst [vmem:[%s3147_s26 + $0x100] sm:$0xff] %v282_v32   ;;  %v294_v35 = vld [vmem:[%s3142_s25 + $0x218] sm:$0xff]   ;;  %287 = vst [vmem:[%s3147_s26 + $0x108] sm:$0xff] %v286_v33   ;;  %v298_v36 = vld [vmem:[%s3142_s25 + $0x220] sm:$0xff]  }
  0x21   : > { %291 = vst [vmem:[%s3147_s26 + $0x110] sm:$0xff] %v290_v34   ;;  %295 = vst [vmem:[%s3147_s26 + $0x118] sm:$0xff] %v294_v35   ;;  %v302_v37 = vld [vmem:[%s3142_s25 + $0x228] sm:$0xff]   ;;  %v306_v38 = vld [vmem:[%s3142_s25 + $0x230] sm:$0xff]  }
  0x22   : > { %299 = vst [vmem:[%s3147_s26 + $0x120] sm:$0xff] %v298_v36   ;;  %303 = vst [vmem:[%s3147_s26 + $0x128] sm:$0xff] %v302_v37   ;;  %v310_v39 = vld [vmem:[%s3142_s25 + $0x238] sm:$0xff]   ;;  %v314_v40 = vld [vmem:[%s3142_s25 + $0x240] sm:$0xff]  }
  0x23   : > { %307 = vst [vmem:[%s3147_s26 + $0x130] sm:$0xff] %v306_v38   ;;  %v318_v41 = vld [vmem:[%s3142_s25 + $0x248] sm:$0xff]   ;;  %311 = vst [vmem:[%s3147_s26 + $0x138] sm:$0xff] %v310_v39   ;;  %v322_v42 = vld [vmem:[%s3142_s25 + $0x250] sm:$0xff]  }
  0x24   : > { %315 = vst [vmem:[%s3147_s26 + $0x140] sm:$0xff] %v314_v40   ;;  %319 = vst [vmem:[%s3147_s26 + $0x148] sm:$0xff] %v318_v41   ;;  %v326_v43 = vld [vmem:[%s3142_s25 + $0x258] sm:$0xff]   ;;  %v330_v44 = vld [vmem:[%s3142_s25 + $0x260] sm:$0xff]  }
  0x25   : > { %323 = vst [vmem:[%s3147_s26 + $0x150] sm:$0xff] %v322_v42   ;;  %327 = vst [vmem:[%s3147_s26 + $0x158] sm:$0xff] %v326_v43   ;;  %v334_v45 = vld [vmem:[%s3142_s25 + $0x268] sm:$0xff]   ;;  %v338_v46 = vld [vmem:[%s3142_s25 + $0x270] sm:$0xff]  }
  0x26   : > { %331 = vst [vmem:[%s3147_s26 + $0x160] sm:$0xff] %v330_v44   ;;  %v342_v47 = vld [vmem:[%s3142_s25 + $0x278] sm:$0xff]   ;;  %335 = vst [vmem:[%s3147_s26 + $0x168] sm:$0xff] %v334_v45   ;;  %v346_v48 = vld [vmem:[%s3142_s25 + $0x300] sm:$0xff]  }
  0x27   : > { %339 = vst [vmem:[%s3147_s26 + $0x170] sm:$0xff] %v338_v46   ;;  %343 = vst [vmem:[%s3147_s26 + $0x178] sm:$0xff] %v342_v47   ;;  %v350_v49 = vld [vmem:[%s3142_s25 + $0x308] sm:$0xff]   ;;  %v354_v50 = vld [vmem:[%s3142_s25 + $0x310] sm:$0xff]  }
  0x28   : > { %347 = vst [vmem:[%s3147_s26 + $0x180] sm:$0xff] %v346_v48   ;;  %351 = vst [vmem:[%s3147_s26 + $0x188] sm:$0xff] %v350_v49   ;;  %v358_v51 = vld [vmem:[%s3142_s25 + $0x318] sm:$0xff]   ;;  %v362_v52 = vld [vmem:[%s3142_s25 + $0x320] sm:$0xff]  }
  0x29   : > { %355 = vst [vmem:[%s3147_s26 + $0x190] sm:$0xff] %v354_v50   ;;  %v366_v53 = vld [vmem:[%s3142_s25 + $0x328] sm:$0xff]   ;;  %359 = vst [vmem:[%s3147_s26 + $0x198] sm:$0xff] %v358_v51   ;;  %v370_v54 = vld [vmem:[%s3142_s25 + $0x330] sm:$0xff]  }
  0x2a   : > { %363 = vst [vmem:[%s3147_s26 + $0x1a0] sm:$0xff] %v362_v52   ;;  %367 = vst [vmem:[%s3147_s26 + $0x1a8] sm:$0xff] %v366_v53   ;;  %v374_v55 = vld [vmem:[%s3142_s25 + $0x338] sm:$0xff]   ;;  %v378_v56 = vld [vmem:[%s3142_s25 + $0x340] sm:$0xff]  }
  0x2b   : > { %371 = vst [vmem:[%s3147_s26 + $0x1b0] sm:$0xff] %v370_v54   ;;  %375 = vst [vmem:[%s3147_s26 + $0x1b8] sm:$0xff] %v374_v55   ;;  %v382_v57 = vld [vmem:[%s3142_s25 + $0x348] sm:$0xff]   ;;  %v386_v58 = vld [vmem:[%s3142_s25 + $0x350] sm:$0xff]  }
  0x2c   : > { %379 = vst [vmem:[%s3147_s26 + $0x1c0] sm:$0xff] %v378_v56   ;;  %v390_v59 = vld [vmem:[%s3142_s25 + $0x358] sm:$0xff]   ;;  %383 = vst [vmem:[%s3147_s26 + $0x1c8] sm:$0xff] %v382_v57   ;;  %v394_v60 = vld [vmem:[%s3142_s25 + $0x360] sm:$0xff]  }
  0x2d   : > { %387 = vst [vmem:[%s3147_s26 + $0x1d0] sm:$0xff] %v386_v58   ;;  %391 = vst [vmem:[%s3147_s26 + $0x1d8] sm:$0xff] %v390_v59   ;;  %v398_v61 = vld [vmem:[%s3142_s25 + $0x368] sm:$0xff]   ;;  %v402_v62 = vld [vmem:[%s3142_s25 + $0x370] sm:$0xff]  }
  0x2e   : > { %395 = vst [vmem:[%s3147_s26 + $0x1e0] sm:$0xff] %v394_v60   ;;  %399 = vst [vmem:[%s3147_s26 + $0x1e8] sm:$0xff] %v398_v61   ;;  %v406_v63 = vld [vmem:[%s3142_s25 + $0x378] sm:$0xff]  }
  0x2f   : > { %403 = vst [vmem:[%s3147_s26 + $0x1f0] sm:$0xff] %v402_v62   ;;  %407 = vst [vmem:[%s3147_s26 + $0x1f8] sm:$0xff] %v406_v63  }
  0x30 PF: > { %p2345_p5 = scmp.ge.s32.totalorder %s3086_s14, 1  ;;  %p688_p6 = scmp.lt.s32.totalorder %s3086_s14, 3 }
  0x32   : > { %p689_p7 = pnand %p2345_p5, %p688_p6 }
  0x34   : > { %692 = sbr.rel (%p689_p7) target bundleno = 420 (0x1a4), region = 69 }
  0x39   : > { %v2992_v0 = vld [vmem:[%s3738_s1 + $0x38] sm:$0xff]   ;;  %s695_s29 = sand.u32 1, %s3078_s12   ;;  %v2993_v1 = vld [vmem:[%s3738_s1 + $0x30] sm:$0xff]   ;;  %v3286_v2 = vld [vmem:[%s3738_s1 + $0x28] sm:$0xff]   ;;  %s2347_s24 = sshll.u32 %s2338_s15, 5 }
  0x3a   : > { %2776 = vmatprep.subr.bf16.mxu0 %v2992_v0  ;;  %2824 = vmatprep.subr.bf16.mxu1 %v2992_v0  ;;  %s2346_s5 = sshll.u32 %s695_s29, 9  ;;  %v3291_v3 = vld [vmem:[%s3738_s1 + $0x20] sm:$0xff]   ;;  %v3306_v6 = vld [vmem:[%s3738_s1 + $0x18] sm:$0xff]   ;;  %v3315_v7 = vld [vmem:[%s3738_s1 + $0x10] sm:$0xff]   ;;  %p720_p8 = scmp.lt.s32.totalorder %s2347_s24, 63 }
  0x3b   : > { %2777 = vmatpush3.bf16.msra.mxu0 %v2992_v0  ;;  %2825 = vmatpush3.bf16.msra.mxu1 %v2992_v0  ;;  %s3295_s10 = scalar_lea.vmem [#allocation2], %s2346_s5  ;;  %v3324_v8 = vld [vmem:[%s3738_s1 + $0x8] sm:$0xff]   ;;  %v3333_v9 = vld [vmem:[%s3738_s1] sm:$0xff]  }
  0x3c   : > { %2778 = vmatprep.subr.bf16.mxu0 %v2993_v1  ;;  %2826 = vmatprep.subr.bf16.mxu1 %v2993_v1  ;;  %v3000_v4 = vld [vmem:[%s3295_s10] sm:$0xff]   ;;  %v3002_v10 = vld [vmem:[%s3295_s10 + $0x8] sm:$0xff]   ;;  %v3004_v12 = vld [vmem:[%s3295_s10 + $0x10] sm:$0xff]   ;;  %s3795_s24 = smov (!%p720_p8, %s2347_s24), 63 }
  0x3d   : > { %v3001_v5 = vld [vmem:[%s3295_s10 + $0x80] sm:$0xff]   ;;  %2792 = vmatprep.mubr.bf16.mxu0 %v3000_v4  ;;  %v3003_v11 = vld [vmem:[%s3295_s10 + $0x88] sm:$0xff]   ;;  %v3005_v13 = vld [vmem:[%s3295_s10 + $0x90] sm:$0xff]   ;;  %s2348_s15 = sshll.u32 %s3795_s24, 2 }
  0x3e   : > { %2840 = vmatprep.mubr.bf16.mxu1 %v3001_v5  ;;  %v3006_v14 = vld [vmem:[%s3295_s10 + $0x18] sm:$0xff]   ;;  %v3008_v16 = vld [vmem:[%s3295_s10 + $0x20] sm:$0xff]   ;;  %v3010_v18 = vld [vmem:[%s3295_s10 + $0x28] sm:$0xff]   ;;  %s3621_s28 = scalar_lea.vmem %s3740_s3, %s2348_s15 }
  0x3f   : > { %2779 = vmatpush3.bf16.msra.mxu0 %v2993_v1  ;;  %2827 = vmatpush3.bf16.msra.mxu1 %v2993_v1  ;;  %v3007_v15 = vld [vmem:[%s3295_s10 + $0x98] sm:$0xff]   ;;  %v3009_v17 = vld [vmem:[%s3295_s10 + $0xa0] sm:$0xff]   ;;  %v3011_v19 = vld [vmem:[%s3295_s10 + $0xa8] sm:$0xff]  }
  0x40   : > { %2780 = vmatprep.subr.bf16.mxu0 %v3286_v2  ;;  %2828 = vmatprep.subr.bf16.mxu1 %v3286_v2  ;;  %v3012_v20 = vld [vmem:[%s3295_s10 + $0x30] sm:$0xff]   ;;  %v3014_v22 = vld [vmem:[%s3295_s10 + $0x38] sm:$0xff]   ;;  %v3016_v24 = vld [vmem:[%s3295_s10 + $0x40] sm:$0xff]  }
  0x41   : > { %v3013_v21 = vld [vmem:[%s3295_s10 + $0xb0] sm:$0xff]   ;;  %v3015_v23 = vld [vmem:[%s3295_s10 + $0xb8] sm:$0xff]   ;;  %v3017_v25 = vld [vmem:[%s3295_s10 + $0xc0] sm:$0xff]  }
  0x42   : > { %v3018_v26 = vld [vmem:[%s3295_s10 + $0x48] sm:$0xff]   ;;  %v3020_v28 = vld [vmem:[%s3295_s10 + $0x50] sm:$0xff]   ;;  %v3022_v30 = vld [vmem:[%s3295_s10 + $0x58] sm:$0xff]  }
  0x43   : > { %2781 = vmatpush3.bf16.msra.mxu0 %v3286_v2  ;;  %2829 = vmatpush3.bf16.msra.mxu1 %v3286_v2  ;;  %v3019_v27 = vld [vmem:[%s3295_s10 + $0xc8] sm:$0xff]   ;;  %v3021_v29 = vld [vmem:[%s3295_s10 + $0xd0] sm:$0xff]   ;;  %v3023_v31 = vld [vmem:[%s3295_s10 + $0xd8] sm:$0xff]  }
  0x44   : > { %2782 = vmatprep.subr.bf16.mxu0 %v3291_v3  ;;  %2830 = vmatprep.subr.bf16.mxu1 %v3291_v3  ;;  %v3024_v32 = vld [vmem:[%s3295_s10 + $0x60] sm:$0xff]   ;;  %v3026_v34 = vld [vmem:[%s3295_s10 + $0x68] sm:$0xff]   ;;  %v3028_v36 = vld [vmem:[%s3295_s10 + $0x70] sm:$0xff]  }
  0x45   : > { %v3025_v33 = vld [vmem:[%s3295_s10 + $0xe0] sm:$0xff]   ;;  %v3027_v35 = vld [vmem:[%s3295_s10 + $0xe8] sm:$0xff]   ;;  %v3029_v37 = vld [vmem:[%s3295_s10 + $0xf0] sm:$0xff]  }
  0x46   : > { %v3030_v38 = vld [vmem:[%s3295_s10 + $0x78] sm:$0xff]   ;;  %v3032_v40 = vld [vmem:[%s3295_s10 + $0x100] sm:$0xff]   ;;  %v3034_v42 = vld [vmem:[%s3295_s10 + $0x108] sm:$0xff]  }
  0x47   : > { %2783 = vmatpush3.bf16.msra.mxu0 %v3291_v3  ;;  %2831 = vmatpush3.bf16.msra.mxu1 %v3291_v3  ;;  %v3031_v39 = vld [vmem:[%s3295_s10 + $0xf8] sm:$0xff]   ;;  %v3033_v41 = vld [vmem:[%s3295_s10 + $0x180] sm:$0xff]   ;;  %v3035_v43 = vld [vmem:[%s3295_s10 + $0x188] sm:$0xff]  }
  0x48   : > { %2784 = vmatprep.subr.bf16.mxu0 %v3306_v6  ;;  %2832 = vmatprep.subr.bf16.mxu1 %v3306_v6  ;;  %v3036_v44 = vld [vmem:[%s3295_s10 + $0x110] sm:$0xff]   ;;  %v3038_v46 = vld [vmem:[%s3295_s10 + $0x118] sm:$0xff]   ;;  %v3040_v48 = vld [vmem:[%s3295_s10 + $0x120] sm:$0xff]  }
  0x49   : > { %v3037_v45 = vld [vmem:[%s3295_s10 + $0x190] sm:$0xff]   ;;  %v3039_v47 = vld [vmem:[%s3295_s10 + $0x198] sm:$0xff]   ;;  %v3041_v49 = vld [vmem:[%s3295_s10 + $0x1a0] sm:$0xff]  }
  0x4a   : > { %v3042_v50 = vld [vmem:[%s3295_s10 + $0x128] sm:$0xff]   ;;  %v3044_v52 = vld [vmem:[%s3295_s10 + $0x130] sm:$0xff]   ;;  %v3046_v54 = vld [vmem:[%s3295_s10 + $0x138] sm:$0xff]  }
  0x4b   : > { %2785 = vmatpush3.bf16.msra.mxu0 %v3306_v6  ;;  %2833 = vmatpush3.bf16.msra.mxu1 %v3306_v6  ;;  %v3043_v51 = vld [vmem:[%s3295_s10 + $0x1a8] sm:$0xff]   ;;  %v3045_v53 = vld [vmem:[%s3295_s10 + $0x1b0] sm:$0xff]   ;;  %v3047_v55 = vld [vmem:[%s3295_s10 + $0x1b8] sm:$0xff]  }
  0x4c   : > { %2786 = vmatprep.subr.bf16.mxu0 %v3315_v7  ;;  %2834 = vmatprep.subr.bf16.mxu1 %v3315_v7  ;;  %v3048_v56 = vld [vmem:[%s3295_s10 + $0x140] sm:$0xff]   ;;  %v3050_v58 = vld [vmem:[%s3295_s10 + $0x148] sm:$0xff]   ;;  %v3052_v60 = vld [vmem:[%s3295_s10 + $0x150] sm:$0xff]  }
  0x4d   : > { %v3049_v57 = vld [vmem:[%s3295_s10 + $0x1c0] sm:$0xff]   ;;  %v3051_v59 = vld [vmem:[%s3295_s10 + $0x1c8] sm:$0xff]   ;;  %v3053_v61 = vld [vmem:[%s3295_s10 + $0x1d0] sm:$0xff]  }
  0x4e   : > { %v3054_v62 = vld [vmem:[%s3295_s10 + $0x158] sm:$0xff]   ;;  %v3060_v4 = vld [vmem:[%s3295_s10 + $0x170] sm:$0xff]  }
  0x4f   : > { %2787 = vmatpush3.bf16.msra.mxu0 %v3315_v7  ;;  %2835 = vmatpush3.bf16.msra.mxu1 %v3315_v7  ;;  %v3055_v63 = vld [vmem:[%s3295_s10 + $0x1d8] sm:$0xff]   ;;  %v3061_v5 = vld [vmem:[%s3295_s10 + $0x1f0] sm:$0xff]  }
  0x50   : > { %2788 = vmatprep.subr.bf16.mxu0 %v3324_v8  ;;  %2836 = vmatprep.subr.bf16.mxu1 %v3324_v8 }
  0x53   : > { %2789 = vmatpush3.bf16.msra.mxu0 %v3324_v8  ;;  %2837 = vmatpush3.bf16.msra.mxu1 %v3324_v8 }
  0x54   : > { %2790 = vmatprep.subr.bf16.mxu0 %v3333_v9  ;;  %2838 = vmatprep.subr.bf16.mxu1 %v3333_v9 }
  0x57   : > { %2791 = vmatpush3.bf16.msra.mxu0 %v3333_v9  ;;  %2839 = vmatpush3.bf16.msra.mxu1 %v3333_v9 }
  0x58   : > { %2872 = vmatprep.subr.bf16.mxu0 %v2992_v0  ;;  %2920 = vmatprep.subr.bf16.mxu1 %v2992_v0 }
  0x5a   : > { %2793 = vmatmul.mubr.bf16.vlgmr.msra.gmra.mxu0 %v3002_v10  ;;  %2841 = vmatmul.mubr.bf16.vlgmr.msra.gmra.mxu1 %v3003_v11 }
  0x5b   : > { %2873 = vmatpush3.bf16.msra.mxu0 %v2992_v0  ;;  %2921 = vmatpush3.bf16.msra.mxu1 %v2992_v0  ;;  %v3056_v0 = vld [vmem:[%s3295_s10 + $0x160] sm:$0xff]  }
  0x5c   : > { %2796 = vmatprep.mubr.bf16.mxu0 %v3004_v12  ;;  %2844 = vmatprep.mubr.bf16.mxu1 %v3005_v13 }
  0x5d   : > { %2874 = vmatprep.subr.bf16.mxu0 %v2993_v1  ;;  %2922 = vmatprep.subr.bf16.mxu1 %v2993_v1 }
  0x5f   : > { %2875 = vmatpush3.bf16.msra.mxu0 %v2993_v1  ;;  %2923 = vmatpush3.bf16.msra.mxu1 %v2993_v1  ;;  %v3057_v1 = vld [vmem:[%s3295_s10 + $0x1e0] sm:$0xff]  }
  0x60   : > { %2876 = vmatprep.subr.bf16.mxu0 %v3286_v2  ;;  %2924 = vmatprep.subr.bf16.mxu1 %v3286_v2 }
  0x62   : > { %2797 = vmatmul.mubr.bf16.gmra.mxu0 %v3006_v14  ;;  %2845 = vmatmul.mubr.bf16.gmra.mxu1 %v3007_v15 }
  0x63   : > { %2800 = vmatprep.mubr.bf16.mxu0 %v3008_v16  ;;  %2848 = vmatprep.mubr.bf16.mxu1 %v3009_v17 }
  0x64   : > { %2877 = vmatpush3.bf16.msra.mxu0 %v3286_v2  ;;  %2925 = vmatpush3.bf16.msra.mxu1 %v3286_v2  ;;  %v3058_v2 = vld [vmem:[%s3295_s10 + $0x168] sm:$0xff]  }
  0x65   : > { %2878 = vmatprep.subr.bf16.mxu0 %v3291_v3  ;;  %2926 = vmatprep.subr.bf16.mxu1 %v3291_v3 }
  0x68   : > { %2879 = vmatpush3.bf16.msra.mxu0 %v3291_v3  ;;  %2927 = vmatpush3.bf16.msra.mxu1 %v3291_v3  ;;  %v3059_v3 = vld [vmem:[%s3295_s10 + $0x1e8] sm:$0xff]  }
  0x69   : > { %2880 = vmatprep.subr.bf16.mxu0 %v3306_v6  ;;  %2928 = vmatprep.subr.bf16.mxu1 %v3306_v6 }
  0x6a   : > { %2801 = vmatmul.mubr.bf16.gmra.mxu0 %v3010_v18  ;;  %2849 = vmatmul.mubr.bf16.gmra.mxu1 %v3011_v19 }
  0x6b   : > { %2804 = vmatprep.mubr.bf16.mxu0 %v3012_v20  ;;  %2852 = vmatprep.mubr.bf16.mxu1 %v3013_v21 }
  0x6c   : > { %2881 = vmatpush3.bf16.msra.mxu0 %v3306_v6  ;;  %2929 = vmatpush3.bf16.msra.mxu1 %v3306_v6  ;;  %v3062_v6 = vld [vmem:[%s3295_s10 + $0x178] sm:$0xff]  }
  0x6d   : > { %2882 = vmatprep.subr.bf16.mxu0 %v3315_v7  ;;  %2930 = vmatprep.subr.bf16.mxu1 %v3315_v7 }
  0x70   : > { %2883 = vmatpush3.bf16.msra.mxu0 %v3315_v7  ;;  %2931 = vmatpush3.bf16.msra.mxu1 %v3315_v7  ;;  %v3063_v7 = vld [vmem:[%s3295_s10 + $0x1f8] sm:$0xff]  }
  0x71   : > { %2884 = vmatprep.subr.bf16.mxu0 %v3324_v8  ;;  %2932 = vmatprep.subr.bf16.mxu1 %v3324_v8 }
  0x72   : > { %2805 = vmatmul.mubr.bf16.gmra.mxu0 %v3014_v22  ;;  %2853 = vmatmul.mubr.bf16.gmra.mxu1 %v3015_v23 }
  0x73   : > { %2808 = vmatprep.mubr.bf16.mxu0 %v3016_v24  ;;  %2856 = vmatprep.mubr.bf16.mxu1 %v3017_v25 }
  0x74   : > { %2885 = vmatpush3.bf16.msra.mxu0 %v3324_v8  ;;  %2933 = vmatpush3.bf16.msra.mxu1 %v3324_v8 }
  0x75   : > { %2886 = vmatprep.subr.bf16.mxu0 %v3333_v9  ;;  %2934 = vmatprep.subr.bf16.mxu1 %v3333_v9 }
  0x78   : > { %2887 = vmatpush3.bf16.msra.mxu0 %v3333_v9  ;;  %2935 = vmatpush3.bf16.msra.mxu1 %v3333_v9 }
  0x7a   : > { %2809 = vmatmul.mubr.bf16.gmra.mxu0 %v3018_v26  ;;  %2857 = vmatmul.mubr.bf16.gmra.mxu1 %v3019_v27 }
  0x7b   : > { %2812 = vmatprep.mubr.bf16.mxu0 %v3020_v28  ;;  %2860 = vmatprep.mubr.bf16.mxu1 %v3021_v29 }
  0x82   : > { %2813 = vmatmul.mubr.bf16.gmra.mxu0 %v3022_v30  ;;  %2861 = vmatmul.mubr.bf16.gmra.mxu1 %v3023_v31 }
  0x83   : > { %2816 = vmatprep.mubr.bf16.mxu0 %v3024_v32  ;;  %2864 = vmatprep.mubr.bf16.mxu1 %v3025_v33 }
  0x8a   : > { %2817 = vmatmul.mubr.bf16.gmra.mxu0 %v3026_v34  ;;  %2865 = vmatmul.mubr.bf16.gmra.mxu1 %v3027_v35 }
  0x8b   : > { %2820 = vmatprep.mubr.bf16.mxu0 %v3028_v36  ;;  %2868 = vmatprep.mubr.bf16.mxu1 %v3029_v37 }
  0x92   : > { %2821 = vmatmul.mubr.bf16.gmra.mxu0 %v3030_v38  ;;  %2869 = vmatmul.mubr.bf16.gmra.mxu1 %v3031_v39 }
  0x93   : > { %2888 = vmatprep.mubr.bf16.mxu0 %v3032_v40  ;;  %2936 = vmatprep.mubr.bf16.mxu1 %v3033_v41 }
  0x9a   : > { %2889 = vmatmul.mubr.bf16.vlgmr.msra.gmra.mxu0 %v3034_v42  ;;  %2937 = vmatmul.mubr.bf16.vlgmr.msra.gmra.mxu1 %v3035_v43 }
  0x9b   : > { %2892 = vmatprep.mubr.bf16.mxu0 %v3036_v44  ;;  %2940 = vmatprep.mubr.bf16.mxu1 %v3037_v45 }
  0xa2   : > { %2893 = vmatmul.mubr.bf16.gmra.mxu0 %v3038_v46  ;;  %2941 = vmatmul.mubr.bf16.gmra.mxu1 %v3039_v47 }
  0xa3   : > { %2896 = vmatprep.mubr.bf16.mxu0 %v3040_v48  ;;  %2944 = vmatprep.mubr.bf16.mxu1 %v3041_v49 }
  0xaa   : > { %2897 = vmatmul.mubr.bf16.gmra.mxu0 %v3042_v50  ;;  %2945 = vmatmul.mubr.bf16.gmra.mxu1 %v3043_v51 }
  0xab   : > { %2900 = vmatprep.mubr.bf16.mxu0 %v3044_v52  ;;  %2948 = vmatprep.mubr.bf16.mxu1 %v3045_v53 }
  0xb2   : > { %2901 = vmatmul.mubr.bf16.gmra.mxu0 %v3046_v54  ;;  %2949 = vmatmul.mubr.bf16.gmra.mxu1 %v3047_v55 }
  0xb3   : > { %2904 = vmatprep.mubr.bf16.mxu0 %v3048_v56  ;;  %2952 = vmatprep.mubr.bf16.mxu1 %v3049_v57 }
  0xba   : > { %2905 = vmatmul.mubr.bf16.gmra.mxu0 %v3050_v58  ;;  %2953 = vmatmul.mubr.bf16.gmra.mxu1 %v3051_v59 }
  0xbb   : > { %2908 = vmatprep.mubr.bf16.mxu0 %v3052_v60  ;;  %2956 = vmatprep.mubr.bf16.mxu1 %v3053_v61 }
  0xc2   : > { %2909 = vmatmul.mubr.bf16.gmra.mxu0 %v3054_v62  ;;  %2957 = vmatmul.mubr.bf16.gmra.mxu1 %v3055_v63 }
  0xc3   : > { %2912 = vmatprep.mubr.bf16.mxu0 %v3056_v0  ;;  %2960 = vmatprep.mubr.bf16.mxu1 %v3057_v1 }
  0xca   : > { %2913 = vmatmul.mubr.bf16.gmra.mxu0 %v3058_v2  ;;  %2961 = vmatmul.mubr.bf16.gmra.mxu1 %v3059_v3 }
  0xcb   : > { %2916 = vmatprep.mubr.bf16.mxu0 %v3060_v4  ;;  %2964 = vmatprep.mubr.bf16.mxu1 %v3061_v5 }
  0xd2   : > { %2917 = vmatmul.mubr.bf16.gmra.mxu0 %v3062_v6  ;;  %2965 = vmatmul.mubr.bf16.gmra.mxu1 %v3063_v7 }
 0x11a   : > { %v3427_v8 = vpop.f32.mrf.mxu0  ;;  %v3429_v9 = vpop.f32.mrf.mxu1 }
 0x11b   : > { %v3761_v6 = vmax.f32 %v3427_v8, %v3429_v9 }
 0x11c   : > { %v3433_v11 = vpop.f32.mrf.mxu0  ;;  %v3435_v12 = vpop.f32.mrf.mxu1 }
 0x11e   : > { %v3439_v14 = vpop.f32.mrf.mxu0  ;;  %v3441_v15 = vpop.f32.mrf.mxu1 }
 0x11f   : > { %v1372_v63 = vmax.f32 %v3439_v14, %v3441_v15 }
 0x120   : > { %v3443_v16 = vpop.f32.mrf.mxu0  ;;  %v3445_v17 = vpop.f32.mrf.mxu1 }
 0x121   : > { %v1370_v8 = vmax.f32 %v3443_v16, %v3445_v17 }
 0x122   : > { %v3447_v18 = vpop.f32.mrf.mxu0  ;;  %v3449_v19 = vpop.f32.mrf.mxu1 }
 0x123   : > { %v3763_v16 = vmax.f32 %v3447_v18, %v3449_v19 }
 0x124   : > { %v3453_v21 = vpop.f32.mrf.mxu0  ;;  %v3455_v22 = vpop.f32.mrf.mxu1 }
 0x126   : > { %v3459_v24 = vpop.f32.mrf.mxu0  ;;  %v3461_v25 = vpop.f32.mrf.mxu1 }
 0x128   : > { %v3463_v26 = vpop.f32.mrf.mxu0  ;;  %v3465_v27 = vpop.f32.mrf.mxu1 }
 0x12a   : > { %v3467_v28 = vpop.f32.mrf.mxu0  ;;  %v3469_v29 = vpop.f32.mrf.mxu1 }
 0x12c   : > { %v3473_v31 = vpop.f32.mrf.mxu0  ;;  %v3475_v32 = vpop.f32.mrf.mxu1 }
 0x12e   : > { %v3479_v34 = vpop.f32.mrf.mxu0  ;;  %v3481_v35 = vpop.f32.mrf.mxu1 }
 0x130   : > { %v3483_v36 = vpop.f32.mrf.mxu0  ;;  %v3485_v37 = vpop.f32.mrf.mxu1 }
 0x132   : > { %v3487_v38 = vpop.f32.mrf.mxu0  ;;  %v3489_v39 = vpop.f32.mrf.mxu1 }
 0x134   : > { %v3493_v41 = vpop.f32.mrf.mxu0  ;;  %v3495_v42 = vpop.f32.mrf.mxu1 }
 0x136   : > { %v3499_v44 = vpop.f32.mrf.mxu0  ;;  %v3501_v45 = vpop.f32.mrf.mxu1 }
 0x138   : > { %v3503_v46 = vpop.f32.mrf.mxu0  ;;  %v3505_v47 = vpop.f32.mrf.mxu1 }
 0x13a   : > { %v3507_v48 = vpop.f32.mrf.mxu0  ;;  %v3509_v49 = vpop.f32.mrf.mxu1 }
 0x13c   : > { %v3513_v51 = vpop.f32.mrf.mxu0  ;;  %v3515_v52 = vpop.f32.mrf.mxu1 }
 0x13e   : > { %v3519_v54 = vpop.f32.mrf.mxu0  ;;  %v3521_v55 = vpop.f32.mrf.mxu1 }
 0x140   : > { %v3523_v56 = vpop.f32.mrf.mxu0  ;;  %v3525_v57 = vpop.f32.mrf.mxu1 }
 0x142   : > { %v3527_v58 = vpop.f32.mrf.mxu0  ;;  %v3529_v59 = vpop.f32.mrf.mxu1 }
 0x144   : > { %v3533_v61 = vpop.f32.mrf.mxu0  ;;  %v3535_v62 = vpop.f32.mrf.mxu1 }
 0x146   : > { %v3539_v0 = vpop.f32.mrf.mxu0  ;;  %v3541_v1 = vpop.f32.mrf.mxu1 }
 0x148   : > { %v3543_v2 = vpop.f32.mrf.mxu0  ;;  %v3545_v3 = vpop.f32.mrf.mxu1 }
 0x14a   : > { %v3547_v4 = vpop.f32.mrf.mxu0  ;;  %v3549_v5 = vpop.f32.mrf.mxu1 }
 0x14c   : > { %v3553_v7 = vpop.f32.mrf.mxu0  ;;  %v3555_v60 = vpop.f32.mrf.mxu1 }
 0x14d   : > { %3747 = vst [vmem:[#allocation3_spill] sm:$0xff] %v3553_v7  ;;  %3748 = vst [vmem:[#allocation4_spill] sm:$0xff] %v3555_v60 }
 0x14e   : > { %v3559_v53 = vpop.f32.mrf.mxu0  ;;  %v3561_v50 = vpop.f32.mrf.mxu1 }
 0x14f   : > { %3749 = vst [vmem:[#allocation5_spill] sm:$0xff] %v3559_v53  ;;  %3750 = vst [vmem:[#allocation6_spill] sm:$0xff] %v3561_v50 }
 0x150   : > { %v3563_v43 = vpop.f32.mrf.mxu0  ;;  %v3565_v40 = vpop.f32.mrf.mxu1 }
 0x151   : > { %3751 = vst [vmem:[#allocation7_spill] sm:$0xff] %v3563_v43  ;;  %3752 = vst [vmem:[#allocation8_spill] sm:$0xff] %v3565_v40 }
 0x152   : > { %v3567_v33 = vpop.f32.mrf.mxu0  ;;  %v3569_v30 = vpop.f32.mrf.mxu1 }
 0x153   : > { %3753 = vst [vmem:[#allocation9_spill] sm:$0xff] %v3567_v33  ;;  %3754 = vst [vmem:[#allocation10_spill] sm:$0xff] %v3569_v30 }
 0x154   : > { %v3573_v23 = vpop.f32.mrf.mxu0  ;;  %v3575_v20 = vpop.f32.mrf.mxu1 }
 0x155   : > { %3755 = vst [vmem:[#allocation11_spill] sm:$0xff] %v3573_v23  ;;  %3756 = vst [vmem:[#allocation12_spill] sm:$0xff] %v3575_v20 }
 0x156   : > { %v3579_v13 = vpop.f32.mrf.mxu0  ;;  %v3581_v10 = vpop.f32.mrf.mxu1 }
 0x157   : > { %3757 = vst [vmem:[#allocation13_spill] sm:$0xff] %v3579_v13  ;;  %3758 = vst [vmem:[#allocation14_spill] sm:$0xff] %v3581_v10 }
 0x158   : > { %v3583_v43 = vpop.f32.mrf.mxu0  ;;  %v3585_v40 = vpop.f32.mrf.mxu1 }
 0x159   : > { %3759 = vst [vmem:[#allocation15_spill] sm:$0xff] %v3583_v43  ;;  %3760 = vst [vmem:[#allocation16_spill] sm:$0xff] %v3585_v40  ;;  %v3762_v43 = vmax.f32 %v3433_v11, %v3435_v12  ;;  %v3600_v40 = vld [vmem:[%s3739_s2] ss:$0 sm:$0xff] }
 0x15a   : > { %v2890_v60 = vpop.f32.mrf.mxu0  ;;  %v2938_v7 = vpop.f32.mrf.mxu1 }
 0x15b   : > { %v1693_v30 = vmax.f32 %v3761_v6, %v2890_v60 }
 0x15c   : > { %v1564_v33 = vpop.f32.mrf.mxu0  ;;  %v1886_v53 = vpop.f32.mrf.mxu1 }
 0x15d   : > { %v2015_v13 = vmax.f32 %v1693_v30, %v2938_v7  ;;  %v1691_v10 = vmax.f32 %v3762_v43, %v1564_v33 }
 0x15e   : > { %v2891_v20 = vpop.f32.mrf.mxu0  ;;  %v2939_v23 = vpop.f32.mrf.mxu1 }
 0x15f   : > { %v2013_v9 = vmax.f32 %v1691_v10, %v1886_v53  ;;  %v1694_v60 = vmax.f32 %v1372_v63, %v2891_v20  ;;  %v2054_v15 = vadd.f32 %v3600_v40, %v2015_v13 }
 0x160   : > { %v1567_v6 = vpop.f32.mrf.mxu0  ;;  %v1889_v14 = vpop.f32.mrf.mxu1 }
 0x161   : > { %v2016_v30 = vmax.f32 %v1694_v60, %v2939_v23  ;;  %v1692_v11 = vmax.f32 %v1370_v8, %v1567_v6  ;;  %v2052_v43 = vadd.f32 %v3600_v40, %v2013_v9  ;;  %v2086_v53 = vmax.f32 %v2054_v15, 0.0 }
 0x162   : > { %v2894_v12 = vpop.f32.mrf.mxu0  ;;  %v2942_v33 = vpop.f32.mrf.mxu1  ;;  %v3764_v23 = vmax.f32 %v3453_v21, %v3455_v22  ;;  %v1376_v9 = vmax.f32 %v3459_v24, %v3461_v25  ;;  %v1374_v60 = vmax.f32 %v3463_v26, %v3465_v27 }
 0x163   : > { %v2055_v7 = vadd.f32 %v3600_v40, %v2016_v30  ;;  %v2014_v50 = vmax.f32 %v1692_v11, %v1889_v14  ;;  %v1697_v10 = vmax.f32 %v3763_v16, %v2894_v12  ;;  %v2084_v6 = vmax.f32 %v2052_v43, 0.0 }
 0x164   : > { %v1580_v17 = vpop.f32.mrf.mxu0  ;;  %v1902_v20 = vpop.f32.mrf.mxu1  ;;  %v3765_v43 = vmax.f32 %v3467_v28, %v3469_v29 }
 0x165   : > { %v2087_v63 = vmax.f32 %v2055_v7, 0.0  ;;  %v2053_v13 = vadd.f32 %v3600_v40, %v2014_v50  ;;  %v1695_v8 = vmax.f32 %v3764_v23, %v1580_v17  ;;  %v2019_v18 = vmax.f32 %v1697_v10, %v2942_v33 }
 0x166   : > { %v2895_v19 = vpop.f32.mrf.mxu0  ;;  %v2943_v50 = vpop.f32.mrf.mxu1 }
 0x167   : > { %v2593_v14 = vpack.c.bf16 %v2087_v63, %v2086_v53  ;;  %v2085_v21 = vmax.f32 %v2053_v13, 0.0  ;;  %v2017_v22 = vmax.f32 %v1695_v8, %v1902_v20  ;;  %v1698_v15 = vmax.f32 %v1376_v9, %v2895_v19 }
 0x168   : > { %v1583_v30 = vpop.f32.mrf.mxu0  ;;  %v1905_v24 = vpop.f32.mrf.mxu1  ;;  %v2058_v27 = vadd.f32 %v3600_v40, %v2019_v18  ;;  %v1380_v63 = vmax.f32 %v3479_v34, %v3481_v35  ;;  %v3766_v8 = vmax.f32 %v3473_v31, %v3475_v32 }
 0x169   : > { %2665 = vst [vmem:[%s3621_s28 + $0x8] sm:$0xff] %v2593_v14   ;;  %v2588_v25 = vpack.c.bf16 %v2085_v21, %v2084_v6  ;;  %v1696_v26 = vmax.f32 %v1374_v60, %v1583_v30  ;;  %v2020_v11 = vmax.f32 %v1698_v15, %v2943_v50  ;;  %v2056_v33 = vadd.f32 %v3600_v40, %v2017_v22 }
 0x16a   : > { %v2898_v12 = vpop.f32.mrf.mxu0  ;;  %v2946_v7 = vpop.f32.mrf.mxu1  ;;  %v2090_v60 = vmax.f32 %v2058_v27, 0.0  ;;  %v1378_v14 = vmax.f32 %v3483_v36, %v3485_v37  ;;  %v3767_v27 = vmax.f32 %v3487_v38, %v3489_v39  ;;  %v1384_v36 = vmax.f32 %v3499_v44, %v3501_v45 }
 0x16b   : > { %2589 = vst [vmem:[%s3621_s28] sm:$0xff] %v2588_v25   ;;  %v2018_v16 = vmax.f32 %v1696_v26, %v1905_v24  ;;  %v1701_v10 = vmax.f32 %v3765_v43, %v2898_v12  ;;  %v2059_v17 = vadd.f32 %v3600_v40, %v2020_v11  ;;  %v2088_v29 = vmax.f32 %v2056_v33, 0.0 }
 0x16c   : > { %v1596_v20 = vpop.f32.mrf.mxu0  ;;  %v1918_v53 = vpop.f32.mrf.mxu1  ;;  %v1382_v44 = vmax.f32 %v3503_v46, %v3505_v47 }
 0x16d   : > { %v2057_v13 = vadd.f32 %v3600_v40, %v2018_v16  ;;  %v2023_v23 = vmax.f32 %v1701_v10, %v2946_v7  ;;  %v1699_v9 = vmax.f32 %v3766_v8, %v1596_v20  ;;  %v2091_v18 = vmax.f32 %v2059_v17, 0.0 }
 0x16e   : > { %v2899_v19 = vpop.f32.mrf.mxu0  ;;  %v2947_v28 = vpop.f32.mrf.mxu1  ;;  %v3768_v17 = vmax.f32 %v3493_v41, %v3495_v42 }
 0x16f   : > { %v2089_v50 = vmax.f32 %v2057_v13, 0.0  ;;  %v1702_v6 = vmax.f32 %v1380_v63, %v2899_v19  ;;  %v2603_v34 = vpack.c.bf16 %v2091_v18, %v2090_v60  ;;  %v2021_v35 = vmax.f32 %v1699_v9, %v1918_v53 }
 0x170   : > { %v1599_v21 = vpop.f32.mrf.mxu0  ;;  %v1921_v22 = vpop.f32.mrf.mxu1  ;;  %v2062_v31 = vadd.f32 %v3600_v40, %v2023_v23 }
 0x171   : > { %v2598_v15 = vpack.c.bf16 %v2089_v50, %v2088_v29  ;;  %v2024_v32 = vmax.f32 %v1702_v6, %v2947_v28  ;;  %2667 = vst [vmem:[%s3621_s28 + $0x18] sm:$0xff] %v2603_v34   ;;  %v1700_v30 = vmax.f32 %v1378_v14, %v1599_v21  ;;  %v2060_v37 = vadd.f32 %v3600_v40, %v2021_v35 }
 0x172   : > { %v2902_v24 = vpop.f32.mrf.mxu0  ;;  %v2950_v25 = vpop.f32.mrf.mxu1  ;;  %v2094_v16 = vmax.f32 %v2062_v31, 0.0  ;;  %v3769_v6 = vmax.f32 %v3507_v48, %v3509_v49  ;;  %v3770_v31 = vmax.f32 %v3513_v51, %v3515_v52 }
 0x173   : > { %2666 = vst [vmem:[%s3621_s28 + $0x10] sm:$0xff] %v2598_v15   ;;  %v2063_v26 = vadd.f32 %v3600_v40, %v2024_v32  ;;  %v1705_v11 = vmax.f32 %v3767_v27, %v2902_v24  ;;  %v2022_v12 = vmax.f32 %v1700_v30, %v1921_v22  ;;  %v2092_v23 = vmax.f32 %v2060_v37, 0.0 }
 0x174   : > { %v1612_v7 = vpop.f32.mrf.mxu0  ;;  %v1934_v33 = vpop.f32.mrf.mxu1  ;;  %v1388_v30 = vmax.f32 %v3519_v54, %v3521_v55  ;;  %v1386_v24 = vmax.f32 %v3523_v56, %v3525_v57 }
 0x175   : > { %v2095_v43 = vmax.f32 %v2063_v26, 0.0  ;;  %v2027_v10 = vmax.f32 %v1705_v11, %v2950_v25  ;;  %v1703_v20 = vmax.f32 %v3768_v17, %v1612_v7  ;;  %v2061_v53 = vadd.f32 %v3600_v40, %v2022_v12 }
 0x176   : > { %v2903_v38 = vpop.f32.mrf.mxu0  ;;  %v2951_v39 = vpop.f32.mrf.mxu1 }
 0x177   : > { %v2613_v45 = vpack.c.bf16 %v2095_v43, %v2094_v16  ;;  %v2025_v63 = vmax.f32 %v1703_v20, %v1934_v33  ;;  %v1706_v13 = vmax.f32 %v1384_v36, %v2903_v38  ;;  %v2093_v8 = vmax.f32 %v2061_v53, 0.0 }
 0x178   : > { %v1615_v9 = vpop.f32.mrf.mxu0  ;;  %v1937_v60 = vpop.f32.mrf.mxu1  ;;  %v2066_v18 = vadd.f32 %v3600_v40, %v2027_v10  ;;  %v3771_v43 = vmax.f32 %v3527_v58, %v3529_v59  ;;  %v1392_v38 = vmax.f32 %v3539_v0, %v3541_v1 }
 0x179   : > { %2669 = vst [vmem:[%s3621_s28 + $0x28] sm:$0xff] %v2613_v45   ;;  %v2028_v41 = vmax.f32 %v1706_v13, %v2951_v39  ;;  %v1704_v42 = vmax.f32 %v1382_v44, %v1615_v9  ;;  %v2608_v19 = vpack.c.bf16 %v2093_v8, %v2092_v23  ;;  %v2064_v50 = vadd.f32 %v3600_v40, %v2025_v63 }
 0x17a   : > { %v2906_v28 = vpop.f32.mrf.mxu0  ;;  %v2954_v29 = vpop.f32.mrf.mxu1  ;;  %v2098_v21 = vmax.f32 %v2066_v18, 0.0  ;;  %v3772_v45 = vmax.f32 %v3533_v61, %v3535_v62  ;;  %v1390_v18 = vmax.f32 %v3543_v2, %v3545_v3  ;;  %v3774_v2 = vld [vmem:[#allocation6_spill] sm:$0xff]  ;;  %v3775_v3 = vld [vmem:[#allocation5_spill] sm:$0xff] }
 0x17b   : > { %v2067_v46 = vadd.f32 %v3600_v40, %v2028_v41  ;;  %v2026_v47 = vmax.f32 %v1704_v42, %v1937_v60  ;;  %v1709_v14 = vmax.f32 %v3769_v6, %v2906_v28  ;;  %2668 = vst [vmem:[%s3621_s28 + $0x20] sm:$0xff] %v2608_v19   ;;  %v2096_v26 = vmax.f32 %v2064_v50, 0.0 }
 0x17c   : > { %v1628_v34 = vpop.f32.mrf.mxu0  ;;  %v1950_v35 = vpop.f32.mrf.mxu1 }
 0x17d   : > { %v2099_v22 = vmax.f32 %v2067_v46, 0.0  ;;  %v2065_v15 = vadd.f32 %v3600_v40, %v2026_v47  ;;  %v1707_v32 = vmax.f32 %v3770_v31, %v1628_v34  ;;  %v2031_v48 = vmax.f32 %v1709_v14, %v2954_v29 }
 0x17e   : > { %v2907_v49 = vpop.f32.mrf.mxu0  ;;  %v2955_v25 = vpop.f32.mrf.mxu1  ;;  %v3773_v47 = vmax.f32 %v3547_v4, %v3549_v5  ;;  %v1396_v14 = vmax.f32 %v3775_v3, %v3774_v2 }
 0x17f   : > { %v2623_v27 = vpack.c.bf16 %v2099_v22, %v2098_v21  ;;  %v2097_v11 = vmax.f32 %v2065_v15, 0.0  ;;  %v2029_v36 = vmax.f32 %v1707_v32, %v1950_v35  ;;  %v1710_v37 = vmax.f32 %v1388_v30, %v2907_v49  ;;  %v3776_v30 = vld [vmem:[#allocation3_spill] sm:$0xff] }
 0x180   : > { %v1631_v12 = vpop.f32.mrf.mxu0  ;;  %v1953_v7 = vpop.f32.mrf.mxu1  ;;  %v2070_v33 = vadd.f32 %v3600_v40, %v2031_v48 }
 0x181   : > { %2671 = vst [vmem:[%s3621_s28 + $0x38] sm:$0xff] %v2623_v27   ;;  %v2618_v51 = vpack.c.bf16 %v2097_v11, %v2096_v26  ;;  %v1708_v52 = vmax.f32 %v1386_v24, %v1631_v12  ;;  %v2032_v54 = vmax.f32 %v1710_v37, %v2955_v25  ;;  %v2068_v56 = vadd.f32 %v3600_v40, %v2029_v36  ;;  %v3777_v24 = vld [vmem:[#allocation4_spill] sm:$0xff]  ;;  %v3780_v27 = vld [vmem:[#allocation7_spill] sm:$0xff] }
 0x182   : > { %v2910_v55 = vpop.f32.mrf.mxu0  ;;  %v2958_v16 = vpop.f32.mrf.mxu1  ;;  %v2102_v13 = vmax.f32 %v2070_v33, 0.0  ;;  %v3778_v48 = vmax.f32 %v3776_v30, %v3777_v24  ;;  %v3779_v26 = vld [vmem:[#allocation8_spill] sm:$0xff] }
 0x183   : > { %2670 = vst [vmem:[%s3621_s28 + $0x30] sm:$0xff] %v2618_v51   ;;  %v2030_v57 = vmax.f32 %v1708_v52, %v1953_v7  ;;  %v1713_v10 = vmax.f32 %v3771_v43, %v2910_v55  ;;  %v2071_v17 = vadd.f32 %v3600_v40, %v2032_v54  ;;  %v2100_v59 = vmax.f32 %v2068_v56, 0.0 }
 0x184   : > { %v1644_v20 = vpop.f32.mrf.mxu0  ;;  %v1966_v53 = vpop.f32.mrf.mxu1  ;;  %v1394_v11 = vmax.f32 %v3780_v27, %v3779_v26 }
 0x185   : > { %v2069_v39 = vadd.f32 %v3600_v40, %v2030_v57  ;;  %v2035_v44 = vmax.f32 %v1713_v10, %v2958_v16  ;;  %v1711_v63 = vmax.f32 %v3772_v45, %v1644_v20  ;;  %v2103_v23 = vmax.f32 %v2071_v17, 0.0 }
 0x186   : > { %v2911_v8 = vpop.f32.mrf.mxu0  ;;  %v2959_v58 = vpop.f32.mrf.mxu1 }
 0x187   : > { %v2101_v9 = vmax.f32 %v2069_v39, 0.0  ;;  %v1714_v60 = vmax.f32 %v1392_v38, %v2911_v8  ;;  %v2633_v0 = vpack.c.bf16 %v2103_v23, %v2102_v13  ;;  %v2033_v1 = vmax.f32 %v1711_v63, %v1966_v53  ;;  %v3781_v53 = vld [vmem:[#allocation9_spill] sm:$0xff]  ;;  %v3782_v38 = vld [vmem:[#allocation10_spill] sm:$0xff] }
 0x188   : > { %v1647_v41 = vpop.f32.mrf.mxu0  ;;  %v1969_v42 = vpop.f32.mrf.mxu1  ;;  %v2074_v61 = vadd.f32 %v3600_v40, %v2035_v44  ;;  %v3783_v39 = vmax.f32 %v3781_v53, %v3782_v38 }
 0x189   : > { %v2628_v19 = vpack.c.bf16 %v2101_v9, %v2100_v59  ;;  %v2036_v62 = vmax.f32 %v1714_v60, %v2959_v58  ;;  %2673 = vst [vmem:[%s3621_s28 + $0x48] sm:$0xff] %v2633_v0   ;;  %v1712_v28 = vmax.f32 %v1390_v18, %v1647_v41  ;;  %v2072_v34 = vadd.f32 %v3600_v40, %v2033_v1  ;;  %v3784_v58 = vld [vmem:[#allocation11_spill] sm:$0xff]  ;;  %v3785_v59 = vld [vmem:[#allocation12_spill] sm:$0xff]  ;;  %v3787_v18 = vld [vmem:[#allocation14_spill] sm:$0xff] }
 0x18a   : > { %v2914_v29 = vpop.f32.mrf.mxu0  ;;  %v2962_v50 = vpop.f32.mrf.mxu1  ;;  %v2106_v15 = vmax.f32 %v2074_v61, 0.0  ;;  %v3786_v9 = vmax.f32 %v3784_v58, %v3785_v59  ;;  %v3788_v0 = vld [vmem:[#allocation13_spill] sm:$0xff]  ;;  %v3789_v41 = vld [vmem:[#allocation16_spill] sm:$0xff] }
 0x18b   : > { %2672 = vst [vmem:[%s3621_s28 + $0x40] sm:$0xff] %v2628_v19   ;;  %v2075_v46 = vadd.f32 %v3600_v40, %v2036_v62  ;;  %v1717_v6 = vmax.f32 %v3773_v47, %v2914_v29  ;;  %v2034_v35 = vmax.f32 %v1712_v28, %v1969_v42  ;;  %v2104_v7 = vmax.f32 %v2072_v34, 0.0  ;;  %v3790_v42 = vld [vmem:[#allocation15_spill] sm:$0xff] }
 0x18c   : > { %v1660_v21 = vpop.f32.mrf.mxu0  ;;  %v1982_v22 = vpop.f32.mrf.mxu1  ;;  %v1400_v1 = vmax.f32 %v3788_v0, %v3787_v18  ;;  %v1398_v19 = vmax.f32 %v3790_v42, %v3789_v41 }
 0x18d   : > { %v2107_v31 = vmax.f32 %v2075_v46, 0.0  ;;  %v2039_v32 = vmax.f32 %v1717_v6, %v2962_v50  ;;  %v1715_v49 = vmax.f32 %v3778_v48, %v1660_v21  ;;  %v2073_v25 = vadd.f32 %v3600_v40, %v2034_v35 }
 0x18e   : > { %v2915_v4 = vpop.f32.mrf.mxu0  ;;  %v2963_v5 = vpop.f32.mrf.mxu1 }
 0x18f   : > { %v2643_v36 = vpack.c.bf16 %v2107_v31, %v2106_v15  ;;  %v2037_v37 = vmax.f32 %v1715_v49, %v1982_v22  ;;  %v1718_v12 = vmax.f32 %v1396_v14, %v2915_v4  ;;  %v2105_v51 = vmax.f32 %v2073_v25, 0.0 }
 0x190   : > { %v1663_v52 = vpop.f32.mrf.mxu0  ;;  %v1985_v33 = vpop.f32.mrf.mxu1  ;;  %v2078_v54 = vadd.f32 %v3600_v40, %v2039_v32 }
 0x191   : > { %2675 = vst [vmem:[%s3621_s28 + $0x58] sm:$0xff] %v2643_v36   ;;  %v2040_v55 = vmax.f32 %v1718_v12, %v2963_v5  ;;  %v1716_v16 = vmax.f32 %v1394_v11, %v1663_v52  ;;  %v2638_v56 = vpack.c.bf16 %v2105_v51, %v2104_v7  ;;  %v2076_v10 = vadd.f32 %v3600_v40, %v2037_v37 }
 0x192   : > { %v2918_v57 = vpop.f32.mrf.mxu0  ;;  %v2966_v43 = vpop.f32.mrf.mxu1  ;;  %v2110_v13 = vmax.f32 %v2078_v54, 0.0 }
 0x193   : > { %v2079_v17 = vadd.f32 %v3600_v40, %v2040_v55  ;;  %v2038_v20 = vmax.f32 %v1716_v16, %v1985_v33  ;;  %v1721_v44 = vmax.f32 %v3783_v39, %v2918_v57  ;;  %2674 = vst [vmem:[%s3621_s28 + $0x50] sm:$0xff] %v2638_v56   ;;  %v2108_v29 = vmax.f32 %v2076_v10, 0.0 }
 0x194   : > { %v1676_v45 = vpop.f32.mrf.mxu0  ;;  %v1998_v63 = vpop.f32.mrf.mxu1 }
 0x195   : > { %v2111_v23 = vmax.f32 %v2079_v17, 0.0  ;;  %v2077_v8 = vadd.f32 %v3600_v40, %v2038_v20  ;;  %v1719_v60 = vmax.f32 %v3786_v9, %v1676_v45  ;;  %v2043_v61 = vmax.f32 %v1721_v44, %v2966_v43 }
 0x196   : > { %v2919_v62 = vpop.f32.mrf.mxu0  ;;  %v2967_v28 = vpop.f32.mrf.mxu1 }
 0x197   : > { %v2653_v50 = vpack.c.bf16 %v2111_v23, %v2110_v13  ;;  %v2109_v46 = vmax.f32 %v2077_v8, 0.0  ;;  %v2041_v47 = vmax.f32 %v1719_v60, %v1998_v63  ;;  %v1722_v6 = vmax.f32 %v1400_v1, %v2919_v62 }
 0x198   : > { %v1679_v2 = vpop.f32.mrf.mxu0  ;;  %v2082_v34 = vadd.f32 %v3600_v40, %v2043_v61  ;;  %v2001_v21 = vpop.f32.mrf.mxu1 }
 0x199   : > { %2677 = vst [vmem:[%s3621_s28 + $0x68] sm:$0xff] %v2653_v50   ;;  %v2648_v3 = vpack.c.bf16 %v2109_v46, %v2108_v29  ;;  %v1720_v14 = vmax.f32 %v1398_v19, %v1679_v2  ;;  %v2044_v35 = vmax.f32 %v1722_v6, %v2967_v28  ;;  %v2080_v22 = vadd.f32 %v3600_v40, %v2041_v47 }
 0x19a   : > { %v2114_v30 = vmax.f32 %v2082_v34, 0.0 }
 0x19b   : > { %2676 = vst [vmem:[%s3621_s28 + $0x60] sm:$0xff] %v2648_v3   ;;  %v2042_v15 = vmax.f32 %v1720_v14, %v2001_v21  ;;  %v2083_v31 = vadd.f32 %v3600_v40, %v2044_v35  ;;  %v2112_v48 = vmax.f32 %v2080_v22, 0.0 }
 0x19d   : > { %v2081_v32 = vadd.f32 %v3600_v40, %v2042_v15  ;;  %v2115_v24 = vmax.f32 %v2083_v31, 0.0 }
 0x19f   : > { %v2113_v49 = vmax.f32 %v2081_v32, 0.0  ;;  %v2663_v25 = vpack.c.bf16 %v2115_v24, %v2114_v30 }
 0x1a1   : > { %v2658_v4 = vpack.c.bf16 %v2113_v49, %v2112_v48  ;;  %2679 = vst [vmem:[%s3621_s28 + $0x78] sm:$0xff] %v2663_v25  }
 0x1a3   : > { %2678 = vst [vmem:[%s3621_s28 + $0x70] sm:$0xff] %v2658_v4  }
 0x1a4 PF: > { %p10_p9 = scmp.ge.s32.totalorder %s3125_s16, 4   ;;  %s3791_s12 = smov %s3082_s13 }
 0x1a5   : > { %s3792_s13 = smov %s3134_s19  ;;  %s3793_s14 = smov %s3125_s16 }
 0x1a6   :  { %12 = sbr.rel (!%p10_p9) target bundleno = 2 (0x2), region = 111 }

// kernel: network_forward.5
= control target key start
LH: loop header
LB: loop body
LE: loop exit
PB: predicated region body
PF: predicated region fallthrough
CT: control target
= control target key end

     0   :  { %s2349_s12 = smov 0   ;;  %s2351_s13 = smov 0   ;;  %s3054_s0 = inlined_call_operand.vmem [shape: bf16[4,128,512], index: 0, kind: input, shape index: {}]   ;;  %s3055_s1 = inlined_call_operand.vmem [shape: bf16[512,128], index: 1, kind: input, shape index: {}]   ;;  %s3056_s2 = inlined_call_operand.vmem [shape: f32[1,128], index: 2, kind: input, shape index: {}]   ;;  %s3057_s3 = inlined_call_operand.vmem [shape: bf16[128,128], index: 3, kind: output, shape index: {}]  }
   0x1   :  { %s2353_s14 = smov 0  }
   0x2 LB: > { %s1633_s15 = sadd.s32 4294967295, %s2327_s14   ;;  %s2366_s16 = sadd.s32 1, %s2327_s14   ;;  %s2327_s14 = sphi %s2353_s14, %s3086_s14   ;;  %s2323_s13 = sphi %s2351_s13, %s3085_s13   ;;  %s2319_s12 = sphi %s2349_s12, %s3084_s12  }
   0x3   : > { %s17_s17 = ssub.s32 %s2327_s14, %s2366_s16  ;;  %s20_s18 = sadd.s32 1, %s2323_s13 }
   0x4   : > { %p18_p0 = scmp.eq.s32.totalorder %s17_s17, 0  ;;  %p27_p1 = scmp.ne.s32.totalorder %s2323_s13, %s2319_s12 }
   0x5   : > { %p28_p2 = scmp.eq.s32.totalorder %s2327_s14, 0  ;;  %p1636_p4 = scmp.ge.s32.totalorder %s2327_s14, 2 }
   0x6   : > { %s2375_s19 = scalar_select %p18_p0, %s2323_s13, %s20_s18  }
   0x7   : > { %p29_p3 = por %p28_p2, %p27_p1  ;;  %127 = sbr.rel (%p1636_p4) target bundleno = 48 (0x30), region = 24 }
   0xc   : > { %130 = sbr.rel (!%p29_p3) target bundleno = 48 (0x30), region = 28  ;;  %s132_s20 = sand.u32 (%p29_p3), 1, %s2323_s13  }
   0xd   : > { %s1801_s21 = sshll.u32 (%p29_p3), %s2327_s14, 7  ;;  %s1637_s22 = sshll.u32 (%p29_p3), %s132_s20, 9 }
   0xe   : > { %s2383_s25 = scalar_lea.vmem (%p29_p3), %s3054_s0, %s1801_s21  ;;  %s2388_s26 = scalar_lea.vmem (%p29_p3), [#allocation2], %s1637_s22 }
   0xf   : > { %v151_v0 = vld [vmem:[%s2383_s25] sm:$0xff] (%p29_p3)  ;;  %v153_v1 = vld [vmem:[%s2383_s25 + $0x8] sm:$0xff] (%p29_p3)  ;;  %v155_v2 = vld [vmem:[%s2383_s25 + $0x10] sm:$0xff] (%p29_p3) }
  0x10   : > { %152 = vst [vmem:[%s2388_s26] sm:$0xff] (%p29_p3), %v151_v0  ;;  %154 = vst [vmem:[%s2388_s26 + $0x8] sm:$0xff] (%p29_p3), %v153_v1  ;;  %v157_v3 = vld [vmem:[%s2383_s25 + $0x18] sm:$0xff] (%p29_p3)  ;;  %v159_v4 = vld [vmem:[%s2383_s25 + $0x20] sm:$0xff] (%p29_p3) }
  0x11   : > { %156 = vst [vmem:[%s2388_s26 + $0x10] sm:$0xff] %v155_v2  ;;  %v161_v5 = vld [vmem:[%s2383_s25 + $0x28] sm:$0xff]  ;;  %158 = vst [vmem:[%s2388_s26 + $0x18] sm:$0xff] %v157_v3  ;;  %v163_v6 = vld [vmem:[%s2383_s25 + $0x30] sm:$0xff] }
  0x12   : > { %160 = vst [vmem:[%s2388_s26 + $0x20] sm:$0xff] %v159_v4  ;;  %162 = vst [vmem:[%s2388_s26 + $0x28] sm:$0xff] %v161_v5  ;;  %v165_v7 = vld [vmem:[%s2383_s25 + $0x38] sm:$0xff]  ;;  %v167_v8 = vld [vmem:[%s2383_s25 + $0x40] sm:$0xff] }
  0x13   : > { %164 = vst [vmem:[%s2388_s26 + $0x30] sm:$0xff] %v163_v6  ;;  %166 = vst [vmem:[%s2388_s26 + $0x38] sm:$0xff] %v165_v7  ;;  %v169_v9 = vld [vmem:[%s2383_s25 + $0x48] sm:$0xff]  ;;  %v171_v10 = vld [vmem:[%s2383_s25 + $0x50] sm:$0xff] }
  0x14   : > { %168 = vst [vmem:[%s2388_s26 + $0x40] sm:$0xff] %v167_v8  ;;  %v173_v11 = vld [vmem:[%s2383_s25 + $0x58] sm:$0xff]  ;;  %170 = vst [vmem:[%s2388_s26 + $0x48] sm:$0xff] %v169_v9  ;;  %v175_v12 = vld [vmem:[%s2383_s25 + $0x60] sm:$0xff] }
  0x15   : > { %172 = vst [vmem:[%s2388_s26 + $0x50] sm:$0xff] %v171_v10  ;;  %174 = vst [vmem:[%s2388_s26 + $0x58] sm:$0xff] %v173_v11  ;;  %v177_v13 = vld [vmem:[%s2383_s25 + $0x68] sm:$0xff]  ;;  %v179_v14 = vld [vmem:[%s2383_s25 + $0x70] sm:$0xff] }
  0x16   : > { %176 = vst [vmem:[%s2388_s26 + $0x60] sm:$0xff] %v175_v12  ;;  %178 = vst [vmem:[%s2388_s26 + $0x68] sm:$0xff] %v177_v13  ;;  %v181_v15 = vld [vmem:[%s2383_s25 + $0x78] sm:$0xff]  ;;  %v183_v16 = vld [vmem:[%s2383_s25 + $0x100] sm:$0xff] }
  0x17   : > { %180 = vst [vmem:[%s2388_s26 + $0x70] sm:$0xff] %v179_v14  ;;  %v185_v17 = vld [vmem:[%s2383_s25 + $0x108] sm:$0xff]  ;;  %182 = vst [vmem:[%s2388_s26 + $0x78] sm:$0xff] %v181_v15  ;;  %v187_v18 = vld [vmem:[%s2383_s25 + $0x110] sm:$0xff] }
  0x18   : > { %184 = vst [vmem:[%s2388_s26 + $0x80] sm:$0xff] %v183_v16  ;;  %186 = vst [vmem:[%s2388_s26 + $0x88] sm:$0xff] %v185_v17  ;;  %v189_v19 = vld [vmem:[%s2383_s25 + $0x118] sm:$0xff]  ;;  %v191_v20 = vld [vmem:[%s2383_s25 + $0x120] sm:$0xff] }
  0x19   : > { %188 = vst [vmem:[%s2388_s26 + $0x90] sm:$0xff] %v187_v18  ;;  %190 = vst [vmem:[%s2388_s26 + $0x98] sm:$0xff] %v189_v19  ;;  %v193_v21 = vld [vmem:[%s2383_s25 + $0x128] sm:$0xff]  ;;  %v195_v22 = vld [vmem:[%s2383_s25 + $0x130] sm:$0xff] }
  0x1a   : > { %192 = vst [vmem:[%s2388_s26 + $0xa0] sm:$0xff] %v191_v20  ;;  %v197_v23 = vld [vmem:[%s2383_s25 + $0x138] sm:$0xff]  ;;  %194 = vst [vmem:[%s2388_s26 + $0xa8] sm:$0xff] %v193_v21  ;;  %v199_v24 = vld [vmem:[%s2383_s25 + $0x140] sm:$0xff] }
  0x1b   : > { %196 = vst [vmem:[%s2388_s26 + $0xb0] sm:$0xff] %v195_v22  ;;  %198 = vst [vmem:[%s2388_s26 + $0xb8] sm:$0xff] %v197_v23  ;;  %v201_v25 = vld [vmem:[%s2383_s25 + $0x148] sm:$0xff]  ;;  %v203_v26 = vld [vmem:[%s2383_s25 + $0x150] sm:$0xff] }
  0x1c   : > { %200 = vst [vmem:[%s2388_s26 + $0xc0] sm:$0xff] %v199_v24  ;;  %202 = vst [vmem:[%s2388_s26 + $0xc8] sm:$0xff] %v201_v25  ;;  %v205_v27 = vld [vmem:[%s2383_s25 + $0x158] sm:$0xff]  ;;  %v207_v28 = vld [vmem:[%s2383_s25 + $0x160] sm:$0xff] }
  0x1d   : > { %204 = vst [vmem:[%s2388_s26 + $0xd0] sm:$0xff] %v203_v26  ;;  %v209_v29 = vld [vmem:[%s2383_s25 + $0x168] sm:$0xff]  ;;  %206 = vst [vmem:[%s2388_s26 + $0xd8] sm:$0xff] %v205_v27  ;;  %v211_v30 = vld [vmem:[%s2383_s25 + $0x170] sm:$0xff] }
  0x1e   : > { %208 = vst [vmem:[%s2388_s26 + $0xe0] sm:$0xff] %v207_v28  ;;  %210 = vst [vmem:[%s2388_s26 + $0xe8] sm:$0xff] %v209_v29  ;;  %v213_v31 = vld [vmem:[%s2383_s25 + $0x178] sm:$0xff]  ;;  %v215_v32 = vld [vmem:[%s2383_s25 + $0x200] sm:$0xff] }
  0x1f   : > { %212 = vst [vmem:[%s2388_s26 + $0xf0] sm:$0xff] %v211_v30  ;;  %214 = vst [vmem:[%s2388_s26 + $0xf8] sm:$0xff] %v213_v31  ;;  %v217_v33 = vld [vmem:[%s2383_s25 + $0x208] sm:$0xff]  ;;  %v219_v34 = vld [vmem:[%s2383_s25 + $0x210] sm:$0xff] }
  0x20   : > { %216 = vst [vmem:[%s2388_s26 + $0x100] sm:$0xff] %v215_v32  ;;  %v221_v35 = vld [vmem:[%s2383_s25 + $0x218] sm:$0xff]  ;;  %218 = vst [vmem:[%s2388_s26 + $0x108] sm:$0xff] %v217_v33  ;;  %v223_v36 = vld [vmem:[%s2383_s25 + $0x220] sm:$0xff] }
  0x21   : > { %220 = vst [vmem:[%s2388_s26 + $0x110] sm:$0xff] %v219_v34  ;;  %222 = vst [vmem:[%s2388_s26 + $0x118] sm:$0xff] %v221_v35  ;;  %v225_v37 = vld [vmem:[%s2383_s25 + $0x228] sm:$0xff]  ;;  %v227_v38 = vld [vmem:[%s2383_s25 + $0x230] sm:$0xff] }
  0x22   : > { %224 = vst [vmem:[%s2388_s26 + $0x120] sm:$0xff] %v223_v36  ;;  %226 = vst [vmem:[%s2388_s26 + $0x128] sm:$0xff] %v225_v37  ;;  %v229_v39 = vld [vmem:[%s2383_s25 + $0x238] sm:$0xff]  ;;  %v231_v40 = vld [vmem:[%s2383_s25 + $0x240] sm:$0xff] }
  0x23   : > { %228 = vst [vmem:[%s2388_s26 + $0x130] sm:$0xff] %v227_v38  ;;  %v233_v41 = vld [vmem:[%s2383_s25 + $0x248] sm:$0xff]  ;;  %230 = vst [vmem:[%s2388_s26 + $0x138] sm:$0xff] %v229_v39  ;;  %v235_v42 = vld [vmem:[%s2383_s25 + $0x250] sm:$0xff] }
  0x24   : > { %232 = vst [vmem:[%s2388_s26 + $0x140] sm:$0xff] %v231_v40  ;;  %234 = vst [vmem:[%s2388_s26 + $0x148] sm:$0xff] %v233_v41  ;;  %v237_v43 = vld [vmem:[%s2383_s25 + $0x258] sm:$0xff]  ;;  %v239_v44 = vld [vmem:[%s2383_s25 + $0x260] sm:$0xff] }
  0x25   : > { %236 = vst [vmem:[%s2388_s26 + $0x150] sm:$0xff] %v235_v42  ;;  %238 = vst [vmem:[%s2388_s26 + $0x158] sm:$0xff] %v237_v43  ;;  %v241_v45 = vld [vmem:[%s2383_s25 + $0x268] sm:$0xff]  ;;  %v243_v46 = vld [vmem:[%s2383_s25 + $0x270] sm:$0xff] }
  0x26   : > { %240 = vst [vmem:[%s2388_s26 + $0x160] sm:$0xff] %v239_v44  ;;  %v245_v47 = vld [vmem:[%s2383_s25 + $0x278] sm:$0xff]  ;;  %242 = vst [vmem:[%s2388_s26 + $0x168] sm:$0xff] %v241_v45  ;;  %v247_v48 = vld [vmem:[%s2383_s25 + $0x300] sm:$0xff] }
  0x27   : > { %244 = vst [vmem:[%s2388_s26 + $0x170] sm:$0xff] %v243_v46  ;;  %246 = vst [vmem:[%s2388_s26 + $0x178] sm:$0xff] %v245_v47  ;;  %v249_v49 = vld [vmem:[%s2383_s25 + $0x308] sm:$0xff]  ;;  %v251_v50 = vld [vmem:[%s2383_s25 + $0x310] sm:$0xff] }
  0x28   : > { %248 = vst [vmem:[%s2388_s26 + $0x180] sm:$0xff] %v247_v48  ;;  %250 = vst [vmem:[%s2388_s26 + $0x188] sm:$0xff] %v249_v49  ;;  %v253_v51 = vld [vmem:[%s2383_s25 + $0x318] sm:$0xff]  ;;  %v255_v52 = vld [vmem:[%s2383_s25 + $0x320] sm:$0xff] }
  0x29   : > { %252 = vst [vmem:[%s2388_s26 + $0x190] sm:$0xff] %v251_v50  ;;  %v257_v53 = vld [vmem:[%s2383_s25 + $0x328] sm:$0xff]  ;;  %254 = vst [vmem:[%s2388_s26 + $0x198] sm:$0xff] %v253_v51  ;;  %v259_v54 = vld [vmem:[%s2383_s25 + $0x330] sm:$0xff] }
  0x2a   : > { %256 = vst [vmem:[%s2388_s26 + $0x1a0] sm:$0xff] %v255_v52  ;;  %258 = vst [vmem:[%s2388_s26 + $0x1a8] sm:$0xff] %v257_v53  ;;  %v261_v55 = vld [vmem:[%s2383_s25 + $0x338] sm:$0xff]  ;;  %v263_v56 = vld [vmem:[%s2383_s25 + $0x340] sm:$0xff] }
  0x2b   : > { %260 = vst [vmem:[%s2388_s26 + $0x1b0] sm:$0xff] %v259_v54  ;;  %262 = vst [vmem:[%s2388_s26 + $0x1b8] sm:$0xff] %v261_v55  ;;  %v265_v57 = vld [vmem:[%s2383_s25 + $0x348] sm:$0xff]  ;;  %v267_v58 = vld [vmem:[%s2383_s25 + $0x350] sm:$0xff] }
  0x2c   : > { %264 = vst [vmem:[%s2388_s26 + $0x1c0] sm:$0xff] %v263_v56  ;;  %v269_v59 = vld [vmem:[%s2383_s25 + $0x358] sm:$0xff]  ;;  %266 = vst [vmem:[%s2388_s26 + $0x1c8] sm:$0xff] %v265_v57  ;;  %v271_v60 = vld [vmem:[%s2383_s25 + $0x360] sm:$0xff] }
  0x2d   : > { %268 = vst [vmem:[%s2388_s26 + $0x1d0] sm:$0xff] %v267_v58  ;;  %270 = vst [vmem:[%s2388_s26 + $0x1d8] sm:$0xff] %v269_v59  ;;  %v273_v61 = vld [vmem:[%s2383_s25 + $0x368] sm:$0xff]  ;;  %v275_v62 = vld [vmem:[%s2383_s25 + $0x370] sm:$0xff] }
  0x2e   : > { %272 = vst [vmem:[%s2388_s26 + $0x1e0] sm:$0xff] %v271_v60  ;;  %274 = vst [vmem:[%s2388_s26 + $0x1e8] sm:$0xff] %v273_v61  ;;  %v277_v63 = vld [vmem:[%s2383_s25 + $0x378] sm:$0xff] }
  0x2f   : > { %276 = vst [vmem:[%s2388_s26 + $0x1f0] sm:$0xff] %v275_v62  ;;  %278 = vst [vmem:[%s2388_s26 + $0x1f8] sm:$0xff] %v277_v63 }
  0x30 PF: > { %p1641_p5 = scmp.ge.s32.totalorder %s2327_s14, 1  ;;  %p283_p6 = scmp.lt.s32.totalorder %s2327_s14, 3 }
  0x32   : > { %p284_p7 = pnand %p1641_p5, %p283_p6 }
  0x34   : > { %287 = sbr.rel (%p284_p7) target bundleno = 424 (0x1a8), region = 51 }
  0x39   : > { %v2520_v0 = vld [vmem:[%s3055_s1 + $0x78] sm:$0xff]   ;;  %v2543_v4 = vld [vmem:[%s3055_s1 + $0x70] sm:$0xff]   ;;  %v2567_v8 = vld [vmem:[%s3055_s1 + $0x68] sm:$0xff]   ;;  %s290_s6 = sand.u32 1, %s2319_s12   ;;  %s1643_s30 = sshll.u32 %s1633_s15, 3 }
  0x3a   : > { %v2525_v1 = vld [vmem:[%s3055_s1 + $0xf8] sm:$0xff]   ;;  %1833 = vmatprep.subr.bf16.mxu0 %v2520_v0  ;;  %v2549_v5 = vld [vmem:[%s3055_s1 + $0xf0] sm:$0xff]   ;;  %v2573_v9 = vld [vmem:[%s3055_s1 + $0xe8] sm:$0xff]   ;;  %s1642_s12 = sshll.u32 %s290_s6, 9  ;;  %p315_p8 = scmp.lt.s32.totalorder %s1643_s30, 15 }
  0x3b   : > { %v2531_v2 = vld [vmem:[%s3055_s1 + $0x38] sm:$0xff]   ;;  %1873 = vmatprep.subr.bf16.mxu1 %v2525_v1  ;;  %v2555_v6 = vld [vmem:[%s3055_s1 + $0x30] sm:$0xff]   ;;  %v2579_v10 = vld [vmem:[%s3055_s1 + $0x28] sm:$0xff]   ;;  %s2709_s29 = scalar_lea.vmem [#allocation2], %s1642_s12 }
  0x3c   : > { %v2537_v3 = vld [vmem:[%s3055_s1 + $0xb8] sm:$0xff]   ;;  %1834 = vmatpush3.bf16.msra.mxu0 %v2531_v2  ;;  %v2561_v7 = vld [vmem:[%s3055_s1 + $0xb0] sm:$0xff]   ;;  %v2585_v11 = vld [vmem:[%s3055_s1 + $0xa8] sm:$0xff]   ;;  %s3088_s30 = smov (!%p315_p8, %s1643_s30), 15 }
  0x3d   : > { %1874 = vmatpush3.bf16.msra.mxu1 %v2537_v3  ;;  %1835 = vmatprep.subr.bf16.mxu0 %v2543_v4  ;;  %v2591_v12 = vld [vmem:[%s3055_s1 + $0x60] sm:$0xff]   ;;  %v2615_v16 = vld [vmem:[%s3055_s1 + $0x58] sm:$0xff]   ;;  %v2639_v20 = vld [vmem:[%s3055_s1 + $0x50] sm:$0xff]   ;;  %s1644_s4 = sshll.u32 %s3088_s30, 2 }
  0x3e   : > { %1875 = vmatprep.subr.bf16.mxu1 %v2549_v5  ;;  %v2597_v13 = vld [vmem:[%s3055_s1 + $0xe0] sm:$0xff]   ;;  %v2621_v17 = vld [vmem:[%s3055_s1 + $0xd8] sm:$0xff]   ;;  %v2645_v21 = vld [vmem:[%s3055_s1 + $0xd0] sm:$0xff]   ;;  %s3012_s7 = scalar_lea.vmem %s3057_s3, %s1644_s4 }
  0x3f   : > { %v2603_v14 = vld [vmem:[%s3055_s1 + $0x20] sm:$0xff]   ;;  %v2627_v18 = vld [vmem:[%s3055_s1 + $0x18] sm:$0xff]   ;;  %v2651_v22 = vld [vmem:[%s3055_s1 + $0x10] sm:$0xff]  }
  0x40   : > { %1836 = vmatpush3.bf16.msra.mxu0 %v2555_v6  ;;  %v2609_v15 = vld [vmem:[%s3055_s1 + $0xa0] sm:$0xff]   ;;  %v2633_v19 = vld [vmem:[%s3055_s1 + $0x98] sm:$0xff]   ;;  %v2657_v23 = vld [vmem:[%s3055_s1 + $0x90] sm:$0xff]  }
  0x41   : > { %1876 = vmatpush3.bf16.msra.mxu1 %v2561_v7  ;;  %1837 = vmatprep.subr.bf16.mxu0 %v2567_v8  ;;  %v2664_v24 = vld [vmem:[%s3055_s1 + $0x48] sm:$0xff]   ;;  %v2688_v28 = vld [vmem:[%s3055_s1 + $0x40] sm:$0xff]  }
  0x42   : > { %1877 = vmatprep.subr.bf16.mxu1 %v2573_v9  ;;  %v2670_v25 = vld [vmem:[%s3055_s1 + $0xc8] sm:$0xff]   ;;  %v2694_v29 = vld [vmem:[%s3055_s1 + $0xc0] sm:$0xff]  }
  0x43   : > { %v2676_v26 = vld [vmem:[%s3055_s1 + $0x8] sm:$0xff]   ;;  %v2700_v30 = vld [vmem:[%s3055_s1] sm:$0xff]  }
  0x44   : > { %1838 = vmatpush3.bf16.msra.mxu0 %v2579_v10  ;;  %v2682_v27 = vld [vmem:[%s3055_s1 + $0x88] sm:$0xff]   ;;  %v2706_v31 = vld [vmem:[%s3055_s1 + $0x80] sm:$0xff]  }
  0x45   : > { %1878 = vmatpush3.bf16.msra.mxu1 %v2585_v11  ;;  %1839 = vmatprep.subr.bf16.mxu0 %v2591_v12  ;;  %v2209_v32 = vld [vmem:[%s2709_s29] ss:$16 sps:$4 sm:$0xff]   ;;  %v2211_v33 = vld [vmem:[%s2709_s29 + $0x4] ss:$16 sps:$4 sm:$0xff]   ;;  %v2212_v34 = vld [vmem:[%s2709_s29 + $0x8] ss:$16 sps:$4 sm:$0xff]  }
  0x46   : > { %1879 = vmatprep.subr.bf16.mxu1 %v2597_v13  ;;  %v2214_v35 = vld [vmem:[%s2709_s29 + $0xc] ss:$16 sps:$4 sm:$0xff]   ;;  %705 = vmatprep.mubr.bf16.mxu0 %v2211_v33  ;;  %v2215_v36 = vld [vmem:[%s2709_s29 + $0x24] ss:$16 sps:$4 sm:$0xff]   ;;  %v2219_v38 = vld [vmem:[%s2709_s29 + $0x20] ss:$16 sps:$4 sm:$0xff]  }
  0x47   : > { %770 = vmatprep.mubr.bf16.mxu1 %v2214_v35  ;;  %v2217_v37 = vld [vmem:[%s2709_s29 + $0x2c] ss:$16 sps:$4 sm:$0xff]   ;;  %v2220_v39 = vld [vmem:[%s2709_s29 + $0x28] ss:$16 sps:$4 sm:$0xff]   ;;  %v2221_v40 = vld [vmem:[%s2709_s29 + $0x44] ss:$16 sps:$4 sm:$0xff]  }
  0x48   : > { %1840 = vmatpush3.bf16.msra.mxu0 %v2603_v14  ;;  %v2223_v41 = vld [vmem:[%s2709_s29 + $0x4c] ss:$16 sps:$4 sm:$0xff]   ;;  %v2225_v42 = vld [vmem:[%s2709_s29 + $0x40] ss:$16 sps:$4 sm:$0xff]   ;;  %v2226_v43 = vld [vmem:[%s2709_s29 + $0x48] ss:$16 sps:$4 sm:$0xff]  }
  0x49   : > { %1880 = vmatpush3.bf16.msra.mxu1 %v2609_v15  ;;  %1841 = vmatprep.subr.bf16.mxu0 %v2615_v16  ;;  %v2227_v44 = vld [vmem:[%s2709_s29 + $0x64] ss:$16 sps:$4 sm:$0xff]   ;;  %v2229_v45 = vld [vmem:[%s2709_s29 + $0x6c] ss:$16 sps:$4 sm:$0xff]   ;;  %v2231_v46 = vld [vmem:[%s2709_s29 + $0x60] ss:$16 sps:$4 sm:$0xff]  }
  0x4a   : > { %1881 = vmatprep.subr.bf16.mxu1 %v2621_v17  ;;  %v2232_v47 = vld [vmem:[%s2709_s29 + $0x68] ss:$16 sps:$4 sm:$0xff]   ;;  %v2235_v48 = vld [vmem:[%s2709_s29 + $0x84] ss:$16 sps:$4 sm:$0xff]   ;;  %v2238_v49 = vld [vmem:[%s2709_s29 + $0x8c] ss:$16 sps:$4 sm:$0xff]  }
  0x4b   : > { %v2233_v50 = vld [vmem:[%s2709_s29 + $0x80] ss:$16 sps:$4 sm:$0xff]   ;;  %v2236_v51 = vld [vmem:[%s2709_s29 + $0x88] ss:$16 sps:$4 sm:$0xff]   ;;  %v2239_v52 = vld [vmem:[%s2709_s29 + $0xa4] ss:$16 sps:$4 sm:$0xff]  }
  0x4c   : > { %1842 = vmatpush3.bf16.msra.mxu0 %v2627_v18  ;;  %v2241_v53 = vld [vmem:[%s2709_s29 + $0xac] ss:$16 sps:$4 sm:$0xff]   ;;  %v2243_v54 = vld [vmem:[%s2709_s29 + $0xa0] ss:$16 sps:$4 sm:$0xff]   ;;  %v2244_v55 = vld [vmem:[%s2709_s29 + $0xa8] ss:$16 sps:$4 sm:$0xff]  }
  0x4d   : > { %1882 = vmatpush3.bf16.msra.mxu1 %v2633_v19  ;;  %1843 = vmatprep.subr.bf16.mxu0 %v2639_v20  ;;  %v2245_v56 = vld [vmem:[%s2709_s29 + $0xc4] ss:$16 sps:$4 sm:$0xff]   ;;  %v2247_v57 = vld [vmem:[%s2709_s29 + $0xcc] ss:$16 sps:$4 sm:$0xff]   ;;  %v2249_v58 = vld [vmem:[%s2709_s29 + $0xc0] ss:$16 sps:$4 sm:$0xff]  }
  0x4e   : > { %1883 = vmatprep.subr.bf16.mxu1 %v2645_v21  ;;  %v2250_v59 = vld [vmem:[%s2709_s29 + $0xc8] ss:$16 sps:$4 sm:$0xff]   ;;  %v2251_v60 = vld [vmem:[%s2709_s29 + $0xe4] ss:$16 sps:$4 sm:$0xff]   ;;  %v2253_v61 = vld [vmem:[%s2709_s29 + $0xec] ss:$16 sps:$4 sm:$0xff]  }
  0x4f   : > { %v2255_v62 = vld [vmem:[%s2709_s29 + $0xe0] ss:$16 sps:$4 sm:$0xff]   ;;  %v2256_v63 = vld [vmem:[%s2709_s29 + $0xe8] ss:$16 sps:$4 sm:$0xff]   ;;  %v2262_v33 = vld [vmem:[%s2709_s29 + $0x10c] ss:$16 sps:$4 sm:$0xff]  }
  0x50   : > { %1844 = vmatpush3.bf16.msra.mxu0 %v2651_v22  ;;  %v2260_v35 = vld [vmem:[%s2709_s29 + $0x108] ss:$16 sps:$4 sm:$0xff]  }
  0x51   : > { %1884 = vmatpush3.bf16.msra.mxu1 %v2657_v23  ;;  %1845 = vmatprep.subr.bf16.mxu0 %v2664_v24 }
  0x52   : > { %1885 = vmatprep.subr.bf16.mxu1 %v2670_v25 }
  0x54   : > { %1846 = vmatpush3.bf16.msra.mxu0 %v2676_v26 }
  0x55   : > { %1886 = vmatpush3.bf16.msra.mxu1 %v2682_v27  ;;  %1847 = vmatprep.subr.bf16.mxu0 %v2688_v28 }
  0x56   : > { %1887 = vmatprep.subr.bf16.mxu1 %v2694_v29 }
  0x58   : > { %1848 = vmatpush3.bf16.msra.mxu0 %v2700_v30 }
  0x59   : > { %1888 = vmatpush3.bf16.msra.mxu1 %v2706_v31  ;;  %1913 = vmatprep.subr.bf16.mxu0 %v2520_v0 }
  0x5a   : > { %1953 = vmatprep.subr.bf16.mxu1 %v2525_v1 }
  0x5b   : > { %706 = vmatmul.mubr.bf16.vlgmr.msra.gmra.mxu0 %v2209_v32  ;;  %v2259_v32 = vld [vmem:[%s2709_s29 + $0x104] ss:$16 sps:$4 sm:$0xff]  }
  0x5c   : > { %771 = vmatmul.mubr.bf16.vlgmr.msra.gmra.mxu1 %v2212_v34  ;;  %1914 = vmatpush3.bf16.msra.mxu0 %v2531_v2  ;;  %v2257_v34 = vld [vmem:[%s2709_s29 + $0x100] ss:$16 sps:$4 sm:$0xff]  }
  0x5d   : > { %1954 = vmatpush3.bf16.msra.mxu1 %v2537_v3  ;;  %1915 = vmatprep.subr.bf16.mxu0 %v2543_v4 }
  0x5e   : > { %1955 = vmatprep.subr.bf16.mxu1 %v2549_v5  ;;  %713 = vmatprep.mubr.bf16.mxu0 %v2215_v36  ;;  %v2263_v36 = vld [vmem:[%s2709_s29 + $0x124] ss:$16 sps:$4 sm:$0xff]  }
  0x5f   : > { %778 = vmatprep.mubr.bf16.mxu1 %v2217_v37  ;;  %v2265_v37 = vld [vmem:[%s2709_s29 + $0x12c] ss:$16 sps:$4 sm:$0xff]  }
  0x60   : > { %1916 = vmatpush3.bf16.msra.mxu0 %v2555_v6 }
  0x61   : > { %1956 = vmatpush3.bf16.msra.mxu1 %v2561_v7  ;;  %1917 = vmatprep.subr.bf16.mxu0 %v2567_v8 }
  0x62   : > { %1957 = vmatprep.subr.bf16.mxu1 %v2573_v9 }
  0x63   : > { %714 = vmatmul.mubr.bf16.gmra.mxu0 %v2219_v38  ;;  %v2267_v38 = vld [vmem:[%s2709_s29 + $0x120] ss:$16 sps:$4 sm:$0xff]  }
  0x64   : > { %779 = vmatmul.mubr.bf16.gmra.mxu1 %v2220_v39  ;;  %1918 = vmatpush3.bf16.msra.mxu0 %v2579_v10 }
  0x65   : > { %1958 = vmatpush3.bf16.msra.mxu1 %v2585_v11  ;;  %1919 = vmatprep.subr.bf16.mxu0 %v2591_v12 }
  0x66   : > { %1959 = vmatprep.subr.bf16.mxu1 %v2597_v13  ;;  %721 = vmatprep.mubr.bf16.mxu0 %v2221_v40 }
  0x67   : > { %786 = vmatprep.mubr.bf16.mxu1 %v2223_v41 }
  0x68   : > { %1920 = vmatpush3.bf16.msra.mxu0 %v2603_v14 }
  0x69   : > { %1960 = vmatpush3.bf16.msra.mxu1 %v2609_v15  ;;  %1921 = vmatprep.subr.bf16.mxu0 %v2615_v16 }
  0x6a   : > { %1961 = vmatprep.subr.bf16.mxu1 %v2621_v17 }
  0x6b   : > { %722 = vmatmul.mubr.bf16.gmra.mxu0 %v2225_v42 }
  0x6c   : > { %787 = vmatmul.mubr.bf16.gmra.mxu1 %v2226_v43  ;;  %1922 = vmatpush3.bf16.msra.mxu0 %v2627_v18 }
  0x6d   : > { %1962 = vmatpush3.bf16.msra.mxu1 %v2633_v19  ;;  %1923 = vmatprep.subr.bf16.mxu0 %v2639_v20 }
  0x6e   : > { %1963 = vmatprep.subr.bf16.mxu1 %v2645_v21  ;;  %729 = vmatprep.mubr.bf16.mxu0 %v2227_v44 }
  0x6f   : > { %794 = vmatprep.mubr.bf16.mxu1 %v2229_v45 }
  0x70   : > { %1924 = vmatpush3.bf16.msra.mxu0 %v2651_v22 }
  0x71   : > { %1964 = vmatpush3.bf16.msra.mxu1 %v2657_v23  ;;  %1925 = vmatprep.subr.bf16.mxu0 %v2664_v24 }
  0x72   : > { %1965 = vmatprep.subr.bf16.mxu1 %v2670_v25 }
  0x73   : > { %730 = vmatmul.mubr.bf16.gmra.mxu0 %v2231_v46 }
  0x74   : > { %795 = vmatmul.mubr.bf16.gmra.mxu1 %v2232_v47  ;;  %1926 = vmatpush3.bf16.msra.mxu0 %v2676_v26 }
  0x75   : > { %1966 = vmatpush3.bf16.msra.mxu1 %v2682_v27  ;;  %1927 = vmatprep.subr.bf16.mxu0 %v2688_v28 }
  0x76   : > { %1967 = vmatprep.subr.bf16.mxu1 %v2694_v29  ;;  %932 = vmatprep.mubr.bf16.mxu0 %v2235_v48 }
  0x77   : > { %997 = vmatprep.mubr.bf16.mxu1 %v2238_v49 }
  0x78   : > { %1928 = vmatpush3.bf16.msra.mxu0 %v2700_v30 }
  0x79   : > { %1968 = vmatpush3.bf16.msra.mxu1 %v2706_v31  ;;  %1993 = vmatprep.subr.bf16.mxu0 %v2520_v0 }
  0x7a   : > { %2033 = vmatprep.subr.bf16.mxu1 %v2525_v1 }
  0x7b   : > { %933 = vmatmul.mubr.bf16.vlgmr.msra.gmra.mxu0 %v2233_v50 }
  0x7c   : > { %998 = vmatmul.mubr.bf16.vlgmr.msra.gmra.mxu1 %v2236_v51  ;;  %1994 = vmatpush3.bf16.msra.mxu0 %v2531_v2 }
  0x7d   : > { %2034 = vmatpush3.bf16.msra.mxu1 %v2537_v3  ;;  %1995 = vmatprep.subr.bf16.mxu0 %v2543_v4 }
  0x7e   : > { %2035 = vmatprep.subr.bf16.mxu1 %v2549_v5  ;;  %940 = vmatprep.mubr.bf16.mxu0 %v2239_v52 }
  0x7f   : > { %1005 = vmatprep.mubr.bf16.mxu1 %v2241_v53 }
  0x80   : > { %1996 = vmatpush3.bf16.msra.mxu0 %v2555_v6 }
  0x81   : > { %2036 = vmatpush3.bf16.msra.mxu1 %v2561_v7  ;;  %1997 = vmatprep.subr.bf16.mxu0 %v2567_v8 }
  0x82   : > { %2037 = vmatprep.subr.bf16.mxu1 %v2573_v9 }
  0x83   : > { %941 = vmatmul.mubr.bf16.gmra.mxu0 %v2243_v54 }
  0x84   : > { %1006 = vmatmul.mubr.bf16.gmra.mxu1 %v2244_v55  ;;  %1998 = vmatpush3.bf16.msra.mxu0 %v2579_v10 }
  0x85   : > { %2038 = vmatpush3.bf16.msra.mxu1 %v2585_v11  ;;  %1999 = vmatprep.subr.bf16.mxu0 %v2591_v12 }
  0x86   : > { %2039 = vmatprep.subr.bf16.mxu1 %v2597_v13  ;;  %948 = vmatprep.mubr.bf16.mxu0 %v2245_v56 }
  0x87   : > { %1013 = vmatprep.mubr.bf16.mxu1 %v2247_v57 }
  0x88   : > { %2000 = vmatpush3.bf16.msra.mxu0 %v2603_v14 }
  0x89   : > { %2040 = vmatpush3.bf16.msra.mxu1 %v2609_v15  ;;  %2001 = vmatprep.subr.bf16.mxu0 %v2615_v16 }
  0x8a   : > { %2041 = vmatprep.subr.bf16.mxu1 %v2621_v17 }
  0x8b   : > { %949 = vmatmul.mubr.bf16.gmra.mxu0 %v2249_v58 }
  0x8c   : > { %1014 = vmatmul.mubr.bf16.gmra.mxu1 %v2250_v59  ;;  %2002 = vmatpush3.bf16.msra.mxu0 %v2627_v18 }
  0x8d   : > { %2042 = vmatpush3.bf16.msra.mxu1 %v2633_v19  ;;  %2003 = vmatprep.subr.bf16.mxu0 %v2639_v20 }
  0x8e   : > { %2043 = vmatprep.subr.bf16.mxu1 %v2645_v21  ;;  %956 = vmatprep.mubr.bf16.mxu0 %v2251_v60 }
  0x8f   : > { %1021 = vmatprep.mubr.bf16.mxu1 %v2253_v61 }
  0x90   : > { %2004 = vmatpush3.bf16.msra.mxu0 %v2651_v22 }
  0x91   : > { %2044 = vmatpush3.bf16.msra.mxu1 %v2657_v23  ;;  %2005 = vmatprep.subr.bf16.mxu0 %v2664_v24 }
  0x92   : > { %2045 = vmatprep.subr.bf16.mxu1 %v2670_v25 }
  0x93   : > { %957 = vmatmul.mubr.bf16.gmra.mxu0 %v2255_v62 }
  0x94   : > { %1022 = vmatmul.mubr.bf16.gmra.mxu1 %v2256_v63  ;;  %2006 = vmatpush3.bf16.msra.mxu0 %v2676_v26 }
  0x95   : > { %2046 = vmatpush3.bf16.msra.mxu1 %v2682_v27  ;;  %2007 = vmatprep.subr.bf16.mxu0 %v2688_v28 }
  0x96   : > { %2047 = vmatprep.subr.bf16.mxu1 %v2694_v29  ;;  %1167 = vmatprep.mubr.bf16.mxu0 %v2259_v32 }
  0x97   : > { %1232 = vmatprep.mubr.bf16.mxu1 %v2262_v33 }
  0x98   : > { %2008 = vmatpush3.bf16.msra.mxu0 %v2700_v30 }
  0x99   : > { %2048 = vmatpush3.bf16.msra.mxu1 %v2706_v31  ;;  %2073 = vmatprep.subr.bf16.mxu0 %v2520_v0  ;;  %v2268_v0 = vld [vmem:[%s2709_s29 + $0x128] ss:$16 sps:$4 sm:$0xff]  }
  0x9a   : > { %2113 = vmatprep.subr.bf16.mxu1 %v2525_v1  ;;  %v2269_v1 = vld [vmem:[%s2709_s29 + $0x144] ss:$16 sps:$4 sm:$0xff]  }
  0x9b   : > { %1168 = vmatmul.mubr.bf16.vlgmr.msra.gmra.mxu0 %v2257_v34 }
  0x9c   : > { %1233 = vmatmul.mubr.bf16.vlgmr.msra.gmra.mxu1 %v2260_v35  ;;  %2074 = vmatpush3.bf16.msra.mxu0 %v2531_v2  ;;  %v2271_v2 = vld [vmem:[%s2709_s29 + $0x14c] ss:$16 sps:$4 sm:$0xff]  }
  0x9d   : > { %2114 = vmatpush3.bf16.msra.mxu1 %v2537_v3  ;;  %2075 = vmatprep.subr.bf16.mxu0 %v2543_v4  ;;  %v2273_v3 = vld [vmem:[%s2709_s29 + $0x140] ss:$16 sps:$4 sm:$0xff]   ;;  %v2274_v4 = vld [vmem:[%s2709_s29 + $0x148] ss:$16 sps:$4 sm:$0xff]  }
  0x9e   : > { %2115 = vmatprep.subr.bf16.mxu1 %v2549_v5  ;;  %1175 = vmatprep.mubr.bf16.mxu0 %v2263_v36  ;;  %v2275_v5 = vld [vmem:[%s2709_s29 + $0x164] ss:$16 sps:$4 sm:$0xff]  }
  0x9f   : > { %1240 = vmatprep.mubr.bf16.mxu1 %v2265_v37 }
  0xa0   : > { %2076 = vmatpush3.bf16.msra.mxu0 %v2555_v6  ;;  %v2277_v6 = vld [vmem:[%s2709_s29 + $0x16c] ss:$16 sps:$4 sm:$0xff]  }
  0xa1   : > { %2116 = vmatpush3.bf16.msra.mxu1 %v2561_v7  ;;  %2077 = vmatprep.subr.bf16.mxu0 %v2567_v8  ;;  %v2279_v7 = vld [vmem:[%s2709_s29 + $0x160] ss:$16 sps:$4 sm:$0xff]   ;;  %v2280_v8 = vld [vmem:[%s2709_s29 + $0x168] ss:$16 sps:$4 sm:$0xff]  }
  0xa2   : > { %2117 = vmatprep.subr.bf16.mxu1 %v2573_v9  ;;  %v2283_v9 = vld [vmem:[%s2709_s29 + $0x184] ss:$16 sps:$4 sm:$0xff]  }
  0xa3   : > { %1176 = vmatmul.mubr.bf16.gmra.mxu0 %v2267_v38 }
  0xa4   : > { %1241 = vmatmul.mubr.bf16.gmra.mxu1 %v2268_v0  ;;  %2078 = vmatpush3.bf16.msra.mxu0 %v2579_v10  ;;  %v2286_v10 = vld [vmem:[%s2709_s29 + $0x18c] ss:$16 sps:$4 sm:$0xff]  }
  0xa5   : > { %2118 = vmatpush3.bf16.msra.mxu1 %v2585_v11  ;;  %2079 = vmatprep.subr.bf16.mxu0 %v2591_v12  ;;  %v2281_v11 = vld [vmem:[%s2709_s29 + $0x180] ss:$16 sps:$4 sm:$0xff]   ;;  %v2284_v12 = vld [vmem:[%s2709_s29 + $0x188] ss:$16 sps:$4 sm:$0xff]  }
  0xa6   : > { %2119 = vmatprep.subr.bf16.mxu1 %v2597_v13  ;;  %1183 = vmatprep.mubr.bf16.mxu0 %v2269_v1  ;;  %v2287_v13 = vld [vmem:[%s2709_s29 + $0x1a4] ss:$16 sps:$4 sm:$0xff]  }
  0xa7   : > { %1248 = vmatprep.mubr.bf16.mxu1 %v2271_v2 }
  0xa8   : > { %2080 = vmatpush3.bf16.msra.mxu0 %v2603_v14  ;;  %v2289_v14 = vld [vmem:[%s2709_s29 + $0x1ac] ss:$16 sps:$4 sm:$0xff]  }
  0xa9   : > { %2120 = vmatpush3.bf16.msra.mxu1 %v2609_v15  ;;  %2081 = vmatprep.subr.bf16.mxu0 %v2615_v16  ;;  %v2291_v15 = vld [vmem:[%s2709_s29 + $0x1a0] ss:$16 sps:$4 sm:$0xff]   ;;  %v2292_v16 = vld [vmem:[%s2709_s29 + $0x1a8] ss:$16 sps:$4 sm:$0xff]  }
  0xaa   : > { %2121 = vmatprep.subr.bf16.mxu1 %v2621_v17  ;;  %v2293_v17 = vld [vmem:[%s2709_s29 + $0x1c4] ss:$16 sps:$4 sm:$0xff]  }
  0xab   : > { %1184 = vmatmul.mubr.bf16.gmra.mxu0 %v2273_v3 }
  0xac   : > { %1249 = vmatmul.mubr.bf16.gmra.mxu1 %v2274_v4  ;;  %2082 = vmatpush3.bf16.msra.mxu0 %v2627_v18  ;;  %v2295_v18 = vld [vmem:[%s2709_s29 + $0x1cc] ss:$16 sps:$4 sm:$0xff]  }
  0xad   : > { %2122 = vmatpush3.bf16.msra.mxu1 %v2633_v19  ;;  %2083 = vmatprep.subr.bf16.mxu0 %v2639_v20  ;;  %v2297_v19 = vld [vmem:[%s2709_s29 + $0x1c0] ss:$16 sps:$4 sm:$0xff]   ;;  %v2298_v20 = vld [vmem:[%s2709_s29 + $0x1c8] ss:$16 sps:$4 sm:$0xff]  }
  0xae   : > { %2123 = vmatprep.subr.bf16.mxu1 %v2645_v21  ;;  %1191 = vmatprep.mubr.bf16.mxu0 %v2275_v5  ;;  %v2299_v21 = vld [vmem:[%s2709_s29 + $0x1e4] ss:$16 sps:$4 sm:$0xff]  }
  0xaf   : > { %1256 = vmatprep.mubr.bf16.mxu1 %v2277_v6 }
  0xb0   : > { %2084 = vmatpush3.bf16.msra.mxu0 %v2651_v22  ;;  %v2301_v22 = vld [vmem:[%s2709_s29 + $0x1ec] ss:$16 sps:$4 sm:$0xff]  }
  0xb1   : > { %2124 = vmatpush3.bf16.msra.mxu1 %v2657_v23  ;;  %2085 = vmatprep.subr.bf16.mxu0 %v2664_v24  ;;  %v2303_v23 = vld [vmem:[%s2709_s29 + $0x1e0] ss:$16 sps:$4 sm:$0xff]   ;;  %v2304_v24 = vld [vmem:[%s2709_s29 + $0x1e8] ss:$16 sps:$4 sm:$0xff]  }
  0xb2   : > { %2125 = vmatprep.subr.bf16.mxu1 %v2670_v25 }
  0xb3   : > { %1192 = vmatmul.mubr.bf16.gmra.mxu0 %v2279_v7 }
  0xb4   : > { %1257 = vmatmul.mubr.bf16.gmra.mxu1 %v2280_v8  ;;  %2086 = vmatpush3.bf16.msra.mxu0 %v2676_v26 }
  0xb5   : > { %2126 = vmatpush3.bf16.msra.mxu1 %v2682_v27  ;;  %2087 = vmatprep.subr.bf16.mxu0 %v2688_v28 }
  0xb6   : > { %2127 = vmatprep.subr.bf16.mxu1 %v2694_v29  ;;  %1402 = vmatprep.mubr.bf16.mxu0 %v2283_v9 }
  0xb7   : > { %1467 = vmatprep.mubr.bf16.mxu1 %v2286_v10 }
  0xb8   : > { %2088 = vmatpush3.bf16.msra.mxu0 %v2700_v30 }
  0xb9   : > { %2128 = vmatpush3.bf16.msra.mxu1 %v2706_v31 }
  0xbb   : > { %1403 = vmatmul.mubr.bf16.vlgmr.msra.gmra.mxu0 %v2281_v11 }
  0xbc   : > { %1468 = vmatmul.mubr.bf16.vlgmr.msra.gmra.mxu1 %v2284_v12  ;;  %1410 = vmatprep.mubr.bf16.mxu0 %v2287_v13 }
  0xbd   : > { %1475 = vmatprep.mubr.bf16.mxu1 %v2289_v14 }
  0xc3   : > { %1411 = vmatmul.mubr.bf16.gmra.mxu0 %v2291_v15 }
  0xc4   : > { %1476 = vmatmul.mubr.bf16.gmra.mxu1 %v2292_v16  ;;  %1418 = vmatprep.mubr.bf16.mxu0 %v2293_v17 }
  0xc5   : > { %1483 = vmatprep.mubr.bf16.mxu1 %v2295_v18 }
  0xcb   : > { %1419 = vmatmul.mubr.bf16.gmra.mxu0 %v2297_v19 }
  0xcc   : > { %1484 = vmatmul.mubr.bf16.gmra.mxu1 %v2298_v20  ;;  %1426 = vmatprep.mubr.bf16.mxu0 %v2299_v21 }
  0xcd   : > { %1491 = vmatprep.mubr.bf16.mxu1 %v2301_v22 }
  0xd3   : > { %1427 = vmatmul.mubr.bf16.gmra.mxu0 %v2303_v23 }
  0xd4   : > { %1492 = vmatmul.mubr.bf16.gmra.mxu1 %v2304_v24 }
 0x11b   : > { %v1849_v25 = vpop.f32.mrf.mxu0 }
 0x11c   : > { %v1889_v26 = vpop.f32.mrf.mxu1 }
 0x11d   : > { %v1850_v27 = vpop.f32.mrf.mxu0 }
 0x11e   : > { %v1851_v28 = vadd.f32 %v1850_v27, %v1849_v25  ;;  %v1890_v29 = vpop.f32.mrf.mxu1 }
 0x11f   : > { %v1891_v30 = vadd.f32 %v1890_v29, %v1889_v26  ;;  %v1852_v31 = vpop.f32.mrf.mxu0 }
 0x120   : > { %v1892_v39 = vpop.f32.mrf.mxu1 }
 0x121   : > { %v2872_v40 = vadd.f32 %v1891_v30, %v1851_v28  ;;  %v1853_v41 = vpop.f32.mrf.mxu0 }
 0x122   : > { %v1854_v42 = vadd.f32 %v1853_v41, %v1852_v31  ;;  %v1893_v43 = vpop.f32.mrf.mxu1 }
 0x123   : > { %v1894_v44 = vadd.f32 %v1893_v43, %v1892_v39  ;;  %v1855_v45 = vpop.f32.mrf.mxu0 }
 0x124   : > { %v1895_v46 = vpop.f32.mrf.mxu1 }
 0x125   : > { %v2874_v47 = vadd.f32 %v1894_v44, %v1854_v42  ;;  %v1856_v48 = vpop.f32.mrf.mxu0 }
 0x126   : > { %v1857_v49 = vadd.f32 %v1856_v48, %v1855_v45  ;;  %v1896_v50 = vpop.f32.mrf.mxu1 }
 0x127   : > { %v1897_v51 = vadd.f32 %v1896_v50, %v1895_v46  ;;  %v1858_v52 = vpop.f32.mrf.mxu0 }
 0x128   : > { %v1898_v53 = vpop.f32.mrf.mxu1 }
 0x129   : > { %v2876_v54 = vadd.f32 %v1897_v51, %v1857_v49  ;;  %v1859_v55 = vpop.f32.mrf.mxu0 }
 0x12a   : > { %v1860_v56 = vadd.f32 %v1859_v55, %v1858_v52  ;;  %v1899_v57 = vpop.f32.mrf.mxu1 }
 0x12b   : > { %v1900_v58 = vadd.f32 %v1899_v57, %v1898_v53  ;;  %v1861_v59 = vpop.f32.mrf.mxu0 }
 0x12c   : > { %v1901_v60 = vpop.f32.mrf.mxu1 }
 0x12d   : > { %v2878_v61 = vadd.f32 %v1900_v58, %v1860_v56  ;;  %v1862_v62 = vpop.f32.mrf.mxu0 }
 0x12e   : > { %v1863_v63 = vadd.f32 %v1862_v62, %v1861_v59  ;;  %v1902_v32 = vpop.f32.mrf.mxu1 }
 0x12f   : > { %v1903_v33 = vadd.f32 %v1902_v32, %v1901_v60  ;;  %v1864_v34 = vpop.f32.mrf.mxu0 }
 0x130   : > { %v1904_v35 = vpop.f32.mrf.mxu1 }
 0x131   : > { %v2880_v36 = vadd.f32 %v1903_v33, %v1863_v63  ;;  %v1865_v37 = vpop.f32.mrf.mxu0 }
 0x132   : > { %v1866_v38 = vadd.f32 %v1865_v37, %v1864_v34  ;;  %v1905_v0 = vpop.f32.mrf.mxu1 }
 0x133   : > { %v1906_v1 = vadd.f32 %v1905_v0, %v1904_v35  ;;  %v1867_v2 = vpop.f32.mrf.mxu0 }
 0x134   : > { %v1907_v3 = vpop.f32.mrf.mxu1 }
 0x135   : > { %v2882_v4 = vadd.f32 %v1906_v1, %v1866_v38  ;;  %v1868_v5 = vpop.f32.mrf.mxu0 }
 0x136   : > { %v1869_v6 = vadd.f32 %v1868_v5, %v1867_v2  ;;  %v1908_v7 = vpop.f32.mrf.mxu1 }
 0x137   : > { %v1909_v8 = vadd.f32 %v1908_v7, %v1907_v3  ;;  %v1870_v9 = vpop.f32.mrf.mxu0 }
 0x138   : > { %v1910_v10 = vpop.f32.mrf.mxu1 }
 0x139   : > { %v2884_v11 = vadd.f32 %v1909_v8, %v1869_v6  ;;  %v1871_v12 = vpop.f32.mrf.mxu0 }
 0x13a   : > { %v1872_v13 = vadd.f32 %v1871_v12, %v1870_v9  ;;  %v1911_v14 = vpop.f32.mrf.mxu1 }
 0x13b   : > { %3060 = vst [vmem:[#allocation3_spill] sm:$0xff] %v2884_v11  ;;  %v1912_v15 = vadd.f32 %v1911_v14, %v1910_v10  ;;  %v1929_v16 = vpop.f32.mrf.mxu0 }
 0x13c   : > { %v1969_v17 = vpop.f32.mrf.mxu1 }
 0x13d   : > { %v2886_v18 = vadd.f32 %v1912_v15, %v1872_v13  ;;  %v1930_v19 = vpop.f32.mrf.mxu0 }
 0x13e   : > { %v1931_v20 = vadd.f32 %v1930_v19, %v1929_v16  ;;  %v1970_v21 = vpop.f32.mrf.mxu1 }
 0x13f   : > { %3061 = vst [vmem:[#allocation4_spill] sm:$0xff] %v2886_v18  ;;  %v1971_v22 = vadd.f32 %v1970_v21, %v1969_v17  ;;  %v2888_v23 = vpop.f32.mrf.mxu0 }
 0x140   : > { %v2890_v24 = vpop.f32.mrf.mxu1 }
 0x141   : > { %v2892_v25 = vadd.f32 %v1971_v22, %v1931_v20  ;;  %v2894_v26 = vpop.f32.mrf.mxu0 }
 0x142   : > { %v2896_v27 = vpop.f32.mrf.mxu1  ;;  %v1934_v49 = vadd.f32 %v2894_v26, %v2888_v23 }
 0x143   : > { %v1935_v29 = vpop.f32.mrf.mxu0  ;;  %v1974_v28 = vadd.f32 %v2896_v27, %v2890_v24  ;;  %v3070_v23 = vmax.f32 %v2872_v40, %v2892_v25  ;;  %v2985_v25 = vld [vmem:[%s3056_s2] ss:$0 sm:$0xff] }
 0x144   : > { %v1975_v30 = vpop.f32.mrf.mxu1 }
 0x145   : > { %v1936_v31 = vpop.f32.mrf.mxu0 }
 0x146   : > { %v1937_v39 = vadd.f32 %v1936_v31, %v1935_v29  ;;  %v1976_v41 = vpop.f32.mrf.mxu1 }
 0x147   : > { %v1977_v42 = vadd.f32 %v1976_v41, %v1975_v30  ;;  %v2900_v43 = vpop.f32.mrf.mxu0 }
 0x148   : > { %v2902_v44 = vpop.f32.mrf.mxu1 }
 0x149   : > { %v2904_v45 = vadd.f32 %v1977_v42, %v1937_v39  ;;  %v2906_v46 = vpop.f32.mrf.mxu0 }
 0x14a   : > { %v2908_v48 = vpop.f32.mrf.mxu1 }
 0x14b   : > { %v1941_v50 = vpop.f32.mrf.mxu0 }
 0x14c   : > { %v1981_v51 = vpop.f32.mrf.mxu1 }
 0x14d   : > { %v1942_v52 = vpop.f32.mrf.mxu0 }
 0x14e   : > { %v1943_v53 = vadd.f32 %v1942_v52, %v1941_v50  ;;  %v1982_v55 = vpop.f32.mrf.mxu1 }
 0x14f   : > { %v1983_v56 = vadd.f32 %v1982_v55, %v1981_v51  ;;  %v2912_v57 = vpop.f32.mrf.mxu0 }
 0x150   : > { %v2914_v58 = vpop.f32.mrf.mxu1 }
 0x151   : > { %v2916_v59 = vadd.f32 %v1983_v56, %v1943_v53  ;;  %v2918_v60 = vpop.f32.mrf.mxu0 }
 0x152   : > { %v2920_v62 = vpop.f32.mrf.mxu1 }
 0x153   : > { %v1947_v32 = vpop.f32.mrf.mxu0 }
 0x154   : > { %v1987_v33 = vpop.f32.mrf.mxu1 }
 0x155   : > { %v1948_v34 = vpop.f32.mrf.mxu0 }
 0x156   : > { %v1949_v35 = vadd.f32 %v1948_v34, %v1947_v32  ;;  %v1988_v37 = vpop.f32.mrf.mxu1 }
 0x157   : > { %v1989_v38 = vadd.f32 %v1988_v37, %v1987_v33  ;;  %v2924_v0 = vpop.f32.mrf.mxu0 }
 0x158   : > { %v2926_v1 = vpop.f32.mrf.mxu1 }
 0x159   : > { %3062 = vst [vmem:[#allocation5_spill] sm:$0xff] %v2926_v1  ;;  %v2928_v2 = vadd.f32 %v1989_v38, %v1949_v35  ;;  %v2930_v3 = vpop.f32.mrf.mxu0 }
 0x15a   : > { %3064 = vst [vmem:[#allocation7_spill] sm:$0xff] %v2930_v3  ;;  %v2932_v5 = vpop.f32.mrf.mxu1 }
 0x15b   : > { %3063 = vst [vmem:[#allocation6_spill] sm:$0xff] %v2928_v2  ;;  %3065 = vst [vmem:[#allocation8_spill] sm:$0xff] %v2932_v5  ;;  %v2009_v7 = vpop.f32.mrf.mxu0 }
 0x15c   : > { %v2049_v8 = vpop.f32.mrf.mxu1 }
 0x15d   : > { %v2010_v9 = vpop.f32.mrf.mxu0 }
 0x15e   : > { %v2050_v10 = vpop.f32.mrf.mxu1  ;;  %v2011_v37 = vadd.f32 %v2010_v9, %v2009_v7  ;;  %v1003_v7 = vadd.f32 %v1974_v28, %v1934_v49 }
 0x15f   : > { %v2012_v12 = vpop.f32.mrf.mxu0  ;;  %v2051_v38 = vadd.f32 %v2050_v10, %v2049_v8 }
 0x160   : > { %v2052_v13 = vpop.f32.mrf.mxu1 }
 0x161   : > { %v2013_v14 = vpop.f32.mrf.mxu0  ;;  %v1235_v11 = vadd.f32 %v2051_v38, %v2011_v37 }
 0x162   : > { %v2053_v15 = vpop.f32.mrf.mxu1  ;;  %v2014_v5 = vadd.f32 %v2013_v14, %v2012_v12 }
 0x163   : > { %v2015_v16 = vpop.f32.mrf.mxu0  ;;  %v1265_v24 = vmax.f32 %v3070_v23, %v1235_v11 }
 0x164   : > { %v2055_v17 = vpop.f32.mrf.mxu1 }
 0x165   : > { %v2016_v19 = vpop.f32.mrf.mxu0 }
 0x166   : > { %v2056_v20 = vpop.f32.mrf.mxu1  ;;  %v2017_v10 = vadd.f32 %v2016_v19, %v2015_v16  ;;  %v3071_v19 = vmax.f32 %v2876_v54, %v2904_v45  ;;  %v1986_v54 = vadd.f32 %v2920_v62, %v2914_v58 }
 0x167   : > { %v2018_v21 = vpop.f32.mrf.mxu0 }
 0x168   : > { %v2058_v22 = vpop.f32.mrf.mxu1 }
 0x169   : > { %v2019_v29 = vpop.f32.mrf.mxu0 }
 0x16a   : > { %v2059_v30 = vpop.f32.mrf.mxu1  ;;  %v2020_v40 = vadd.f32 %v2019_v29, %v2018_v21 }
 0x16b   : > { %v2936_v31 = vpop.f32.mrf.mxu0  ;;  %v2060_v11 = vadd.f32 %v2059_v30, %v2058_v22 }
 0x16c   : > { %v2938_v39 = vpop.f32.mrf.mxu1 }
 0x16d   : > { %v2940_v41 = vpop.f32.mrf.mxu0  ;;  %v1246_v21 = vadd.f32 %v2060_v11, %v2020_v40 }
 0x16e   : > { %v2942_v42 = vpop.f32.mrf.mxu1  ;;  %v2023_v29 = vadd.f32 %v2940_v41, %v2936_v31 }
 0x16f   : > { %v2944_v50 = vpop.f32.mrf.mxu0  ;;  %v2063_v30 = vadd.f32 %v2942_v42, %v2938_v39 }
 0x170   : > { %v2946_v51 = vpop.f32.mrf.mxu1 }
 0x171   : > { %v2948_v52 = vpop.f32.mrf.mxu0  ;;  %v1251_v58 = vadd.f32 %v2063_v30, %v2023_v29 }
 0x172   : > { %v2950_v53 = vpop.f32.mrf.mxu1  ;;  %v2026_v42 = vadd.f32 %v2948_v52, %v2944_v50 }
 0x173   : > { %v2952_v55 = vpop.f32.mrf.mxu0 }
 0x174   : > { %v2954_v56 = vpop.f32.mrf.mxu1 }
 0x175   : > { %v2956_v32 = vpop.f32.mrf.mxu0 }
 0x176   : > { %v2958_v33 = vpop.f32.mrf.mxu1 }
 0x177   : > { %v2960_v34 = vpop.f32.mrf.mxu0 }
 0x178   : > { %3066 = vst [vmem:[#allocation9_spill] sm:$0xff] %v2960_v34  ;;  %v2962_v35 = vpop.f32.mrf.mxu1  ;;  %v2054_v34 = vadd.f32 %v2053_v15, %v2052_v13 }
 0x179   : > { %3067 = vst [vmem:[#allocation10_spill] sm:$0xff] %v2962_v35  ;;  %v2964_v6 = vpop.f32.mrf.mxu0 }
 0x17a   : > { %3068 = vst [vmem:[#allocation11_spill] sm:$0xff] %v2964_v6  ;;  %v2966_v63 = vpop.f32.mrf.mxu1  ;;  %v1238_v26 = vadd.f32 %v2054_v34, %v2014_v5 }
 0x17b   : > { %3069 = vst [vmem:[#allocation12_spill] sm:$0xff] %v2966_v63  ;;  %v2089_v18 = vpop.f32.mrf.mxu0  ;;  %v2057_v63 = vadd.f32 %v2056_v20, %v2055_v17 }
 0x17c   : > { %v2129_v2 = vpop.f32.mrf.mxu1 }
 0x17d   : > { %v2090_v1 = vpop.f32.mrf.mxu0  ;;  %v1243_v15 = vadd.f32 %v2057_v63, %v2017_v10 }
 0x17e   : > { %v2091_v3 = vadd.f32 %v2090_v1, %v2089_v18  ;;  %v2130_v35 = vpop.f32.mrf.mxu1  ;;  %v1940_v18 = vadd.f32 %v2906_v46, %v2900_v43  ;;  %v1980_v1 = vadd.f32 %v2908_v48, %v2902_v44 }
 0x17f   : > { %v2131_v8 = vadd.f32 %v2130_v35, %v2129_v2  ;;  %v2092_v9 = vpop.f32.mrf.mxu0  ;;  %v1031_v2 = vmax.f32 %v2874_v47, %v1003_v7  ;;  %v1267_v20 = vmax.f32 %v3071_v19, %v1243_v15 }
 0x180   : > { %v2132_v6 = vpop.f32.mrf.mxu1  ;;  %v1011_v47 = vadd.f32 %v1980_v1, %v1940_v18  ;;  %v3078_v19 = vld [vmem:[#allocation10_spill] sm:$0xff] }
 0x181   : > { %v1470_v27 = vadd.f32 %v2131_v8, %v2091_v3  ;;  %v2093_v37 = vpop.f32.mrf.mxu0  ;;  %v1266_v43 = vmax.f32 %v1031_v2, %v1238_v26  ;;  %v1946_v8 = vadd.f32 %v2918_v60, %v2912_v57 }
 0x182   : > { %v2094_v28 = vadd.f32 %v2093_v37, %v2092_v9  ;;  %v2133_v49 = vpop.f32.mrf.mxu1  ;;  %v1033_v7 = vmax.f32 %v2878_v61, %v1011_v47 }
 0x183   : > { %v1500_v12 = vmax.f32 %v1265_v24, %v1470_v27  ;;  %v2134_v13 = vadd.f32 %v2133_v49, %v2132_v6  ;;  %v2095_v14 = vpop.f32.mrf.mxu0  ;;  %v2066_v24 = vadd.f32 %v2950_v53, %v2946_v51  ;;  %v1019_v27 = vadd.f32 %v1986_v54, %v1946_v8 }
 0x184   : > { %v2135_v3 = vpop.f32.mrf.mxu1  ;;  %v1268_v57 = vmax.f32 %v1033_v7, %v1246_v21  ;;  %v2069_v49 = vadd.f32 %v2958_v33, %v2954_v56 }
 0x185   : > { %v1473_v44 = vadd.f32 %v2134_v13, %v2094_v28  ;;  %v2096_v46 = vpop.f32.mrf.mxu0  ;;  %v1515_v63 = vadd.f32 %v2985_v25, %v1500_v12  ;;  %v1254_v1 = vadd.f32 %v2066_v24, %v2026_v42  ;;  %v2029_v28 = vadd.f32 %v2956_v32, %v2952_v55 }
 0x186   : > { %v2097_v48 = vadd.f32 %v2096_v46, %v2095_v14  ;;  %v2136_v5 = vpop.f32.mrf.mxu1  ;;  %v3072_v12 = vmax.f32 %v2880_v36, %v2916_v59  ;;  %v1035_v11 = vmax.f32 %v2882_v4, %v1019_v27  ;;  %v3075_v46 = vld [vmem:[#allocation8_spill] sm:$0xff] }
 0x187   : > { %v1501_v6 = vmax.f32 %v1266_v43, %v1473_v44  ;;  %v2137_v16 = vadd.f32 %v2136_v5, %v2135_v3  ;;  %v2098_v17 = vpop.f32.mrf.mxu0  ;;  %v1523_v10 = vmax.f32 %v1515_v63, 0.0  ;;  %v3073_v3 = vld [vmem:[#allocation7_spill] sm:$0xff]  ;;  %v3074_v44 = vld [vmem:[#allocation5_spill] sm:$0xff]  ;;  %v1259_v63 = vadd.f32 %v2069_v49, %v2029_v28 }
 0x188   : > { %v2138_v22 = vpop.f32.mrf.mxu1  ;;  %v1269_v13 = vmax.f32 %v3072_v12, %v1251_v58  ;;  %v1952_v43 = vadd.f32 %v3073_v3, %v2924_v0  ;;  %v1992_v55 = vadd.f32 %v3075_v46, %v3074_v44  ;;  %v1270_v5 = vmax.f32 %v1035_v11, %v1254_v1 }
 0x189   : > { %v1516_v34 = vadd.f32 %v2985_v25, %v1501_v6  ;;  %v1478_v35 = vadd.f32 %v2137_v16, %v2097_v48  ;;  %v2099_v38 = vpop.f32.mrf.mxu0  ;;  %v3076_v16 = vld [vmem:[#allocation9_spill] sm:$0xff] }
 0x18a   : > { %v2100_v45 = vadd.f32 %v2099_v38, %v2098_v17  ;;  %v2139_v9 = vpop.f32.mrf.mxu1  ;;  %v3077_v17 = vld [vmem:[#allocation11_spill] sm:$0xff]  ;;  %v1027_v30 = vadd.f32 %v1992_v55, %v1952_v43 }
 0x18b   : > { %v1524_v31 = vmax.f32 %v1516_v34, 0.0  ;;  %v1502_v41 = vmax.f32 %v1267_v20, %v1478_v35  ;;  %v2140_v23 = vadd.f32 %v2139_v9, %v2138_v22  ;;  %v2101_v39 = vpop.f32.mrf.mxu0  ;;  %v2032_v4 = vadd.f32 %v3077_v17, %v3076_v16  ;;  %v3079_v20 = vld [vmem:[#allocation12_spill] sm:$0xff]  ;;  %v3080_v9 = vld [vmem:[#allocation3_spill] sm:$0xff] }
 0x18c   : > { %v2141_v61 = vpop.f32.mrf.mxu1  ;;  %v2072_v0 = vadd.f32 %v3079_v20, %v3078_v19 }
 0x18d   : > { %v1813_v60 = vpack.c.bf16 %v1524_v31, %v1523_v10  ;;  %v1481_v62 = vadd.f32 %v2140_v23, %v2100_v45  ;;  %v2102_v26 = vpop.f32.mrf.mxu0  ;;  %v1517_v50 = vadd.f32 %v2985_v25, %v1502_v41  ;;  %v3081_v10 = vld [vmem:[#allocation6_spill] sm:$0xff] }
 0x18e   : > { %v2103_v37 = vadd.f32 %v2102_v26, %v2101_v39  ;;  %v2142_v18 = vpop.f32.mrf.mxu1  ;;  %v3082_v31 = vmax.f32 %v3080_v9, %v3081_v10  ;;  %v1262_v23 = vadd.f32 %v2072_v0, %v2032_v4 }
 0x18f   : > { %1814 = vst [vmem:[%s3012_s7] sm:$0xff] %v1813_v60   ;;  %v1503_v52 = vmax.f32 %v1268_v57, %v1481_v62  ;;  %v2143_v51 = vadd.f32 %v2142_v18, %v2141_v61  ;;  %v2104_v53 = vpop.f32.mrf.mxu0  ;;  %v1525_v56 = vmax.f32 %v1517_v50, 0.0  ;;  %v3083_v61 = vld [vmem:[#allocation4_spill] sm:$0xff] }
 0x190   : > { %v2144_v2 = vpop.f32.mrf.mxu1  ;;  %v1271_v41 = vmax.f32 %v3082_v31, %v1259_v63  ;;  %v1037_v57 = vmax.f32 %v3083_v61, %v1027_v30 }
 0x191   : > { %v1518_v14 = vadd.f32 %v2985_v25, %v1503_v52  ;;  %v1486_v15 = vadd.f32 %v2143_v51, %v2103_v37  ;;  %v2105_v40 = vpop.f32.mrf.mxu0 }
 0x192   : > { %v2106_v32 = vadd.f32 %v2105_v40, %v2104_v53  ;;  %v2145_v47 = vpop.f32.mrf.mxu1  ;;  %v1272_v18 = vmax.f32 %v1037_v57, %v1262_v23 }
 0x193   : > { %v1526_v33 = vmax.f32 %v1518_v14, 0.0  ;;  %v1504_v48 = vmax.f32 %v1269_v13, %v1486_v15  ;;  %v2146_v36 = vadd.f32 %v2145_v47, %v2144_v2  ;;  %v2107_v59 = vpop.f32.mrf.mxu0 }
 0x194   : > { %v2147_v6 = vpop.f32.mrf.mxu1 }
 0x195   : > { %v1818_v21 = vpack.c.bf16 %v1526_v33, %v1525_v56  ;;  %v1489_v22 = vadd.f32 %v2146_v36, %v2106_v32  ;;  %v2108_v29 = vpop.f32.mrf.mxu0  ;;  %v1519_v38 = vadd.f32 %v2985_v25, %v1504_v48 }
 0x196   : > { %v2109_v34 = vadd.f32 %v2108_v29, %v2107_v59  ;;  %v2148_v35 = vpop.f32.mrf.mxu1 }
 0x197   : > { %1830 = vst [vmem:[%s3012_s7 + $0x8] sm:$0xff] %v1818_v21   ;;  %v1505_v7 = vmax.f32 %v1270_v5, %v1489_v22  ;;  %v2149_v8 = vadd.f32 %v2148_v35, %v2147_v6  ;;  %v2110_v54 = vpop.f32.mrf.mxu0  ;;  %v1527_v62 = vmax.f32 %v1519_v38, 0.0 }
 0x198   : > { %v2150_v45 = vpop.f32.mrf.mxu1 }
 0x199   : > { %v1520_v39 = vadd.f32 %v2985_v25, %v1505_v7  ;;  %v1494_v42 = vadd.f32 %v2149_v8, %v2109_v34  ;;  %v2111_v24 = vpop.f32.mrf.mxu0 }
 0x19a   : > { %v2112_v58 = vadd.f32 %v2111_v24, %v2110_v54  ;;  %v2151_v60 = vpop.f32.mrf.mxu1 }
 0x19b   : > { %v1528_v26 = vmax.f32 %v1520_v39, 0.0  ;;  %v1506_v27 = vmax.f32 %v1271_v41, %v1494_v42  ;;  %v2152_v37 = vadd.f32 %v2151_v60, %v2150_v45 }
 0x19d   : > { %v1823_v50 = vpack.c.bf16 %v1528_v26, %v1527_v62  ;;  %v1497_v52 = vadd.f32 %v2152_v37, %v2112_v58  ;;  %v1521_v51 = vadd.f32 %v2985_v25, %v1506_v27 }
 0x19f   : > { %1831 = vst [vmem:[%s3012_s7 + $0x10] sm:$0xff] %v1823_v50   ;;  %v1507_v53 = vmax.f32 %v1272_v18, %v1497_v52  ;;  %v1529_v28 = vmax.f32 %v1521_v51, 0.0 }
 0x1a1   : > { %v1522_v1 = vadd.f32 %v2985_v25, %v1507_v53 }
 0x1a3   : > { %v1530_v49 = vmax.f32 %v1522_v1, 0.0 }
 0x1a5   : > { %v1828_v2 = vpack.c.bf16 %v1530_v49, %v1529_v28 }
 0x1a7   : > { %1832 = vst [vmem:[%s3012_s7 + $0x18] sm:$0xff] %v1828_v2  }
 0x1a8 PF: > { %p10_p9 = scmp.ge.s32.totalorder %s2366_s16, 4   ;;  %s3084_s12 = smov %s2323_s13 }
 0x1a9   : > { %s3085_s13 = smov %s2375_s19  ;;  %s3086_s14 = smov %s2366_s16 }
 0x1aa   :  { %12 = sbr.rel (!%p10_p9) target bundleno = 2 (0x2), region = 93 }

// kernel: network_forward.6
= control target key start
LH: loop header
LB: loop body
LE: loop exit
PB: predicated region body
PF: predicated region fallthrough
CT: control target
= control target key end

     0   :  { %s2340_s12 = smov 0   ;;  %s2342_s13 = smov 0   ;;  %s3037_s0 = inlined_call_operand.vmem [shape: bf16[4,32,896], index: 0, kind: input, shape index: {}]   ;;  %s3038_s1 = inlined_call_operand.vmem [shape: bf16[896,128], index: 1, kind: input, shape index: {}]   ;;  %s3039_s2 = inlined_call_operand.vmem [shape: f32[1,128], index: 2, kind: input, shape index: {}]   ;;  %s3040_s3 = inlined_call_operand.vmem [shape: bf16[32,128], index: 3, kind: output, shape index: {}]  }
   0x1   :  { %s2344_s14 = smov 0  }
   0x2 LB: > { %s1643_s15 = sadd.s32 4294967295, %s2316_s14   ;;  %s2357_s16 = sadd.s32 1, %s2316_s14   ;;  %s2316_s14 = sphi %s2344_s14, %s3043_s14   ;;  %s2312_s13 = sphi %s2342_s13, %s3042_s13   ;;  %s2308_s12 = sphi %s2340_s12, %s3041_s12  }
   0x3   : > { %s17_s17 = ssub.s32 %s2316_s14, %s2357_s16  ;;  %s20_s18 = sadd.s32 1, %s2312_s13 }
   0x4   : > { %p18_p0 = scmp.eq.s32.totalorder %s17_s17, 0  ;;  %p27_p1 = scmp.ne.s32.totalorder %s2312_s13, %s2308_s12 }
   0x5   : > { %p28_p2 = scmp.eq.s32.totalorder %s2316_s14, 0  ;;  %p1646_p4 = scmp.ge.s32.totalorder %s2316_s14, 2 }
   0x6   : > { %s2366_s19 = scalar_select %p18_p0, %s2312_s13, %s20_s18  }
   0x7   : > { %p29_p3 = por %p28_p2, %p27_p1  ;;  %127 = sbr.rel (%p1646_p4) target bundleno = 34 (0x22), region = 24 }
   0xc   : > { %130 = sbr.rel (!%p29_p3) target bundleno = 34 (0x22), region = 28  ;;  %s132_s20 = sand.u32 (%p29_p3), 1, %s2312_s13  }
   0xd   : > { %s2170_s21 = smul.u32 (%p29_p3), 56, %s2316_s14 }
   0xe   : > { %s2169_s22 = smul.u32 (%p29_p3), 224, %s132_s20 }
   0xf   : > { %s2374_s25 = scalar_lea.vmem (%p29_p3), %s3037_s0, %s2170_s21 }
  0x10   : > { %v153_v0 = vld [vmem:[%s2374_s25] sm:$0xff] (%p29_p3)  ;;  %v155_v1 = vld [vmem:[%s2374_s25 + $0x8] sm:$0xff] (%p29_p3)  ;;  %v157_v2 = vld [vmem:[%s2374_s25 + $0x10] sm:$0xff] (%p29_p3)  ;;  %s2379_s26 = scalar_lea.vmem (%p29_p3), [#allocation2], %s2169_s22 }
  0x11   : > { %154 = vst [vmem:[%s2379_s26] sm:$0xff] %v153_v0  ;;  %156 = vst [vmem:[%s2379_s26 + $0x8] sm:$0xff] %v155_v1  ;;  %v159_v3 = vld [vmem:[%s2374_s25 + $0x1c] sm:$0xff]  ;;  %v161_v4 = vld [vmem:[%s2374_s25 + $0x24] sm:$0xff] }
  0x12   : > { %158 = vst [vmem:[%s2379_s26 + $0x10] sm:$0xff] %v157_v2  ;;  %v163_v5 = vld [vmem:[%s2374_s25 + $0x2c] sm:$0xff]  ;;  %160 = vst [vmem:[%s2379_s26 + $0x1c] sm:$0xff] %v159_v3  ;;  %v167_v7 = vld [vmem:[%s2374_s25 + $0x78] sm:$0xff] }
  0x13   : > { %162 = vst [vmem:[%s2379_s26 + $0x24] sm:$0xff] %v161_v4  ;;  %164 = vst [vmem:[%s2379_s26 + $0x2c] sm:$0xff] %v163_v5  ;;  %v165_v6 = vld [vmem:[%s2374_s25 + $0x70] sm:$0xff]  ;;  %v169_v8 = vld [vmem:[%s2374_s25 + $0x80] sm:$0xff] }
  0x14   : > { %166 = vst [vmem:[%s2379_s26 + $0x38] sm:$0xff] %v165_v6  ;;  %168 = vst [vmem:[%s2379_s26 + $0x40] sm:$0xff] %v167_v7  ;;  %v171_v9 = vld [vmem:[%s2374_s25 + $0x8c] sm:$0xff]  ;;  %v173_v10 = vld [vmem:[%s2374_s25 + $0x94] sm:$0xff] }
  0x15   : > { %170 = vst [vmem:[%s2379_s26 + $0x48] sm:$0xff] %v169_v8  ;;  %v175_v11 = vld [vmem:[%s2374_s25 + $0x9c] sm:$0xff]  ;;  %172 = vst [vmem:[%s2379_s26 + $0x54] sm:$0xff] %v171_v9  ;;  %v179_v13 = vld [vmem:[%s2374_s25 + $0xe8] sm:$0xff] }
  0x16   : > { %174 = vst [vmem:[%s2379_s26 + $0x5c] sm:$0xff] %v173_v10  ;;  %176 = vst [vmem:[%s2379_s26 + $0x64] sm:$0xff] %v175_v11  ;;  %v177_v12 = vld [vmem:[%s2374_s25 + $0xe0] sm:$0xff]  ;;  %v181_v14 = vld [vmem:[%s2374_s25 + $0xf0] sm:$0xff] }
  0x17   : > { %178 = vst [vmem:[%s2379_s26 + $0x70] sm:$0xff] %v177_v12  ;;  %180 = vst [vmem:[%s2379_s26 + $0x78] sm:$0xff] %v179_v13  ;;  %v183_v15 = vld [vmem:[%s2374_s25 + $0xfc] sm:$0xff]  ;;  %v185_v16 = vld [vmem:[%s2374_s25 + $0x104] sm:$0xff] }
  0x18   : > { %182 = vst [vmem:[%s2379_s26 + $0x80] sm:$0xff] %v181_v14  ;;  %v187_v17 = vld [vmem:[%s2374_s25 + $0x10c] sm:$0xff]  ;;  %184 = vst [vmem:[%s2379_s26 + $0x8c] sm:$0xff] %v183_v15  ;;  %v191_v19 = vld [vmem:[%s2374_s25 + $0x158] sm:$0xff] }
  0x19   : > { %186 = vst [vmem:[%s2379_s26 + $0x94] sm:$0xff] %v185_v16  ;;  %188 = vst [vmem:[%s2379_s26 + $0x9c] sm:$0xff] %v187_v17  ;;  %v189_v18 = vld [vmem:[%s2374_s25 + $0x150] sm:$0xff]  ;;  %v193_v20 = vld [vmem:[%s2374_s25 + $0x160] sm:$0xff] }
  0x1a   : > { %190 = vst [vmem:[%s2379_s26 + $0xa8] sm:$0xff] %v189_v18  ;;  %192 = vst [vmem:[%s2379_s26 + $0xb0] sm:$0xff] %v191_v19  ;;  %v195_v21 = vld [vmem:[%s2374_s25 + $0x16c] sm:$0xff]  ;;  %v197_v22 = vld [vmem:[%s2374_s25 + $0x174] sm:$0xff] }
  0x1b   : > { %194 = vst [vmem:[%s2379_s26 + $0xb8] sm:$0xff] %v193_v20  ;;  %v199_v23 = vld [vmem:[%s2374_s25 + $0x17c] sm:$0xff]  ;;  %196 = vst [vmem:[%s2379_s26 + $0xc4] sm:$0xff] %v195_v21  ;;  %v1650_v24 = vld [vmem:[%s2374_s25 + $0x18] sm:$0xf] }
  0x1c   : > { %198 = vst [vmem:[%s2379_s26 + $0xcc] sm:$0xff] %v197_v22  ;;  %200 = vst [vmem:[%s2379_s26 + $0xd4] sm:$0xff] %v199_v23  ;;  %v1652_v25 = vld [vmem:[%s2374_s25 + $0x34] sm:$0xf]  ;;  %v1654_v26 = vld [vmem:[%s2374_s25 + $0x88] sm:$0xf] }
  0x1d   : > { %1651 = vst [vmem:[%s2379_s26 + $0x18] sm:$0xf] %v1650_v24  ;;  %1653 = vst [vmem:[%s2379_s26 + $0x34] sm:$0xf] %v1652_v25  ;;  %v1656_v27 = vld [vmem:[%s2374_s25 + $0xa4] sm:$0xf] }
  0x1e   : > { %1655 = vst [vmem:[%s2379_s26 + $0x50] sm:$0xf] %v1654_v26  ;;  %v1658_v28 = vld [vmem:[%s2374_s25 + $0xf8] sm:$0xf]  ;;  %v1660_v29 = vld [vmem:[%s2374_s25 + $0x114] sm:$0xf] }
  0x1f   : > { %1657 = vst [vmem:[%s2379_s26 + $0x6c] sm:$0xf] %v1656_v27  ;;  %1659 = vst [vmem:[%s2379_s26 + $0x88] sm:$0xf] %v1658_v28  ;;  %v1662_v30 = vld [vmem:[%s2374_s25 + $0x168] sm:$0xf] }
  0x20   : > { %1661 = vst [vmem:[%s2379_s26 + $0xa4] sm:$0xf] %v1660_v29  ;;  %v1664_v31 = vld [vmem:[%s2374_s25 + $0x184] sm:$0xf]  ;;  %1663 = vst [vmem:[%s2379_s26 + $0xc0] sm:$0xf] %v1662_v30 }
  0x21   : > { %1665 = vst [vmem:[%s2379_s26 + $0xdc] sm:$0xf] %v1664_v31 }
  0x22 PF: > { %p1666_p5 = scmp.ge.s32.totalorder %s2316_s14, 1  ;;  %p229_p6 = scmp.lt.s32.totalorder %s2316_s14, 3 }
  0x24   : > { %p230_p7 = pnand %p1666_p5, %p229_p6 }
  0x25   : > { %s236_s4 = sand.u32 (!%p230_p7), 1, %s2308_s12  }
  0x26   : > { %233 = sbr.rel (%p230_p7) target bundleno = 515 (0x203), region = 54 }
  0x27   : > { %s2171_s12 = smul.u32 (!%p230_p7), 224, %s236_s4 }
  0x29   : > { %s2636_s29 = scalar_lea.vmem (!%p230_p7), [#allocation2], %s2171_s12 }
  0x2b   : > { %v2447_v32 = vld [vmem:[%s3038_s1 + $0x78] sm:$0xff]   ;;  %v2470_v36 = vld [vmem:[%s3038_s1 + $0x70] sm:$0xff]   ;;  %v2494_v40 = vld [vmem:[%s3038_s1 + $0x68] sm:$0xff]   ;;  %v2318_v4 = vmov 0.0   ;;  %vm2319_vm0 = vmmov 0  }
  0x2c   : > { %v2452_v33 = vld [vmem:[%s3038_s1 + $0xf8] sm:$0xff]   ;;  %1789 = vmatprep.subr.bf16.mxu0 %v2447_v32  ;;  %v2476_v37 = vld [vmem:[%s3038_s1 + $0xf0] sm:$0xff]   ;;  %v2500_v41 = vld [vmem:[%s3038_s1 + $0xe8] sm:$0xff]  }
  0x2d   : > { %v2458_v34 = vld [vmem:[%s3038_s1 + $0x38] sm:$0xff]   ;;  %1811 = vmatprep.subr.bf16.mxu1 %v2452_v33  ;;  %v2482_v38 = vld [vmem:[%s3038_s1 + $0x30] sm:$0xff]   ;;  %v2506_v42 = vld [vmem:[%s3038_s1 + $0x28] sm:$0xff]  }
  0x2e   : > { %v2464_v35 = vld [vmem:[%s3038_s1 + $0xb8] sm:$0xff]   ;;  %1790 = vmatpush3.bf16.msra.mxu0 %v2458_v34  ;;  %v2488_v39 = vld [vmem:[%s3038_s1 + $0xb0] sm:$0xff]   ;;  %v2512_v43 = vld [vmem:[%s3038_s1 + $0xa8] sm:$0xff]  }
  0x2f   : > { %1812 = vmatpush3.bf16.msra.mxu1 %v2464_v35  ;;  %1791 = vmatprep.subr.bf16.mxu0 %v2470_v36  ;;  %v2518_v44 = vld [vmem:[%s3038_s1 + $0x60] sm:$0xff]   ;;  %v2542_v48 = vld [vmem:[%s3038_s1 + $0x58] sm:$0xff]   ;;  %v2566_v52 = vld [vmem:[%s3038_s1 + $0x50] sm:$0xff]  }
  0x30   : > { %1813 = vmatprep.subr.bf16.mxu1 %v2476_v37  ;;  %v2524_v45 = vld [vmem:[%s3038_s1 + $0xe0] sm:$0xff]   ;;  %v2548_v49 = vld [vmem:[%s3038_s1 + $0xd8] sm:$0xff]   ;;  %v2572_v53 = vld [vmem:[%s3038_s1 + $0xd0] sm:$0xff]  }
  0x31   : > { %v2530_v46 = vld [vmem:[%s3038_s1 + $0x20] sm:$0xff]   ;;  %v2554_v50 = vld [vmem:[%s3038_s1 + $0x18] sm:$0xff]   ;;  %v2578_v54 = vld [vmem:[%s3038_s1 + $0x10] sm:$0xff]  }
  0x32   : > { %1792 = vmatpush3.bf16.msra.mxu0 %v2482_v38  ;;  %v2536_v47 = vld [vmem:[%s3038_s1 + $0xa0] sm:$0xff]   ;;  %v2560_v51 = vld [vmem:[%s3038_s1 + $0x98] sm:$0xff]   ;;  %v2585_v55 = vld [vmem:[%s3038_s1 + $0x90] sm:$0xff]  }
  0x33   : > { %1814 = vmatpush3.bf16.msra.mxu1 %v2488_v39  ;;  %1793 = vmatprep.subr.bf16.mxu0 %v2494_v40  ;;  %v2591_v56 = vld [vmem:[%s3038_s1 + $0x48] sm:$0xff]   ;;  %v2615_v60 = vld [vmem:[%s3038_s1 + $0x40] sm:$0xff]   ;;  %v2647_v5 = vld [vmem:[%s3038_s1 + $0x178] sm:$0xff]  }
  0x34   : > { %1815 = vmatprep.subr.bf16.mxu1 %v2500_v41  ;;  %v2597_v57 = vld [vmem:[%s3038_s1 + $0xc8] sm:$0xff]   ;;  %v2621_v61 = vld [vmem:[%s3038_s1 + $0xc0] sm:$0xff]   ;;  %v2652_v6 = vld [vmem:[%s3038_s1 + $0x138] sm:$0xff]  }
  0x35   : > { %v2603_v58 = vld [vmem:[%s3038_s1 + $0x8] sm:$0xff]   ;;  %v2627_v62 = vld [vmem:[%s3038_s1] sm:$0xff]   ;;  %v2658_v7 = vld [vmem:[%s3038_s1 + $0x1b8] sm:$0xff]  }
  0x36   : > { %1794 = vmatpush3.bf16.msra.mxu0 %v2506_v42  ;;  %v2609_v59 = vld [vmem:[%s3038_s1 + $0x88] sm:$0xff]   ;;  %v2633_v63 = vld [vmem:[%s3038_s1 + $0x80] sm:$0xff]   ;;  %v2664_v8 = vld [vmem:[%s3038_s1 + $0x170] sm:$0xff]  }
  0x37   : > { %1816 = vmatpush3.bf16.msra.mxu1 %v2512_v43  ;;  %1795 = vmatprep.subr.bf16.mxu0 %v2518_v44  ;;  %v2230_v0 = vld [vmem:[%s2636_s29] ss:$28 sps:$4 sm:$0xff]   ;;  %v2233_v2 = vld [vmem:[%s2636_s29 + $0x8] ss:$28 sps:$4 sm:$0xff]   ;;  %v2672_v9 = vld [vmem:[%s3038_s1 + $0x130] sm:$0xff]  }
  0x38   : > { %1817 = vmatprep.subr.bf16.mxu1 %v2524_v45  ;;  %v2232_v1 = vld [vmem:[%s2636_s29 + $0x4] ss:$28 sps:$4 sm:$0xff]   ;;  %v2235_v3 = vld [vmem:[%s2636_s29 + $0xc] ss:$28 sps:$4 sm:$0xff]   ;;  %v2679_v10 = vld [vmem:[%s3038_s1 + $0x1b0] sm:$0xff]  }
  0x39   : > { %791 = vmatprep.mubr.bf16.mxu0 %v2232_v1  ;;  %832 = vmatprep.mubr.bf16.mxu1 %v2235_v3  ;;  %v2684_v11 = vld [vmem:[%s3038_s1 + $0x168] sm:$0xff]   ;;  %v2703_v14 = vld [vmem:[%s3038_s1 + $0x160] sm:$0xff]   ;;  %v2721_v17 = vld [vmem:[%s3038_s1 + $0x158] sm:$0xff]  }
  0x3a   : > { %1796 = vmatpush3.bf16.msra.mxu0 %v2530_v46  ;;  %v2690_v12 = vld [vmem:[%s3038_s1 + $0x128] sm:$0xff]   ;;  %v2708_v15 = vld [vmem:[%s3038_s1 + $0x120] sm:$0xff]   ;;  %v2727_v18 = vld [vmem:[%s3038_s1 + $0x118] sm:$0xff]  }
  0x3b   : > { %1818 = vmatpush3.bf16.msra.mxu1 %v2536_v47  ;;  %1797 = vmatprep.subr.bf16.mxu0 %v2542_v48  ;;  %v2697_v13 = vld [vmem:[%s3038_s1 + $0x1a8] sm:$0xff]   ;;  %v2714_v16 = vld [vmem:[%s3038_s1 + $0x1a0] sm:$0xff]   ;;  %v2733_v19 = vld [vmem:[%s3038_s1 + $0x198] sm:$0xff]  }
  0x3c   : > { %1819 = vmatprep.subr.bf16.mxu1 %v2548_v49  ;;  %v2740_v20 = vld [vmem:[%s3038_s1 + $0x150] sm:$0xff]   ;;  %v2759_v23 = vld [vmem:[%s3038_s1 + $0x148] sm:$0xff]   ;;  %v2778_v26 = vld [vmem:[%s3038_s1 + $0x140] sm:$0xff]  }
  0x3d   : > { %v2746_v21 = vld [vmem:[%s3038_s1 + $0x110] sm:$0xff]   ;;  %v2765_v24 = vld [vmem:[%s3038_s1 + $0x108] sm:$0xff]   ;;  %v2786_v28 = vld [vmem:[%s3038_s1 + $0x100] sm:$0xff]  }
  0x3e   : > { %1798 = vmatpush3.bf16.msra.mxu0 %v2554_v50  ;;  %v2752_v22 = vld [vmem:[%s3038_s1 + $0x190] sm:$0xff]   ;;  %v2771_v25 = vld [vmem:[%s3038_s1 + $0x188] sm:$0xff]   ;;  %v2793_v29 = vld [vmem:[%s3038_s1 + $0x180] sm:$0xff]  }
  0x3f   : > { %1820 = vmatpush3.bf16.msra.mxu1 %v2560_v51  ;;  %1799 = vmatprep.subr.bf16.mxu0 %v2566_v52  ;;  %v2262_v27 = vld [vmem:[%s2636_s29 + $0x14] ss:$28 sps:$4 sm:$0xff]   ;;  %v2269_v1 = vld [vmem:[%s2636_s29 + $0x44] ss:$28 sps:$4 sm:$0xff]  }
  0x40   : > { %1821 = vmatprep.subr.bf16.mxu1 %v2572_v53  ;;  %v2260_v30 = vld [vmem:[%s2636_s29 + $0x10] ss:$28 sps:$4 sm:$0xff]   ;;  %v2263_v31 = vld [vmem:[%s2636_s29 + $0x18] ss:$28 sps:$4 sm:$0xff]   ;;  %v2267_v3 = vld [vmem:[%s2636_s29 + $0x40] ss:$28 sps:$4 sm:$0xff]  }
  0x42   : > { %1800 = vmatpush3.bf16.msra.mxu0 %v2578_v54 }
  0x43   : > { %1822 = vmatpush3.bf16.msra.mxu1 %v2585_v55  ;;  %1801 = vmatprep.subr.bf16.mxu0 %v2591_v56 }
  0x44   : > { %1823 = vmatprep.subr.bf16.mxu1 %v2597_v57 }
  0x46   : > { %1802 = vmatpush3.bf16.msra.mxu0 %v2603_v58 }
  0x47   : > { %1824 = vmatpush3.bf16.msra.mxu1 %v2609_v59  ;;  %1803 = vmatprep.subr.bf16.mxu0 %v2615_v60 }
  0x48   : > { %1825 = vmatprep.subr.bf16.mxu1 %v2621_v61 }
  0x4a   : > { %1804 = vmatpush3.bf16.msra.mxu0 %v2627_v62 }
  0x4b   : > { %1826 = vmatpush3.bf16.msra.mxu1 %v2633_v63  ;;  %1833 = vmatprep.subr.bf16.mxu0 %v2647_v5 }
  0x4c   : > { %2089 = vmatprep.subr.bf16.mxu1 %v2318_v4 }
  0x4d   : > { %792 = vmatmul.mubr.bf16.vlgmr.msra.gmra.mxu0 %v2230_v0  ;;  %v2266_v0 = vld [vmem:[%s2636_s29 + $0x3c] ss:$28 sps:$4 sm:$0xff]  }
  0x4e   : > { %833 = vmatmul.mubr.bf16.vlgmr.msra.gmra.mxu1 %v2233_v2  ;;  %1834 = vmatpush3.bf16.msra.mxu0 %v2652_v6  ;;  %v2264_v2 = vld [vmem:[%s2636_s29 + $0x38] ss:$28 sps:$4 sm:$0xff]  }
  0x4f   : > { %2105 = vmatprep.mubr.msk.bf16.mxu1 %vm2319_vm0, %v2318_v4  ;;  %2090 = vmatpush3.bf16.msra.mxu1 %v2658_v7 }
  0x50   : > { %1835 = vmatprep.subr.bf16.mxu0 %v2664_v8  ;;  %2091 = vmatprep.subr.bf16.mxu1 %v2318_v4 }
  0x51   : > { %873 = vmatprep.mubr.bf16.mxu0 %v2262_v27  ;;  %v2272_v27 = vld [vmem:[%s2636_s29 + $0x4c] ss:$28 sps:$4 sm:$0xff]  }
  0x52   : > { %1836 = vmatpush3.bf16.msra.mxu0 %v2672_v9 }
  0x53   : > { %2092 = vmatpush3.bf16.msra.mxu1 %v2679_v10  ;;  %1837 = vmatprep.subr.bf16.mxu0 %v2684_v11 }
  0x54   : > { %2093 = vmatprep.subr.bf16.mxu1 %v2318_v4 }
  0x56   : > { %1838 = vmatpush3.bf16.msra.mxu0 %v2690_v12 }
  0x57   : > { %2094 = vmatpush3.bf16.msra.mxu1 %v2697_v13  ;;  %1839 = vmatprep.subr.bf16.mxu0 %v2703_v14 }
  0x58   : > { %2095 = vmatprep.subr.bf16.mxu1 %v2318_v4 }
  0x5a   : > { %1840 = vmatpush3.bf16.msra.mxu0 %v2708_v15 }
  0x5b   : > { %2096 = vmatpush3.bf16.msra.mxu1 %v2714_v16  ;;  %1841 = vmatprep.subr.bf16.mxu0 %v2721_v17 }
  0x5c   : > { %2097 = vmatprep.subr.bf16.mxu1 %v2318_v4 }
  0x5e   : > { %1842 = vmatpush3.bf16.msra.mxu0 %v2727_v18 }
  0x5f   : > { %2098 = vmatpush3.bf16.msra.mxu1 %v2733_v19  ;;  %1843 = vmatprep.subr.bf16.mxu0 %v2740_v20 }
  0x60   : > { %2099 = vmatprep.subr.bf16.mxu1 %v2318_v4 }
  0x62   : > { %1844 = vmatpush3.bf16.msra.mxu0 %v2746_v21 }
  0x63   : > { %2100 = vmatpush3.bf16.msra.mxu1 %v2752_v22  ;;  %1845 = vmatprep.subr.bf16.mxu0 %v2759_v23 }
  0x64   : > { %2101 = vmatprep.subr.bf16.mxu1 %v2318_v4 }
  0x66   : > { %1846 = vmatpush3.bf16.msra.mxu0 %v2765_v24 }
  0x67   : > { %2102 = vmatpush3.bf16.msra.mxu1 %v2771_v25  ;;  %1847 = vmatprep.subr.bf16.mxu0 %v2778_v26 }
  0x68   : > { %2103 = vmatprep.subr.bf16.mxu1 %v2318_v4 }
  0x6a   : > { %1848 = vmatpush3.bf16.msra.mxu0 %v2786_v28 }
  0x6b   : > { %2104 = vmatpush3.bf16.msra.mxu1 %v2793_v29  ;;  %1864 = vmatprep.subr.bf16.mxu0 %v2447_v32 }
  0x6c   : > { %1886 = vmatprep.subr.bf16.mxu1 %v2452_v33 }
  0x6d   : > { %874 = vmatmul.mubr.bf16.vlgmr.msra.gmra.mxu0 %v2260_v30  ;;  %v2270_v30 = vld [vmem:[%s2636_s29 + $0x48] ss:$28 sps:$4 sm:$0xff]  }
  0x6e   : > { %2106 = vmatmul.mubr.bf16.vlgmr.msra.gmra.mxu1 %v2263_v31  ;;  %1865 = vmatpush3.bf16.msra.mxu0 %v2458_v34  ;;  %v2273_v31 = vld [vmem:[%s2636_s29 + $0x50] ss:$28 sps:$4 sm:$0xff]  }
  0x6f   : > { %1887 = vmatpush3.bf16.msra.mxu1 %v2464_v35  ;;  %1866 = vmatprep.subr.bf16.mxu0 %v2470_v36 }
  0x70   : > { %1888 = vmatprep.subr.bf16.mxu1 %v2476_v37  ;;  %1000 = vmatprep.mubr.bf16.mxu0 %v2266_v0  ;;  %v2276_v0 = vld [vmem:[%s2636_s29 + $0x74] ss:$28 sps:$4 sm:$0xff]  }
  0x71   : > { %1041 = vmatprep.mubr.bf16.mxu1 %v2269_v1  ;;  %v2279_v1 = vld [vmem:[%s2636_s29 + $0x7c] ss:$28 sps:$4 sm:$0xff]  }
  0x72   : > { %1867 = vmatpush3.bf16.msra.mxu0 %v2482_v38 }
  0x73   : > { %1889 = vmatpush3.bf16.msra.mxu1 %v2488_v39  ;;  %1868 = vmatprep.subr.bf16.mxu0 %v2494_v40 }
  0x74   : > { %1890 = vmatprep.subr.bf16.mxu1 %v2500_v41 }
  0x76   : > { %1869 = vmatpush3.bf16.msra.mxu0 %v2506_v42 }
  0x77   : > { %1891 = vmatpush3.bf16.msra.mxu1 %v2512_v43  ;;  %1870 = vmatprep.subr.bf16.mxu0 %v2518_v44 }
  0x78   : > { %1892 = vmatprep.subr.bf16.mxu1 %v2524_v45 }
  0x7a   : > { %1871 = vmatpush3.bf16.msra.mxu0 %v2530_v46 }
  0x7b   : > { %1893 = vmatpush3.bf16.msra.mxu1 %v2536_v47  ;;  %1872 = vmatprep.subr.bf16.mxu0 %v2542_v48 }
  0x7c   : > { %1894 = vmatprep.subr.bf16.mxu1 %v2548_v49 }
  0x7e   : > { %1873 = vmatpush3.bf16.msra.mxu0 %v2554_v50 }
  0x7f   : > { %1895 = vmatpush3.bf16.msra.mxu1 %v2560_v51  ;;  %1874 = vmatprep.subr.bf16.mxu0 %v2566_v52 }
  0x80   : > { %1896 = vmatprep.subr.bf16.mxu1 %v2572_v53 }
  0x82   : > { %1875 = vmatpush3.bf16.msra.mxu0 %v2578_v54 }
  0x83   : > { %1897 = vmatpush3.bf16.msra.mxu1 %v2585_v55  ;;  %1876 = vmatprep.subr.bf16.mxu0 %v2591_v56 }
  0x84   : > { %1898 = vmatprep.subr.bf16.mxu1 %v2597_v57 }
  0x86   : > { %1877 = vmatpush3.bf16.msra.mxu0 %v2603_v58 }
  0x87   : > { %1899 = vmatpush3.bf16.msra.mxu1 %v2609_v59  ;;  %1878 = vmatprep.subr.bf16.mxu0 %v2615_v60 }
  0x88   : > { %1900 = vmatprep.subr.bf16.mxu1 %v2621_v61 }
  0x8a   : > { %1879 = vmatpush3.bf16.msra.mxu0 %v2627_v62 }
  0x8b   : > { %1901 = vmatpush3.bf16.msra.mxu1 %v2633_v63  ;;  %1908 = vmatprep.subr.bf16.mxu0 %v2647_v5 }
  0x8c   : > { %2109 = vmatprep.subr.bf16.mxu1 %v2318_v4 }
  0x8d   : > { %1001 = vmatmul.mubr.bf16.vlgmr.msra.gmra.mxu0 %v2264_v2  ;;  %v2274_v2 = vld [vmem:[%s2636_s29 + $0x70] ss:$28 sps:$4 sm:$0xff]  }
  0x8e   : > { %1042 = vmatmul.mubr.bf16.vlgmr.msra.gmra.mxu1 %v2267_v3  ;;  %1909 = vmatpush3.bf16.msra.mxu0 %v2652_v6  ;;  %v2277_v3 = vld [vmem:[%s2636_s29 + $0x78] ss:$28 sps:$4 sm:$0xff]  }
  0x8f   : > { %2110 = vmatpush3.bf16.msra.mxu1 %v2658_v7  ;;  %1910 = vmatprep.subr.bf16.mxu0 %v2664_v8 }
  0x90   : > { %2111 = vmatprep.subr.bf16.mxu1 %v2318_v4  ;;  %1082 = vmatprep.mubr.bf16.mxu0 %v2272_v27  ;;  %v2282_v27 = vld [vmem:[%s2636_s29 + $0x84] ss:$28 sps:$4 sm:$0xff]  }
  0x91   : > { %2125 = vmatprep.mubr.msk.bf16.mxu1 %vm2319_vm0, %v2318_v4 }
  0x92   : > { %1911 = vmatpush3.bf16.msra.mxu0 %v2672_v9 }
  0x93   : > { %2112 = vmatpush3.bf16.msra.mxu1 %v2679_v10  ;;  %1912 = vmatprep.subr.bf16.mxu0 %v2684_v11 }
  0x94   : > { %2113 = vmatprep.subr.bf16.mxu1 %v2318_v4 }
  0x96   : > { %1913 = vmatpush3.bf16.msra.mxu0 %v2690_v12 }
  0x97   : > { %2114 = vmatpush3.bf16.msra.mxu1 %v2697_v13  ;;  %1914 = vmatprep.subr.bf16.mxu0 %v2703_v14 }
  0x98   : > { %2115 = vmatprep.subr.bf16.mxu1 %v2318_v4 }
  0x9a   : > { %1915 = vmatpush3.bf16.msra.mxu0 %v2708_v15 }
  0x9b   : > { %2116 = vmatpush3.bf16.msra.mxu1 %v2714_v16  ;;  %1916 = vmatprep.subr.bf16.mxu0 %v2721_v17 }
  0x9c   : > { %2117 = vmatprep.subr.bf16.mxu1 %v2318_v4 }
  0x9e   : > { %1917 = vmatpush3.bf16.msra.mxu0 %v2727_v18 }
  0x9f   : > { %2118 = vmatpush3.bf16.msra.mxu1 %v2733_v19  ;;  %1918 = vmatprep.subr.bf16.mxu0 %v2740_v20 }
  0xa0   : > { %2119 = vmatprep.subr.bf16.mxu1 %v2318_v4 }
  0xa2   : > { %1919 = vmatpush3.bf16.msra.mxu0 %v2746_v21 }
  0xa3   : > { %2120 = vmatpush3.bf16.msra.mxu1 %v2752_v22  ;;  %1920 = vmatprep.subr.bf16.mxu0 %v2759_v23 }
  0xa4   : > { %2121 = vmatprep.subr.bf16.mxu1 %v2318_v4 }
  0xa6   : > { %1921 = vmatpush3.bf16.msra.mxu0 %v2765_v24 }
  0xa7   : > { %2122 = vmatpush3.bf16.msra.mxu1 %v2771_v25  ;;  %1922 = vmatprep.subr.bf16.mxu0 %v2778_v26 }
  0xa8   : > { %2123 = vmatprep.subr.bf16.mxu1 %v2318_v4 }
  0xaa   : > { %1923 = vmatpush3.bf16.msra.mxu0 %v2786_v28 }
  0xab   : > { %2124 = vmatpush3.bf16.msra.mxu1 %v2793_v29  ;;  %1939 = vmatprep.subr.bf16.mxu0 %v2447_v32 }
  0xac   : > { %1961 = vmatprep.subr.bf16.mxu1 %v2452_v33 }
  0xad   : > { %1083 = vmatmul.mubr.bf16.vlgmr.msra.gmra.mxu0 %v2270_v30  ;;  %v2280_v30 = vld [vmem:[%s2636_s29 + $0x80] ss:$28 sps:$4 sm:$0xff]  }
  0xae   : > { %2126 = vmatmul.mubr.bf16.vlgmr.msra.gmra.mxu1 %v2273_v31  ;;  %1940 = vmatpush3.bf16.msra.mxu0 %v2458_v34  ;;  %v2283_v31 = vld [vmem:[%s2636_s29 + $0x88] ss:$28 sps:$4 sm:$0xff]  }
  0xaf   : > { %1962 = vmatpush3.bf16.msra.mxu1 %v2464_v35  ;;  %1941 = vmatprep.subr.bf16.mxu0 %v2470_v36 }
  0xb0   : > { %1963 = vmatprep.subr.bf16.mxu1 %v2476_v37  ;;  %1211 = vmatprep.mubr.bf16.mxu0 %v2276_v0  ;;  %v2286_v0 = vld [vmem:[%s2636_s29 + $0xac] ss:$28 sps:$4 sm:$0xff]  }
  0xb1   : > { %1252 = vmatprep.mubr.bf16.mxu1 %v2279_v1  ;;  %v2289_v1 = vld [vmem:[%s2636_s29 + $0xb4] ss:$28 sps:$4 sm:$0xff]  }
  0xb2   : > { %1942 = vmatpush3.bf16.msra.mxu0 %v2482_v38 }
  0xb3   : > { %1964 = vmatpush3.bf16.msra.mxu1 %v2488_v39  ;;  %1943 = vmatprep.subr.bf16.mxu0 %v2494_v40 }
  0xb4   : > { %1965 = vmatprep.subr.bf16.mxu1 %v2500_v41 }
  0xb6   : > { %1944 = vmatpush3.bf16.msra.mxu0 %v2506_v42 }
  0xb7   : > { %1966 = vmatpush3.bf16.msra.mxu1 %v2512_v43  ;;  %1945 = vmatprep.subr.bf16.mxu0 %v2518_v44 }
  0xb8   : > { %1967 = vmatprep.subr.bf16.mxu1 %v2524_v45 }
  0xba   : > { %1946 = vmatpush3.bf16.msra.mxu0 %v2530_v46 }
  0xbb   : > { %1968 = vmatpush3.bf16.msra.mxu1 %v2536_v47  ;;  %1947 = vmatprep.subr.bf16.mxu0 %v2542_v48 }
  0xbc   : > { %1969 = vmatprep.subr.bf16.mxu1 %v2548_v49 }
  0xbe   : > { %1948 = vmatpush3.bf16.msra.mxu0 %v2554_v50 }
  0xbf   : > { %1970 = vmatpush3.bf16.msra.mxu1 %v2560_v51  ;;  %1949 = vmatprep.subr.bf16.mxu0 %v2566_v52 }
  0xc0   : > { %1971 = vmatprep.subr.bf16.mxu1 %v2572_v53 }
  0xc2   : > { %1950 = vmatpush3.bf16.msra.mxu0 %v2578_v54 }
  0xc3   : > { %1972 = vmatpush3.bf16.msra.mxu1 %v2585_v55  ;;  %1951 = vmatprep.subr.bf16.mxu0 %v2591_v56 }
  0xc4   : > { %1973 = vmatprep.subr.bf16.mxu1 %v2597_v57 }
  0xc6   : > { %1952 = vmatpush3.bf16.msra.mxu0 %v2603_v58 }
  0xc7   : > { %1974 = vmatpush3.bf16.msra.mxu1 %v2609_v59  ;;  %1953 = vmatprep.subr.bf16.mxu0 %v2615_v60 }
  0xc8   : > { %1975 = vmatprep.subr.bf16.mxu1 %v2621_v61 }
  0xca   : > { %1954 = vmatpush3.bf16.msra.mxu0 %v2627_v62 }
  0xcb   : > { %1976 = vmatpush3.bf16.msra.mxu1 %v2633_v63  ;;  %1983 = vmatprep.subr.bf16.mxu0 %v2647_v5 }
  0xcc   : > { %2129 = vmatprep.subr.bf16.mxu1 %v2318_v4 }
  0xcd   : > { %1212 = vmatmul.mubr.bf16.vlgmr.msra.gmra.mxu0 %v2274_v2 }
  0xce   : > { %1253 = vmatmul.mubr.bf16.vlgmr.msra.gmra.mxu1 %v2277_v3  ;;  %1984 = vmatpush3.bf16.msra.mxu0 %v2652_v6 }
  0xcf   : > { %2130 = vmatpush3.bf16.msra.mxu1 %v2658_v7  ;;  %1985 = vmatprep.subr.bf16.mxu0 %v2664_v8 }
  0xd0   : > { %2131 = vmatprep.subr.bf16.mxu1 %v2318_v4  ;;  %1293 = vmatprep.mubr.bf16.mxu0 %v2282_v27 }
  0xd1   : > { %2145 = vmatprep.mubr.msk.bf16.mxu1 %vm2319_vm0, %v2318_v4 }
  0xd2   : > { %1986 = vmatpush3.bf16.msra.mxu0 %v2672_v9 }
  0xd3   : > { %2132 = vmatpush3.bf16.msra.mxu1 %v2679_v10  ;;  %1987 = vmatprep.subr.bf16.mxu0 %v2684_v11 }
  0xd4   : > { %2133 = vmatprep.subr.bf16.mxu1 %v2318_v4 }
  0xd6   : > { %1988 = vmatpush3.bf16.msra.mxu0 %v2690_v12 }
  0xd7   : > { %2134 = vmatpush3.bf16.msra.mxu1 %v2697_v13  ;;  %1989 = vmatprep.subr.bf16.mxu0 %v2703_v14 }
  0xd8   : > { %2135 = vmatprep.subr.bf16.mxu1 %v2318_v4 }
  0xda   : > { %1990 = vmatpush3.bf16.msra.mxu0 %v2708_v15 }
  0xdb   : > { %2136 = vmatpush3.bf16.msra.mxu1 %v2714_v16  ;;  %1991 = vmatprep.subr.bf16.mxu0 %v2721_v17 }
  0xdc   : > { %2137 = vmatprep.subr.bf16.mxu1 %v2318_v4 }
  0xde   : > { %1992 = vmatpush3.bf16.msra.mxu0 %v2727_v18 }
  0xdf   : > { %2138 = vmatpush3.bf16.msra.mxu1 %v2733_v19  ;;  %1993 = vmatprep.subr.bf16.mxu0 %v2740_v20 }
  0xe0   : > { %2139 = vmatprep.subr.bf16.mxu1 %v2318_v4 }
  0xe2   : > { %1994 = vmatpush3.bf16.msra.mxu0 %v2746_v21 }
  0xe3   : > { %2140 = vmatpush3.bf16.msra.mxu1 %v2752_v22  ;;  %1995 = vmatprep.subr.bf16.mxu0 %v2759_v23 }
  0xe4   : > { %2141 = vmatprep.subr.bf16.mxu1 %v2318_v4 }
  0xe6   : > { %1996 = vmatpush3.bf16.msra.mxu0 %v2765_v24 }
  0xe7   : > { %2142 = vmatpush3.bf16.msra.mxu1 %v2771_v25  ;;  %1997 = vmatprep.subr.bf16.mxu0 %v2778_v26 }
  0xe8   : > { %2143 = vmatprep.subr.bf16.mxu1 %v2318_v4 }
  0xea   : > { %1998 = vmatpush3.bf16.msra.mxu0 %v2786_v28 }
  0xeb   : > { %2144 = vmatpush3.bf16.msra.mxu1 %v2793_v29  ;;  %2014 = vmatprep.subr.bf16.mxu0 %v2447_v32  ;;  %v2284_v32 = vld [vmem:[%s2636_s29 + $0xa8] ss:$28 sps:$4 sm:$0xff]  }
  0xec   : > { %2036 = vmatprep.subr.bf16.mxu1 %v2452_v33  ;;  %v2287_v33 = vld [vmem:[%s2636_s29 + $0xb0] ss:$28 sps:$4 sm:$0xff]  }
  0xed   : > { %1294 = vmatmul.mubr.bf16.vlgmr.msra.gmra.mxu0 %v2280_v30 }
  0xee   : > { %2146 = vmatmul.mubr.bf16.vlgmr.msra.gmra.mxu1 %v2283_v31  ;;  %2015 = vmatpush3.bf16.msra.mxu0 %v2458_v34  ;;  %v2292_v34 = vld [vmem:[%s2636_s29 + $0xbc] ss:$28 sps:$4 sm:$0xff]  }
  0xef   : > { %2037 = vmatpush3.bf16.msra.mxu1 %v2464_v35  ;;  %2016 = vmatprep.subr.bf16.mxu0 %v2470_v36 }
  0xf0   : > { %2038 = vmatprep.subr.bf16.mxu1 %v2476_v37  ;;  %1422 = vmatprep.mubr.bf16.mxu0 %v2286_v0 }
  0xf1   : > { %1463 = vmatprep.mubr.bf16.mxu1 %v2289_v1 }
  0xf2   : > { %2017 = vmatpush3.bf16.msra.mxu0 %v2482_v38 }
  0xf3   : > { %2039 = vmatpush3.bf16.msra.mxu1 %v2488_v39  ;;  %2018 = vmatprep.subr.bf16.mxu0 %v2494_v40 }
  0xf4   : > { %2040 = vmatprep.subr.bf16.mxu1 %v2500_v41 }
  0xf6   : > { %2019 = vmatpush3.bf16.msra.mxu0 %v2506_v42 }
  0xf7   : > { %2041 = vmatpush3.bf16.msra.mxu1 %v2512_v43  ;;  %2020 = vmatprep.subr.bf16.mxu0 %v2518_v44  ;;  %v2290_v44 = vld [vmem:[%s2636_s29 + $0xb8] ss:$28 sps:$4 sm:$0xff]  }
  0xf8   : > { %2042 = vmatprep.subr.bf16.mxu1 %v2524_v45  ;;  %v2293_v45 = vld [vmem:[%s2636_s29 + $0xc0] ss:$28 sps:$4 sm:$0xff]   ;;  %s1667_s29 = sshll.u32 %s1643_s15, 1 }
  0xf9   : > { %p261_p8 = scmp.lt.s32.totalorder %s1667_s29, 3 }
  0xfa   : > { %2021 = vmatpush3.bf16.msra.mxu0 %v2530_v46 }
  0xfb   : > { %2043 = vmatpush3.bf16.msra.mxu1 %v2536_v47  ;;  %2022 = vmatprep.subr.bf16.mxu0 %v2542_v48  ;;  %s3045_s29 = smov (!%p261_p8, %s1667_s29), 3 }
  0xfc   : > { %2044 = vmatprep.subr.bf16.mxu1 %v2548_v49  ;;  %s1668_s14 = sshll.u32 %s3045_s29, 2 }
  0xfd   : > { %s264_s11 = scalar_lea.vmem %s3040_s3, %s1668_s14 }
  0xfe   : > { %2023 = vmatpush3.bf16.msra.mxu0 %v2554_v50 }
  0xff   : > { %2045 = vmatpush3.bf16.msra.mxu1 %v2560_v51  ;;  %2024 = vmatprep.subr.bf16.mxu0 %v2566_v52 }
 0x100   : > { %2046 = vmatprep.subr.bf16.mxu1 %v2572_v53 }
 0x102   : > { %2025 = vmatpush3.bf16.msra.mxu0 %v2578_v54 }
 0x103   : > { %2047 = vmatpush3.bf16.msra.mxu1 %v2585_v55  ;;  %2026 = vmatprep.subr.bf16.mxu0 %v2591_v56 }
 0x104   : > { %2048 = vmatprep.subr.bf16.mxu1 %v2597_v57 }
 0x106   : > { %2027 = vmatpush3.bf16.msra.mxu0 %v2603_v58 }
 0x107   : > { %2049 = vmatpush3.bf16.msra.mxu1 %v2609_v59  ;;  %2028 = vmatprep.subr.bf16.mxu0 %v2615_v60 }
 0x108   : > { %2050 = vmatprep.subr.bf16.mxu1 %v2621_v61 }
 0x10a   : > { %2029 = vmatpush3.bf16.msra.mxu0 %v2627_v62 }
 0x10b   : > { %2051 = vmatpush3.bf16.msra.mxu1 %v2633_v63  ;;  %2058 = vmatprep.subr.bf16.mxu0 %v2647_v5 }
 0x10c   : > { %2149 = vmatprep.subr.bf16.mxu1 %v2318_v4 }
 0x10d   : > { %1423 = vmatmul.mubr.bf16.vlgmr.msra.gmra.mxu0 %v2284_v32  ;;  %v1805_v41 = vpop.f32.mrf.mxu0 }
 0x10e   : > { %v1827_v35 = vpop.f32.mrf.mxu1  ;;  %1464 = vmatmul.mubr.bf16.vlgmr.msra.gmra.mxu1 %v2287_v33  ;;  %2059 = vmatpush3.bf16.msra.mxu0 %v2652_v6 }
 0x10f   : > { %2150 = vmatpush3.bf16.msra.mxu1 %v2658_v7  ;;  %2060 = vmatprep.subr.bf16.mxu0 %v2664_v8  ;;  %v1806_v42 = vpop.f32.mrf.mxu0 }
 0x110   : > { %v1828_v36 = vpop.f32.mrf.mxu1  ;;  %2151 = vmatprep.subr.bf16.mxu1 %v2318_v4  ;;  %1504 = vmatprep.mubr.bf16.mxu0 %v2292_v34  ;;  %v1807_v47 = vadd.f32 %v1806_v42, %v1805_v41 }
 0x111   : > { %v1829_v37 = vadd.f32 %v1828_v36, %v1827_v35  ;;  %2165 = vmatprep.mubr.msk.bf16.mxu1 %vm2319_vm0, %v2318_v4  ;;  %v1808_v43 = vpop.f32.mrf.mxu0 }
 0x112   : > { %v1830_v38 = vpop.f32.mrf.mxu1  ;;  %2061 = vmatpush3.bf16.msra.mxu0 %v2672_v9 }
 0x113   : > { %2152 = vmatpush3.bf16.msra.mxu1 %v2679_v10  ;;  %2062 = vmatprep.subr.bf16.mxu0 %v2684_v11  ;;  %v1809_v46 = vpop.f32.mrf.mxu0  ;;  %v835_v51 = vadd.f32 %v1829_v37, %v1807_v47 }
 0x114   : > { %v1831_v39 = vpop.f32.mrf.mxu1  ;;  %2153 = vmatprep.subr.bf16.mxu1 %v2318_v4  ;;  %v1810_v52 = vadd.f32 %v1809_v46, %v1808_v43 }
 0x115   : > { %v1832_v40 = vadd.f32 %v1831_v39, %v1830_v38 }
 0x116   : > { %2063 = vmatpush3.bf16.msra.mxu0 %v2690_v12 }
 0x117   : > { %2154 = vmatpush3.bf16.msra.mxu1 %v2697_v13  ;;  %2064 = vmatprep.subr.bf16.mxu0 %v2703_v14  ;;  %v838_v59 = vadd.f32 %v1832_v40, %v1810_v52 }
 0x118   : > { %2155 = vmatprep.subr.bf16.mxu1 %v2318_v4 }
 0x11a   : > { %2065 = vmatpush3.bf16.msra.mxu0 %v2708_v15 }
 0x11b   : > { %2156 = vmatpush3.bf16.msra.mxu1 %v2714_v16  ;;  %2066 = vmatprep.subr.bf16.mxu0 %v2721_v17 }
 0x11c   : > { %2157 = vmatprep.subr.bf16.mxu1 %v2318_v4 }
 0x11e   : > { %2067 = vmatpush3.bf16.msra.mxu0 %v2727_v18 }
 0x11f   : > { %2158 = vmatpush3.bf16.msra.mxu1 %v2733_v19  ;;  %2068 = vmatprep.subr.bf16.mxu0 %v2740_v20 }
 0x120   : > { %2159 = vmatprep.subr.bf16.mxu1 %v2318_v4 }
 0x122   : > { %2069 = vmatpush3.bf16.msra.mxu0 %v2746_v21 }
 0x123   : > { %2160 = vmatpush3.bf16.msra.mxu1 %v2752_v22  ;;  %2070 = vmatprep.subr.bf16.mxu0 %v2759_v23 }
 0x124   : > { %2161 = vmatprep.subr.bf16.mxu1 %v2318_v4 }
 0x126   : > { %2071 = vmatpush3.bf16.msra.mxu0 %v2765_v24 }
 0x127   : > { %2162 = vmatpush3.bf16.msra.mxu1 %v2771_v25  ;;  %2072 = vmatprep.subr.bf16.mxu0 %v2778_v26 }
 0x128   : > { %2163 = vmatprep.subr.bf16.mxu1 %v2318_v4 }
 0x12a   : > { %2073 = vmatpush3.bf16.msra.mxu0 %v2786_v28 }
 0x12b   : > { %2164 = vmatpush3.bf16.msra.mxu1 %v2793_v29 }
 0x12d   : > { %v1849_v48 = vpop.f32.mrf.mxu0  ;;  %1505 = vmatmul.mubr.bf16.vlgmr.msra.gmra.mxu0 %v2290_v44 }
 0x12e   : > { %2166 = vmatmul.mubr.bf16.vlgmr.msra.gmra.mxu1 %v2293_v45  ;;  %v916_v49 = vpop.f32.mrf.mxu1 }
 0x12f   : > { %v1850_v50 = vpop.f32.mrf.mxu0 }
 0x130   : > { %v1851_v53 = vadd.f32 %v1850_v50, %v1849_v48  ;;  %v2107_v54 = vpop.f32.mrf.mxu1 }
 0x131   : > { %v1852_v55 = vpop.f32.mrf.mxu0 }
 0x132   : > { %v876_v56 = vadd.f32 %v1851_v53, %v835_v51  ;;  %v919_v57 = vpop.f32.mrf.mxu1 }
 0x133   : > { %v1853_v58 = vpop.f32.mrf.mxu0 }
 0x134   : > { %v917_v60 = vadd.f32 %v916_v49, %v876_v56  ;;  %v1854_v61 = vadd.f32 %v1853_v58, %v1852_v55  ;;  %v2108_v62 = vpop.f32.mrf.mxu1 }
 0x136   : > { %v879_v63 = vadd.f32 %v1854_v61, %v838_v59 }
 0x138   : > { %v920_v4 = vadd.f32 %v919_v57, %v879_v63 }
 0x14d   : > { %v1880_v11 = vpop.f32.mrf.mxu0 }
 0x14e   : > { %v1902_v5 = vpop.f32.mrf.mxu1 }
 0x14f   : > { %v1881_v12 = vpop.f32.mrf.mxu0 }
 0x150   : > { %v1903_v6 = vpop.f32.mrf.mxu1  ;;  %v1882_v15 = vadd.f32 %v1881_v12, %v1880_v11 }
 0x151   : > { %v1904_v7 = vadd.f32 %v1903_v6, %v1902_v5  ;;  %v1883_v13 = vpop.f32.mrf.mxu0 }
 0x152   : > { %v1905_v8 = vpop.f32.mrf.mxu1 }
 0x153   : > { %v1884_v14 = vpop.f32.mrf.mxu0  ;;  %v1044_v19 = vadd.f32 %v1904_v7, %v1882_v15 }
 0x154   : > { %v1906_v9 = vpop.f32.mrf.mxu1  ;;  %v1885_v20 = vadd.f32 %v1884_v14, %v1883_v13 }
 0x155   : > { %v1907_v10 = vadd.f32 %v1906_v9, %v1905_v8 }
 0x157   : > { %v1047_v28 = vadd.f32 %v1907_v10, %v1885_v20 }
 0x16d   : > { %v1924_v16 = vpop.f32.mrf.mxu0 }
 0x16e   : > { %v1125_v17 = vpop.f32.mrf.mxu1 }
 0x16f   : > { %v1925_v18 = vpop.f32.mrf.mxu0 }
 0x170   : > { %v1926_v21 = vadd.f32 %v1925_v18, %v1924_v16  ;;  %v2127_v22 = vpop.f32.mrf.mxu1 }
 0x171   : > { %v1927_v23 = vpop.f32.mrf.mxu0 }
 0x172   : > { %v1085_v24 = vadd.f32 %v1926_v21, %v1044_v19  ;;  %v1128_v25 = vpop.f32.mrf.mxu1 }
 0x173   : > { %v1928_v26 = vpop.f32.mrf.mxu0 }
 0x174   : > { %v1126_v29 = vadd.f32 %v1125_v17, %v1085_v24  ;;  %v1929_v2 = vadd.f32 %v1928_v26, %v1927_v23  ;;  %v2128_v3 = vpop.f32.mrf.mxu1 }
 0x176   : > { %v1132_v27 = vmax.f32 %v917_v60, %v1126_v29  ;;  %v1088_v30 = vadd.f32 %v1929_v2, %v1047_v28  ;;  %v1777_v2 = vld [vmem:[%s3039_s2] ss:$0 sm:$0xff] }
 0x178   : > { %v1129_v31 = vadd.f32 %v1128_v25, %v1088_v30 }
 0x17a   : > { %v1133_v0 = vmax.f32 %v920_v4, %v1129_v31 }
 0x18d   : > { %v1955_v37 = vpop.f32.mrf.mxu0 }
 0x18e   : > { %v1977_v1 = vpop.f32.mrf.mxu1 }
 0x18f   : > { %v1956_v38 = vpop.f32.mrf.mxu0 }
 0x190   : > { %v1978_v32 = vpop.f32.mrf.mxu1  ;;  %v1957_v41 = vadd.f32 %v1956_v38, %v1955_v37 }
 0x191   : > { %v1979_v33 = vadd.f32 %v1978_v32, %v1977_v1  ;;  %v1958_v39 = vpop.f32.mrf.mxu0 }
 0x192   : > { %v1980_v34 = vpop.f32.mrf.mxu1 }
 0x193   : > { %v1959_v40 = vpop.f32.mrf.mxu0  ;;  %v1255_v45 = vadd.f32 %v1979_v33, %v1957_v41 }
 0x194   : > { %v1981_v35 = vpop.f32.mrf.mxu1  ;;  %v1960_v46 = vadd.f32 %v1959_v40, %v1958_v39 }
 0x195   : > { %v1982_v36 = vadd.f32 %v1981_v35, %v1980_v34 }
 0x197   : > { %v1258_v53 = vadd.f32 %v1982_v36, %v1960_v46 }
 0x1ad   : > { %v1999_v42 = vpop.f32.mrf.mxu0 }
 0x1ae   : > { %v1336_v43 = vpop.f32.mrf.mxu1 }
 0x1af   : > { %v2000_v44 = vpop.f32.mrf.mxu0 }
 0x1b0   : > { %v2001_v47 = vadd.f32 %v2000_v44, %v1999_v42  ;;  %v2147_v48 = vpop.f32.mrf.mxu1 }
 0x1b1   : > { %v2002_v49 = vpop.f32.mrf.mxu0 }
 0x1b2   : > { %v1296_v50 = vadd.f32 %v2001_v47, %v1255_v45  ;;  %v1339_v51 = vpop.f32.mrf.mxu1 }
 0x1b3   : > { %v2003_v52 = vpop.f32.mrf.mxu0 }
 0x1b4   : > { %v1337_v54 = vadd.f32 %v1336_v43, %v1296_v50  ;;  %v2004_v55 = vadd.f32 %v2003_v52, %v2002_v49  ;;  %v2148_v56 = vpop.f32.mrf.mxu1 }
 0x1b6   : > { %v1343_v57 = vmax.f32 %v1132_v27, %v1337_v54  ;;  %v1299_v58 = vadd.f32 %v2004_v55, %v1258_v53 }
 0x1b8   : > { %v1340_v59 = vadd.f32 %v1339_v51, %v1299_v58 }
 0x1ba   : > { %v1344_v60 = vmax.f32 %v1133_v0, %v1340_v59 }
 0x1cd   : > { %v2030_v61 = vpop.f32.mrf.mxu0 }
 0x1ce   : > { %v2052_v62 = vpop.f32.mrf.mxu1 }
 0x1cf   : > { %v2031_v63 = vpop.f32.mrf.mxu0 }
 0x1d0   : > { %v2053_v4 = vpop.f32.mrf.mxu1  ;;  %v2032_v8 = vadd.f32 %v2031_v63, %v2030_v61 }
 0x1d1   : > { %v2033_v5 = vpop.f32.mrf.mxu0  ;;  %v2054_v9 = vadd.f32 %v2053_v4, %v2052_v62 }
 0x1d2   : > { %v2055_v6 = vpop.f32.mrf.mxu1 }
 0x1d3   : > { %v2034_v7 = vpop.f32.mrf.mxu0  ;;  %v1466_v14 = vadd.f32 %v2054_v9, %v2032_v8 }
 0x1d4   : > { %v2056_v10 = vpop.f32.mrf.mxu1  ;;  %v2035_v15 = vadd.f32 %v2034_v7, %v2033_v5 }
 0x1d5   : > { %v2057_v16 = vadd.f32 %v2056_v10, %v2055_v6 }
 0x1d7   : > { %v1469_v23 = vadd.f32 %v2057_v16, %v2035_v15 }
 0x1ed   : > { %v2074_v11 = vpop.f32.mrf.mxu0 }
 0x1ee   : > { %v1547_v12 = vpop.f32.mrf.mxu1 }
 0x1ef   : > { %v2075_v13 = vpop.f32.mrf.mxu0 }
 0x1f0   : > { %v2076_v17 = vadd.f32 %v2075_v13, %v2074_v11  ;;  %v2167_v18 = vpop.f32.mrf.mxu1 }
 0x1f1   : > { %v2077_v19 = vpop.f32.mrf.mxu0 }
 0x1f2   : > { %v1507_v20 = vadd.f32 %v2076_v17, %v1466_v14  ;;  %v1550_v21 = vpop.f32.mrf.mxu1 }
 0x1f3   : > { %v2078_v22 = vpop.f32.mrf.mxu0 }
 0x1f4   : > { %v1548_v24 = vadd.f32 %v1547_v12, %v1507_v20  ;;  %v2079_v25 = vadd.f32 %v2078_v22, %v2077_v19  ;;  %v2168_v26 = vpop.f32.mrf.mxu1 }
 0x1f6   : > { %v1554_v28 = vmax.f32 %v1343_v57, %v1548_v24  ;;  %v1510_v29 = vadd.f32 %v2079_v25, %v1469_v23 }
 0x1f8   : > { %v1551_v3 = vadd.f32 %v1550_v21, %v1510_v29  ;;  %v1563_v27 = vadd.f32 %v1777_v2, %v1554_v28 }
 0x1fa   : > { %v1555_v30 = vmax.f32 %v1344_v60, %v1551_v3  ;;  %v1565_v0 = vmax.f32 %v1563_v27, 0.0 }
 0x1fc   : > { %v1564_v31 = vadd.f32 %v1777_v2, %v1555_v30 }
 0x1fe   : > { %v1566_v1 = vmax.f32 %v1564_v31, 0.0 }
 0x200   : > { %v1787_v32 = vpack.c.bf16 %v1566_v1, %v1565_v0 }
 0x202   : > { %1788 = vst [vmem:[%s264_s11] sm:$0xff] %v1787_v32  }
 0x203 PF: > { %p10_p9 = scmp.ge.s32.totalorder %s2357_s16, 4   ;;  %s3041_s12 = smov %s2312_s13 }
 0x204   : > { %s3042_s13 = smov %s2366_s19  ;;  %s3043_s14 = smov %s2357_s16 }
 0x205   :  { %12 = sbr.rel (!%p10_p9) target bundleno = 2 (0x2), region = 102 }

// kernel: network_forward.7
= control target key start
LH: loop header
LB: loop body
LE: loop exit
PB: predicated region body
PF: predicated region fallthrough
CT: control target
= control target key end

     0   :  { %v287_v28 = vlaneseq  ;;  %v1980_v36 = vmov 1966171168   ;;  %s2424_s0 = inlined_call_operand.vmem [shape: bf16[2,2048], index: 0, kind: input, shape index: {}]   ;;  %s2425_s1 = inlined_call_operand.vmem [shape: bf16[2048,128], index: 1, kind: input, shape index: {}]   ;;  %s2426_s2 = inlined_call_operand.vmem [shape: f32[1,128], index: 2, kind: input, shape index: {}]   ;;  %s2427_s3 = inlined_call_operand.hbm [shape: f32[2,128], index: 3, kind: output, shape index: {}]  }
   0x1   :  { %v1824_v0 = vld [vmem:[%s2425_s1 + $0x78] sm:$0xff]   ;;  %v1828_v4 = vld [vmem:[%s2425_s1 + $0x70] sm:$0xff]   ;;  %v1832_v8 = vld [vmem:[%s2425_s1 + $0x68] sm:$0xff]   ;;  %v285_v37 = vunpack.c.l.s4 %v1980_v36 }
   0x2   :  { %v1825_v1 = vld [vmem:[%s2425_s1 + $0xf8] sm:$0xff]   ;;  %1646 = vmatprep.subr.bf16.mxu0 %v1824_v0  ;;  %v1829_v5 = vld [vmem:[%s2425_s1 + $0xf0] sm:$0xff]   ;;  %v1833_v9 = vld [vmem:[%s2425_s1 + $0xe8] sm:$0xff]   ;;  %v288_v33 = vshrl.u32 %v287_v28, 7 }
   0x3   :  { %v1826_v2 = vld [vmem:[%s2425_s1 + $0x38] sm:$0xff]   ;;  %1668 = vmatprep.subr.bf16.mxu1 %v1825_v1  ;;  %v1830_v6 = vld [vmem:[%s2425_s1 + $0x30] sm:$0xff]   ;;  %v1834_v10 = vld [vmem:[%s2425_s1 + $0x28] sm:$0xff]   ;;  %v286_v40 = vunpack.c.0.s8 %v285_v37 }
   0x4   :  { %v1827_v3 = vld [vmem:[%s2425_s1 + $0xb8] sm:$0xff]   ;;  %1647 = vmatpush3.bf16.msra.mxu0 %v1826_v2  ;;  %v1831_v7 = vld [vmem:[%s2425_s1 + $0xb0] sm:$0xff]   ;;  %v1835_v11 = vld [vmem:[%s2425_s1 + $0xa8] sm:$0xff]  }
   0x5   :  { %1669 = vmatpush3.bf16.msra.mxu1 %v1827_v3  ;;  %1648 = vmatprep.subr.bf16.mxu0 %v1828_v4  ;;  %v1836_v12 = vld [vmem:[%s2425_s1 + $0x60] sm:$0xff]   ;;  %v1840_v16 = vld [vmem:[%s2425_s1 + $0x58] sm:$0xff]   ;;  %v1844_v20 = vld [vmem:[%s2425_s1 + $0x50] sm:$0xff]   ;;  %v2108_v41 = vsub.s32 %v286_v40, %v288_v33 }
   0x6   :  { %1670 = vmatprep.subr.bf16.mxu1 %v1829_v5  ;;  %v1837_v13 = vld [vmem:[%s2425_s1 + $0xe0] sm:$0xff]   ;;  %v1841_v17 = vld [vmem:[%s2425_s1 + $0xd8] sm:$0xff]   ;;  %v1845_v21 = vld [vmem:[%s2425_s1 + $0xd0] sm:$0xff]  }
   0x7   :  { %v1838_v14 = vld [vmem:[%s2425_s1 + $0x20] sm:$0xff]   ;;  %v1842_v18 = vld [vmem:[%s2425_s1 + $0x18] sm:$0xff]   ;;  %v1846_v22 = vld [vmem:[%s2425_s1 + $0x10] sm:$0xff]  }
   0x8   :  { %1649 = vmatpush3.bf16.msra.mxu0 %v1830_v6  ;;  %v1839_v15 = vld [vmem:[%s2425_s1 + $0xa0] sm:$0xff]   ;;  %v1843_v19 = vld [vmem:[%s2425_s1 + $0x98] sm:$0xff]   ;;  %v1847_v23 = vld [vmem:[%s2425_s1 + $0x90] sm:$0xff]  }
   0x9   :  { %1671 = vmatpush3.bf16.msra.mxu1 %v1831_v7  ;;  %1650 = vmatprep.subr.bf16.mxu0 %v1832_v8  ;;  %v1848_v24 = vld [vmem:[%s2425_s1 + $0x48] sm:$0xff]   ;;  %v1852_v29 = vld [vmem:[%s2425_s1 + $0x40] sm:$0xff]   ;;  %v1857_v35 = vld [vmem:[%s2425_s1 + $0x178] sm:$0xff]  }
   0xa   :  { %1672 = vmatprep.subr.bf16.mxu1 %v1833_v9  ;;  %v1849_v25 = vld [vmem:[%s2425_s1 + $0xc8] sm:$0xff]   ;;  %v1853_v30 = vld [vmem:[%s2425_s1 + $0xc0] sm:$0xff]   ;;  %v1858_v38 = vld [vmem:[%s2425_s1 + $0x1f8] sm:$0xff]  }
   0xb   :  { %v1850_v26 = vld [vmem:[%s2425_s1 + $0x8] sm:$0xff]   ;;  %v1854_v31 = vld [vmem:[%s2425_s1] sm:$0xff]   ;;  %v1859_v48 = vld [vmem:[%s2425_s1 + $0x138] sm:$0xff]  }
   0xc   :  { %1651 = vmatpush3.bf16.msra.mxu0 %v1834_v10  ;;  %v1851_v27 = vld [vmem:[%s2425_s1 + $0x88] sm:$0xff]   ;;  %v1855_v32 = vld [vmem:[%s2425_s1 + $0x80] sm:$0xff]   ;;  %v1861_v51 = vld [vmem:[%s2425_s1 + $0x170] sm:$0xff]  }
   0xd   :  { %1673 = vmatpush3.bf16.msra.mxu1 %v1835_v11  ;;  %1652 = vmatprep.subr.bf16.mxu0 %v1836_v12  ;;  %v16_v34 = vld [vmem:[%s2424_s0] sm:$0xff]  ;;  %v1860_v53 = vld [vmem:[%s2425_s1 + $0x1b8] sm:$0xff]   ;;  %v1862_v54 = vld [vmem:[%s2425_s1 + $0x1f0] sm:$0xff]  }
   0xe   :  { %1674 = vmatprep.subr.bf16.mxu1 %v1837_v13  ;;  %v283_v39 = vcombine.high %v16_v34, %v16_v34  ;;  %v290_v42 = vrot.slane %v16_v34, %v2108_v41  ;;  %v1863_v56 = vld [vmem:[%s2425_s1 + $0x130] sm:$0xff]   ;;  %v1865_v57 = vld [vmem:[%s2425_s1 + $0x168] sm:$0xff]   ;;  %v1869_v61 = vld [vmem:[%s2425_s1 + $0x160] sm:$0xff]  }
   0xf   :  { %v1864_v58 = vld [vmem:[%s2425_s1 + $0x1b0] sm:$0xff]   ;;  %v1866_v59 = vld [vmem:[%s2425_s1 + $0x1e8] sm:$0xff]   ;;  %v1870_v63 = vld [vmem:[%s2425_s1 + $0x1e0] sm:$0xff]  }
  0x10   :  { %1653 = vmatpush3.bf16.msra.mxu0 %v1838_v14  ;;  %v2112_v43 = vrot.slane %v283_v39, %v2108_v41  ;;  %v298_v44 = vcombine.high %v290_v42, %v290_v42  ;;  %v306_v45 = vrot.slane %v290_v42, %v2108_v41  ;;  %v1867_v60 = vld [vmem:[%s2425_s1 + $0x128] sm:$0xff]   ;;  %v1871_v0 = vld [vmem:[%s2425_s1 + $0x120] sm:$0xff]   ;;  %v1873_v1 = vld [vmem:[%s2425_s1 + $0x158] sm:$0xff]  }
  0x11   :  { %1675 = vmatpush3.bf16.msra.mxu1 %v1839_v15  ;;  %1654 = vmatprep.subr.bf16.mxu0 %v1840_v16  ;;  %v1868_v62 = vld [vmem:[%s2425_s1 + $0x1a8] sm:$0xff]   ;;  %v1872_v2 = vld [vmem:[%s2425_s1 + $0x1a0] sm:$0xff]   ;;  %v1874_v3 = vld [vmem:[%s2425_s1 + $0x1d8] sm:$0xff]  }
  0x12   :  { %1676 = vmatprep.subr.bf16.mxu1 %v1841_v17  ;;  %v299_v46 = vcombine.high %v2112_v43, %v2112_v43  ;;  %v320_v47 = vrot.slane %v298_v44, %v2108_v41  ;;  %v328_v50 = vcombine.high %v306_v45, %v306_v45  ;;  %v1875_v4 = vld [vmem:[%s2425_s1 + $0x118] sm:$0xff]   ;;  %v1877_v5 = vld [vmem:[%s2425_s1 + $0x150] sm:$0xff]   ;;  %v1881_v9 = vld [vmem:[%s2425_s1 + $0x148] sm:$0xff]   ;;  %v313_v17 = vrot.slane %v2112_v43, %v2108_v41 }
  0x13   :  { %v1876_v6 = vld [vmem:[%s2425_s1 + $0x198] sm:$0xff]   ;;  %v1878_v7 = vld [vmem:[%s2425_s1 + $0x1d0] sm:$0xff]   ;;  %v1882_v11 = vld [vmem:[%s2425_s1 + $0x1c8] sm:$0xff]  }
  0x14   :  { %1655 = vmatpush3.bf16.msra.mxu0 %v1842_v18  ;;  %v327_v49 = vrot.slane %v299_v46, %v2108_v41  ;;  %1197 = vmatprep.mubr.bf16.mxu0 %v320_v47  ;;  %v330_v52 = vcombine.high %v320_v47, %v320_v47  ;;  %v1879_v8 = vld [vmem:[%s2425_s1 + $0x110] sm:$0xff]   ;;  %v1883_v12 = vld [vmem:[%s2425_s1 + $0x108] sm:$0xff]   ;;  %v1885_v13 = vld [vmem:[%s2425_s1 + $0x140] sm:$0xff]  }
  0x15   :  { %1677 = vmatpush3.bf16.msra.mxu1 %v1843_v19  ;;  %1656 = vmatprep.subr.bf16.mxu0 %v1844_v20  ;;  %v1880_v10 = vld [vmem:[%s2425_s1 + $0x190] sm:$0xff]   ;;  %v1884_v14 = vld [vmem:[%s2425_s1 + $0x188] sm:$0xff]   ;;  %v1886_v15 = vld [vmem:[%s2425_s1 + $0x1c0] sm:$0xff]  }
  0x16   :  { %1678 = vmatprep.subr.bf16.mxu1 %v1845_v21  ;;  %v331_v55 = vcombine.high %v327_v49, %v327_v49  ;;  %1237 = vmatprep.mubr.bf16.mxu1 %v330_v52  ;;  %v1887_v16 = vld [vmem:[%s2425_s1 + $0x100] sm:$0xff]   ;;  %v1889_v18 = vld [vmem:[%s2425_s1 + $0x278] sm:$0xff]   ;;  %v1900_v33 = vld [vmem:[%s2425_s1 + $0x2a8] sm:$0xff]  }
  0x17   :  { %v1888_v19 = vld [vmem:[%s2425_s1 + $0x180] sm:$0xff]   ;;  %v1890_v20 = vld [vmem:[%s2425_s1 + $0x2f8] sm:$0xff]   ;;  %v1909_v40 = vld [vmem:[%s2425_s1 + $0x250] sm:$0xff]  }
  0x18   :  { %1657 = vmatpush3.bf16.msra.mxu0 %v1846_v22  ;;  %v1891_v21 = vld [vmem:[%s2425_s1 + $0x238] sm:$0xff]   ;;  %v329_v22 = vcombine.high %v313_v17, %v313_v17  ;;  %v1902_v34 = vld [vmem:[%s2425_s1 + $0x2e0] sm:$0xff]   ;;  %v1910_v43 = vld [vmem:[%s2425_s1 + $0x2d0] sm:$0xff]  }
  0x19   :  { %1679 = vmatpush3.bf16.msra.mxu1 %v1847_v23  ;;  %1658 = vmatprep.subr.bf16.mxu0 %v1848_v24  ;;  %v1893_v23 = vld [vmem:[%s2425_s1 + $0x270] sm:$0xff]   ;;  %v1892_v24 = vld [vmem:[%s2425_s1 + $0x2b8] sm:$0xff]   ;;  %v1904_v37 = vld [vmem:[%s2425_s1 + $0x2a0] sm:$0xff]  }
  0x1a   :  { %1680 = vmatprep.subr.bf16.mxu1 %v1849_v25  ;;  %v1894_v25 = vld [vmem:[%s2425_s1 + $0x2f0] sm:$0xff]   ;;  %v1905_v36 = vld [vmem:[%s2425_s1 + $0x258] sm:$0xff]   ;;  %v17_v46 = vld [vmem:[%s2424_s0 + $0x8] sm:$0xff] }
  0x1b   :  { %v1907_v39 = vld [vmem:[%s2425_s1 + $0x218] sm:$0xff]   ;;  %v1911_v44 = vld [vmem:[%s2425_s1 + $0x210] sm:$0xff]  }
  0x1c   :  { %1659 = vmatpush3.bf16.msra.mxu0 %v1850_v26  ;;  %v1895_v26 = vld [vmem:[%s2425_s1 + $0x230] sm:$0xff]   ;;  %v1908_v42 = vld [vmem:[%s2425_s1 + $0x298] sm:$0xff]  }
  0x1d   :  { %1681 = vmatpush3.bf16.msra.mxu1 %v1851_v27  ;;  %1660 = vmatprep.subr.bf16.mxu0 %v1852_v29  ;;  %v1897_v27 = vld [vmem:[%s2425_s1 + $0x268] sm:$0xff]   ;;  %v1896_v29 = vld [vmem:[%s2425_s1 + $0x2b0] sm:$0xff]  }
  0x1e   :  { %1682 = vmatprep.subr.bf16.mxu1 %v1853_v30  ;;  %v1898_v30 = vld [vmem:[%s2425_s1 + $0x2e8] sm:$0xff]   ;;  %v1912_v47 = vld [vmem:[%s2425_s1 + $0x290] sm:$0xff]  }
  0x20   :  { %1661 = vmatpush3.bf16.msra.mxu0 %v1854_v31  ;;  %v1899_v31 = vld [vmem:[%s2425_s1 + $0x228] sm:$0xff]  }
  0x21   :  { %1683 = vmatpush3.bf16.msra.mxu1 %v1855_v32  ;;  %1690 = vmatprep.subr.bf16.mxu0 %v1857_v35  ;;  %v1901_v32 = vld [vmem:[%s2425_s1 + $0x260] sm:$0xff]  }
  0x22   :  { %1712 = vmatprep.subr.bf16.mxu1 %v1858_v38  ;;  %v1903_v35 = vld [vmem:[%s2425_s1 + $0x220] sm:$0xff]   ;;  %v1906_v38 = vld [vmem:[%s2425_s1 + $0x2d8] sm:$0xff]  }
  0x23   :  { %1198 = vmatmul.mubr.bf16.vlgmr.msra.gmra.mxu0 %v306_v45  ;;  %v1913_v45 = vld [vmem:[%s2425_s1 + $0x248] sm:$0xff]  }
  0x24   :  { %1691 = vmatpush3.bf16.msra.mxu0 %v1859_v48  ;;  %1238 = vmatmul.mubr.bf16.vlgmr.msra.gmra.mxu1 %v328_v50  ;;  %v339_v48 = vrot.slane %v17_v46, %v2108_v41  ;;  %v1914_v50 = vld [vmem:[%s2425_s1 + $0x2c8] sm:$0xff]  }
  0x25   :  { %1692 = vmatprep.subr.bf16.mxu0 %v1861_v51  ;;  %1713 = vmatpush3.bf16.msra.mxu1 %v1860_v53  ;;  %v1915_v51 = vld [vmem:[%s2425_s1 + $0x208] sm:$0xff]  }
  0x26   :  { %1277 = vmatprep.mubr.bf16.mxu0 %v327_v49  ;;  %1714 = vmatprep.subr.bf16.mxu1 %v1862_v54  ;;  %v332_v49 = vcombine.high %v17_v46, %v17_v46  ;;  %v347_v52 = vcombine.high %v339_v48, %v339_v48  ;;  %v1917_v54 = vld [vmem:[%s2425_s1 + $0x240] sm:$0xff]  }
  0x27   :  { %1317 = vmatprep.mubr.bf16.mxu1 %v331_v55  ;;  %v1916_v55 = vld [vmem:[%s2425_s1 + $0x288] sm:$0xff]  }
  0x28   :  { %1693 = vmatpush3.bf16.msra.mxu0 %v1863_v56  ;;  %v2297_v53 = vrot.slane %v332_v49, %v2108_v41  ;;  %v369_v56 = vrot.slane %v347_v52, %v2108_v41 }
  0x29   :  { %1694 = vmatprep.subr.bf16.mxu0 %v1865_v57  ;;  %1715 = vmatpush3.bf16.msra.mxu1 %v1864_v58  ;;  %v1918_v58 = vld [vmem:[%s2425_s1 + $0x2c0] sm:$0xff]  }
  0x2a   :  { %1716 = vmatprep.subr.bf16.mxu1 %v1866_v59  ;;  %v348_v57 = vcombine.high %v2297_v53, %v2297_v53  ;;  %v1919_v59 = vld [vmem:[%s2425_s1 + $0x200] sm:$0xff]  }
  0x2c   :  { %1695 = vmatpush3.bf16.msra.mxu0 %v1867_v60  ;;  %v379_v60 = vcombine.high %v369_v56, %v369_v56 }
  0x2d   :  { %1696 = vmatprep.subr.bf16.mxu0 %v1869_v61  ;;  %1717 = vmatpush3.bf16.msra.mxu1 %v1868_v62  ;;  %v355_v61 = vrot.slane %v339_v48, %v2108_v41  ;;  %v1921_v62 = vld [vmem:[%s2425_s1 + $0x378] sm:$0xff]  }
  0x2e   :  { %1718 = vmatprep.subr.bf16.mxu1 %v1870_v63  ;;  %v1920_v63 = vld [vmem:[%s2425_s1 + $0x280] sm:$0xff]  }
  0x30   :  { %1697 = vmatpush3.bf16.msra.mxu0 %v1871_v0  ;;  %v376_v0 = vrot.slane %v348_v57, %v2108_v41 }
  0x31   :  { %1698 = vmatprep.subr.bf16.mxu0 %v1873_v1  ;;  %1719 = vmatpush3.bf16.msra.mxu1 %v1872_v2  ;;  %v1922_v1 = vld [vmem:[%s2425_s1 + $0x3f8] sm:$0xff]  }
  0x32   :  { %1720 = vmatprep.subr.bf16.mxu1 %v1874_v3  ;;  %v1923_v2 = vld [vmem:[%s2425_s1 + $0x338] sm:$0xff]   ;;  %v377_v3 = vcombine.high %v355_v61, %v355_v61 }
  0x34   :  { %1699 = vmatpush3.bf16.msra.mxu0 %v1875_v4  ;;  %v1925_v4 = vld [vmem:[%s2425_s1 + $0x370] sm:$0xff]  }
  0x35   :  { %1700 = vmatprep.subr.bf16.mxu0 %v1877_v5  ;;  %1721 = vmatpush3.bf16.msra.mxu1 %v1876_v6  ;;  %v1924_v5 = vld [vmem:[%s2425_s1 + $0x3b8] sm:$0xff]   ;;  %v380_v6 = vcombine.high %v376_v0, %v376_v0 }
  0x36   :  { %1722 = vmatprep.subr.bf16.mxu1 %v1878_v7  ;;  %v1926_v7 = vld [vmem:[%s2425_s1 + $0x3f0] sm:$0xff]  }
  0x38   :  { %1701 = vmatpush3.bf16.msra.mxu0 %v1879_v8  ;;  %v1927_v8 = vld [vmem:[%s2425_s1 + $0x330] sm:$0xff]  }
  0x39   :  { %1702 = vmatprep.subr.bf16.mxu0 %v1881_v9  ;;  %1723 = vmatpush3.bf16.msra.mxu1 %v1880_v10  ;;  %v1929_v9 = vld [vmem:[%s2425_s1 + $0x368] sm:$0xff]   ;;  %v1928_v10 = vld [vmem:[%s2425_s1 + $0x3b0] sm:$0xff]  }
  0x3a   :  { %1724 = vmatprep.subr.bf16.mxu1 %v1882_v11  ;;  %v1930_v11 = vld [vmem:[%s2425_s1 + $0x3e8] sm:$0xff]  }
  0x3c   :  { %1703 = vmatpush3.bf16.msra.mxu0 %v1883_v12  ;;  %v1931_v12 = vld [vmem:[%s2425_s1 + $0x328] sm:$0xff]  }
  0x3d   :  { %1704 = vmatprep.subr.bf16.mxu0 %v1885_v13  ;;  %1725 = vmatpush3.bf16.msra.mxu1 %v1884_v14  ;;  %v1933_v13 = vld [vmem:[%s2425_s1 + $0x360] sm:$0xff]   ;;  %v1932_v14 = vld [vmem:[%s2425_s1 + $0x3a8] sm:$0xff]  }
  0x3e   :  { %1726 = vmatprep.subr.bf16.mxu1 %v1886_v15  ;;  %v1934_v15 = vld [vmem:[%s2425_s1 + $0x3e0] sm:$0xff]  }
  0x40   :  { %1705 = vmatpush3.bf16.msra.mxu0 %v1887_v16  ;;  %v1935_v16 = vld [vmem:[%s2425_s1 + $0x320] sm:$0xff]  }
  0x41   :  { %1734 = vmatprep.subr.bf16.mxu0 %v1889_v18  ;;  %1727 = vmatpush3.bf16.msra.mxu1 %v1888_v19  ;;  %v1936_v18 = vld [vmem:[%s2425_s1 + $0x3a0] sm:$0xff]   ;;  %v1938_v19 = vld [vmem:[%s2425_s1 + $0x3d8] sm:$0xff]  }
  0x42   :  { %1756 = vmatprep.subr.bf16.mxu1 %v1890_v20  ;;  %v1939_v20 = vld [vmem:[%s2425_s1 + $0x318] sm:$0xff]  }
  0x43   :  { %1278 = vmatmul.mubr.bf16.vlgmr.msra.gmra.mxu0 %v313_v17  ;;  %v1937_v17 = vld [vmem:[%s2425_s1 + $0x358] sm:$0xff]  }
  0x44   :  { %1735 = vmatpush3.bf16.msra.mxu0 %v1891_v21  ;;  %1318 = vmatmul.mubr.bf16.vlgmr.msra.gmra.mxu1 %v329_v22  ;;  %v1941_v21 = vld [vmem:[%s2425_s1 + $0x350] sm:$0xff]   ;;  %v1940_v22 = vld [vmem:[%s2425_s1 + $0x398] sm:$0xff]  }
  0x45   :  { %1736 = vmatprep.subr.bf16.mxu0 %v1893_v23  ;;  %1757 = vmatpush3.bf16.msra.mxu1 %v1892_v24  ;;  %v1942_v23 = vld [vmem:[%s2425_s1 + $0x3d0] sm:$0xff]  }
  0x46   :  { %1758 = vmatprep.subr.bf16.mxu1 %v1894_v25  ;;  %1357 = vmatprep.mubr.bf16.mxu0 %v369_v56  ;;  %v1943_v24 = vld [vmem:[%s2425_s1 + $0x310] sm:$0xff]   ;;  %v1945_v25 = vld [vmem:[%s2425_s1 + $0x348] sm:$0xff]  }
  0x47   :  { %1397 = vmatprep.mubr.bf16.mxu1 %v379_v60 }
  0x48   :  { %1737 = vmatpush3.bf16.msra.mxu0 %v1895_v26  ;;  %v1944_v26 = vld [vmem:[%s2425_s1 + $0x390] sm:$0xff]  }
  0x49   :  { %1738 = vmatprep.subr.bf16.mxu0 %v1897_v27  ;;  %1759 = vmatpush3.bf16.msra.mxu1 %v1896_v29 }
  0x4a   :  { %1760 = vmatprep.subr.bf16.mxu1 %v1898_v30 }
  0x4c   :  { %1739 = vmatpush3.bf16.msra.mxu0 %v1899_v31 }
  0x4d   :  { %1740 = vmatprep.subr.bf16.mxu0 %v1901_v32  ;;  %1761 = vmatpush3.bf16.msra.mxu1 %v1900_v33 }
  0x4e   :  { %1762 = vmatprep.subr.bf16.mxu1 %v1902_v34 }
  0x50   :  { %1741 = vmatpush3.bf16.msra.mxu0 %v1903_v35 }
  0x51   :  { %1742 = vmatprep.subr.bf16.mxu0 %v1905_v36  ;;  %1763 = vmatpush3.bf16.msra.mxu1 %v1904_v37 }
  0x52   :  { %1764 = vmatprep.subr.bf16.mxu1 %v1906_v38 }
  0x54   :  { %1743 = vmatpush3.bf16.msra.mxu0 %v1907_v39 }
  0x55   :  { %1744 = vmatprep.subr.bf16.mxu0 %v1909_v40  ;;  %1765 = vmatpush3.bf16.msra.mxu1 %v1908_v42 }
  0x56   :  { %1766 = vmatprep.subr.bf16.mxu1 %v1910_v43 }
  0x58   :  { %1745 = vmatpush3.bf16.msra.mxu0 %v1911_v44 }
  0x59   :  { %1746 = vmatprep.subr.bf16.mxu0 %v1913_v45  ;;  %1767 = vmatpush3.bf16.msra.mxu1 %v1912_v47 }
  0x5a   :  { %1768 = vmatprep.subr.bf16.mxu1 %v1914_v50 }
  0x5c   :  { %1747 = vmatpush3.bf16.msra.mxu0 %v1915_v51 }
  0x5d   :  { %1748 = vmatprep.subr.bf16.mxu0 %v1917_v54  ;;  %1769 = vmatpush3.bf16.msra.mxu1 %v1916_v55 }
  0x5e   :  { %1770 = vmatprep.subr.bf16.mxu1 %v1918_v58 }
  0x60   :  { %1749 = vmatpush3.bf16.msra.mxu0 %v1919_v59 }
  0x61   :  { %1778 = vmatprep.subr.bf16.mxu0 %v1921_v62  ;;  %1771 = vmatpush3.bf16.msra.mxu1 %v1920_v63 }
  0x62   :  { %1800 = vmatprep.subr.bf16.mxu1 %v1922_v1 }
  0x63   :  { %1358 = vmatmul.mubr.bf16.vlgmr.msra.gmra.mxu0 %v355_v61 }
  0x64   :  { %1779 = vmatpush3.bf16.msra.mxu0 %v1923_v2  ;;  %1437 = vmatprep.mubr.bf16.mxu0 %v376_v0 }
  0x65   :  { %1398 = vmatmul.mubr.bf16.vlgmr.msra.gmra.mxu1 %v377_v3  ;;  %1780 = vmatprep.subr.bf16.mxu0 %v1925_v4 }
  0x66   :  { %1801 = vmatpush3.bf16.msra.mxu1 %v1924_v5  ;;  %1477 = vmatprep.mubr.bf16.mxu1 %v380_v6 }
  0x67   :  { %1802 = vmatprep.subr.bf16.mxu1 %v1926_v7 }
  0x68   :  { %1781 = vmatpush3.bf16.msra.mxu0 %v1927_v8 }
  0x69   :  { %1782 = vmatprep.subr.bf16.mxu0 %v1929_v9 }
  0x6a   :  { %1803 = vmatpush3.bf16.msra.mxu1 %v1928_v10 }
  0x6b   :  { %1804 = vmatprep.subr.bf16.mxu1 %v1930_v11 }
  0x6c   :  { %1783 = vmatpush3.bf16.msra.mxu0 %v1931_v12 }
  0x6d   :  { %1784 = vmatprep.subr.bf16.mxu0 %v1933_v13 }
  0x6e   :  { %1805 = vmatpush3.bf16.msra.mxu1 %v1932_v14 }
  0x6f   :  { %1806 = vmatprep.subr.bf16.mxu1 %v1934_v15 }
  0x70   :  { %1785 = vmatpush3.bf16.msra.mxu0 %v1935_v16 }
  0x71   :  { %1786 = vmatprep.subr.bf16.mxu0 %v1937_v17 }
  0x72   :  { %1807 = vmatpush3.bf16.msra.mxu1 %v1936_v18 }
  0x73   :  { %1808 = vmatprep.subr.bf16.mxu1 %v1938_v19 }
  0x74   :  { %1787 = vmatpush3.bf16.msra.mxu0 %v1939_v20 }
  0x75   :  { %1788 = vmatprep.subr.bf16.mxu0 %v1941_v21 }
  0x76   :  { %1809 = vmatpush3.bf16.msra.mxu1 %v1940_v22 }
  0x77   :  { %8 = vsyncpa [#allocation3], 0  ;;  %1810 = vmatprep.subr.bf16.mxu1 %v1942_v23  ;;  %v1946_v27 = vld [vmem:[%s2425_s1 + $0x3c8] sm:$0xff]   ;;  %v1949_v30 = vld [vmem:[%s2425_s1 + $0x340] sm:$0xff]   ;;  %v362_v34 = vrot.slane %v2297_v53, %v2108_v41  ;;  %v1486_v12 = vand.u32 127, %v287_v28  ;;  %vm1489_vm1 = vcmask 1041408  }
  0x78   :  { %1789 = vmatpush3.bf16.msra.mxu0 %v1943_v24  ;;  %v1947_v29 = vld [vmem:[%s2425_s1 + $0x308] sm:$0xff]   ;;  %v1950_v32 = vld [vmem:[%s2425_s1 + $0x3c0] sm:$0xff]  }
  0x79   :  { %1790 = vmatprep.subr.bf16.mxu0 %v1945_v25  ;;  %v1948_v31 = vld [vmem:[%s2425_s1 + $0x388] sm:$0xff]   ;;  %v1951_v33 = vld [vmem:[%s2425_s1 + $0x300] sm:$0xff]   ;;  %v378_v36 = vcombine.high %v362_v34, %v362_v34  ;;  %vm1487_vm0 = vcmp.lt.s32.totalorder %v1486_v12, 10 }
  0x7a   :  { %1811 = vmatpush3.bf16.msra.mxu1 %v1944_v26  ;;  %v1952_v35 = vld [vmem:[%s2425_s1 + $0x380] sm:$0xff]   ;;  %s1981_s1 = smov [#allocation2]  }
  0x7b   :  { %1812 = vmatprep.subr.bf16.mxu1 %v1946_v27  ;;  %v1517_v39 = vld [vmem:[%s2426_s2] ss:$0 sm:$0xff]  ;;  %s1509_s2 = sshll.u32 %s1981_s1, 4  ;;  %s1510_s2 = int_to_ptr.vmem [resolvable:$true] %s1509_s2 }
  0x7c   :  { %1791 = vmatpush3.bf16.msra.mxu0 %v1947_v29  ;;  %s1958_s28 = scalar_lea.vmem %s1510_s2, 32  ;;  %p1963_p1 = scmp.lt.s32.totalorder %s1510_s2, %s1510_s2 }
  0x7d   :  { %1792 = vmatprep.subr.bf16.mxu0 %v1949_v30  ;;  %p1959_p0 = scmp.ne.s32.totalorder %s1510_s2, %s1958_s28  ;;  %p1964_p2 = scmp.lt.s32.totalorder %s1958_s28, %s1958_s28 }
  0x7e   :  { %1813 = vmatpush3.bf16.msra.mxu1 %v1948_v31 }
  0x7f   :  { %1814 = vmatprep.subr.bf16.mxu1 %v1950_v32  ;;  %p1965_p3 = por %p1964_p2, %p1963_p1 }
  0x80   :  { %1793 = vmatpush3.bf16.msra.mxu0 %v1951_v33 }
  0x81   :  { %p1966_p4 = pnand %p1965_p3, %p1959_p0 }
  0x82   :  { %1815 = vmatpush3.bf16.msra.mxu1 %v1952_v35 }
  0x83   :  { %1438 = vmatmul.mubr.bf16.vlgmr.msra.gmra.mxu0 %v362_v34 }
  0x85   :  { %1478 = vmatmul.mubr.bf16.vlgmr.msra.gmra.mxu1 %v378_v36 }
  0xe3   :  { %v1662_v37 = vpop.f32.mrf.mxu0 }
  0xe4   :  { %v1684_v38 = vpop.f32.mrf.mxu1 }
  0xe5   :  { %v1663_v40 = vpop.f32.mrf.mxu0 }
  0xe6   :  { %v1664_v42 = vadd.f32 %v1663_v40, %v1662_v37  ;;  %v1685_v41 = vpop.f32.mrf.mxu1 }
  0xe7   :  { %v1665_v43 = vpop.f32.mrf.mxu0  ;;  %v1686_v45 = vadd.f32 %v1685_v41, %v1684_v38 }
  0xe8   :  { %v1200_v44 = vadd.f32 %v1664_v42, %v1517_v39  ;;  %v1687_v46 = vpop.f32.mrf.mxu1 }
  0xe9   :  { %v1666_v47 = vpop.f32.mrf.mxu0 }
  0xea   :  { %v1240_v48 = vadd.f32 %v1686_v45, %v1200_v44  ;;  %v1688_v49 = vpop.f32.mrf.mxu1 }
 0x103   :  { %v1706_v50 = vpop.f32.mrf.mxu0 }
 0x104   :  { %v1728_v51 = vpop.f32.mrf.mxu1 }
 0x105   :  { %v1707_v52 = vpop.f32.mrf.mxu0 }
 0x106   :  { %v1729_v53 = vpop.f32.mrf.mxu1  ;;  %v1708_v2 = vadd.f32 %v1707_v52, %v1706_v50 }
 0x107   :  { %v1709_v54 = vpop.f32.mrf.mxu0  ;;  %v1730_v4 = vadd.f32 %v1729_v53, %v1728_v51 }
 0x108   :  { %v1731_v55 = vpop.f32.mrf.mxu1  ;;  %v1280_v3 = vadd.f32 %v1708_v2, %v1240_v48 }
 0x109   :  { %v1710_v56 = vpop.f32.mrf.mxu0 }
 0x10a   :  { %v1732_v57 = vpop.f32.mrf.mxu1  ;;  %v1320_v6 = vadd.f32 %v1730_v4, %v1280_v3 }
 0x123   :  { %v1750_v58 = vpop.f32.mrf.mxu0 }
 0x125   :  { %v1772_v59 = vpop.f32.mrf.mxu1  ;;  %v1751_v60 = vpop.f32.mrf.mxu0 }
 0x126   :  { %v1752_v5 = vadd.f32 %v1751_v60, %v1750_v58 }
 0x127   :  { %v1773_v61 = vpop.f32.mrf.mxu1  ;;  %v1753_v62 = vpop.f32.mrf.mxu0 }
 0x128   :  { %v1360_v7 = vadd.f32 %v1752_v5, %v1320_v6  ;;  %v1774_v8 = vadd.f32 %v1773_v61, %v1772_v59 }
 0x129   :  { %v1775_v63 = vpop.f32.mrf.mxu1  ;;  %v1754_v0 = vpop.f32.mrf.mxu0 }
 0x12a   :  { %v1400_v13 = vadd.f32 %v1774_v8, %v1360_v7 }
 0x12b   :  { %v1776_v1 = vpop.f32.mrf.mxu1 }
 0x143   :  { %v1794_v9 = vpop.f32.mrf.mxu0 }
 0x145   :  { %v1816_v10 = vpop.f32.mrf.mxu1  ;;  %v1795_v11 = vpop.f32.mrf.mxu0 }
 0x146   :  { %v1796_v14 = vadd.f32 %v1795_v11, %v1794_v9 }
 0x147   :  { %v1817_v15 = vpop.f32.mrf.mxu1  ;;  %v1797_v16 = vpop.f32.mrf.mxu0 }
 0x148   :  { %v1440_v17 = vadd.f32 %v1796_v14, %v1400_v13  ;;  %v1818_v18 = vadd.f32 %v1817_v15, %v1816_v10 }
 0x149   :  { %v1819_v19 = vpop.f32.mrf.mxu1  ;;  %v1798_v20 = vpop.f32.mrf.mxu0 }
 0x14a   :  { %v1480_v21 = vadd.f32 %v1818_v18, %v1440_v17 }
 0x14b   :  { %v1820_v22 = vpop.f32.mrf.mxu1 }
 0x14c   :  { %v1488_v23 = vsel %vm1487_vm0, %v1480_v21, -1e+30 }
 0x14d   :  { %v1490_v24 = vsel %vm1489_vm1, %v1488_v23, -inf }
 0x14e   :  { %1491 = vmax.xlane.f32.xlu0 %v1490_v24 }
 0x1d7   :  { %v1492_v25 = vpop.xlane.xlu0 %1491 }
 0x1d8   :  { %v1493_v26 = vsub.f32 %v1488_v23, %v1492_v25 }
 0x1da   :  { %v1494_v27 = vmul.f32 1.442695, %v1493_v26 }
 0x1dc   :  { %1954 = vpow2.f32 %v1494_v27 }
 0x1e9   :  { %v1955_v28 = vpop.eup %1954 }
 0x1ea   :  { %v1496_v29 = vsel %vm1487_vm0, %v1955_v28, 0.0 }
 0x1eb   :  { %v1497_v30 = vsel %vm1489_vm1, %v1496_v29, 0.0 }
 0x1ec   :  { %1498 = vadd.xlane.f32.xlu0 %v1497_v30 }
 0x275   :  { %v1499_v31 = vpop.xlane.xlu0 %1498 }
 0x276   :  { %1956 = vrcp.f32 %v1499_v31 }
 0x283   :  { %v1957_v32 = vpop.eup %1956 }
 0x284   :  { %v1501_v33 = vmul.f32 %v1957_v32, %v1496_v29 }
 0x286   :  { %1502 = vst [vmem:[#allocation2] sm:$0x3] %v1501_v33 }
 0x287   :  { %1969 = shalt.err (!%p1966_p4)
}
 0x288   :  { %1512 = dma.vmem_to_hbm [thread:$0]  %s1510_s2, 32, %s2427_s3, [#allocation3]  }
 0x289   :  { %1978 = dma.done.wait [#allocation3], 32  }
 0x28a   :  { %1979 = vsyncadd [#allocation3], 4294967264 }
 0x28b   :  { %1516 = vsyncpa [#allocation3], 1 }

</bundles_post_ra>
